<compile_context>
chip_gen: v7x
topology: tpu7x:2x2x1
jax: 0.10.0
libtpu: 0.0.40
codegen_flags: <defaults>
</compile_context>

<pallas_src>
import jax
import jax.numpy as jnp
from jax import lax
from jax.experimental import pallas as pl
from jax.experimental.pallas import tpu as pltpu


# ----------------------------- fused seq2seq kernel --------------------------------
def seq2seq_kernel(emb_src_ref, emb_tgt_ref,
                   enc_wih_ref, enc_whh_ref, enc_bih_ref, enc_bhh_ref,
                   dec_wih_x_ref, dec_wih_c_ref, dec_whh_ref, dec_bih_ref, dec_bhh_ref,
                   dec_wfc_x_ref, dec_wfc_h_ref, dec_wfc_c_ref, dec_bfc_ref,
                   out_ref,
                   gi_er_scr, gi_ez_scr, gi_en_scr,
                   gi_dr_scr, gi_dz_scr, gi_dn_scr,
                   hdec_scr):
    Ts, B, E = emb_src_ref.shape
    Tt = emb_tgt_ref.shape[0]
    H = enc_whh_ref.shape[-1]
    Vp = out_ref.shape[-1]
    f32, bf16 = jnp.float32, jnp.bfloat16

    def dotf(a, b):
        # bf16 operands, f32 accumulation on the MXU.
        return jnp.dot(a, b, preferred_element_type=f32)

    # ---- encoder: batched per-gate input matmuls for ALL Ts steps at once ----
    xs = emb_src_ref[...].reshape(Ts * B, E)                               # bf16
    gi_er_scr[...] = (dotf(xs, enc_wih_ref[0]) + enc_bih_ref[0]).reshape(Ts, B, H)
    gi_ez_scr[...] = (dotf(xs, enc_wih_ref[1]) + enc_bih_ref[1]).reshape(Ts, B, H)
    gi_en_scr[...] = (dotf(xs, enc_wih_ref[2]) + enc_bih_ref[2]).reshape(Ts, B, H)

    # Loop-invariant recurrence weights: load once, stay vreg/VMEM-resident.
    ewr, ewz, ewn = enc_whh_ref[0], enc_whh_ref[1], enc_whh_ref[2]         # bf16 (H,H)
    ebr, ebz, ebn = enc_bhh_ref[0], enc_bhh_ref[1], enc_bhh_ref[2]         # f32  (1,H)

    def gru_step(h, gi_r, gi_z, gi_n, w_r, w_z, w_n, b_r, b_z, b_n):
        # h kept in f32; only the MXU operand is cast to bf16 (gate math stays f32,
        # since v5e has no bf16 VPU/EUP).
        hb = h.astype(bf16)
        gh_r = dotf(hb, w_r) + b_r
        gh_z = dotf(hb, w_z) + b_z
        gh_n = dotf(hb, w_n) + b_n
        r = jax.nn.sigmoid(gi_r + gh_r)
        z = jax.nn.sigmoid(gi_z + gh_z)
        n = jnp.tanh(gi_n + r * gh_n)
        return (1.0 - z) * n + z * h

    def enc_step(t, h):
        return gru_step(h, gi_er_scr[t], gi_ez_scr[t], gi_en_scr[t],
                        ewr, ewz, ewn, ebr, ebz, ebn)

    h0 = jnp.zeros((B, H), f32)
    ctx = lax.fori_loop(0, Ts, enc_step, h0, unroll=True)                  # encoder final hidden

    # ---- hoisted loop-invariant context contributions (computed exactly once) ----
    ctx_b = ctx.astype(bf16)
    gi_cr = dotf(ctx_b, dec_wih_c_ref[0]) + dec_bih_ref[0]                 # (B, H)
    gi_cz = dotf(ctx_b, dec_wih_c_ref[1]) + dec_bih_ref[1]
    gi_cn = dotf(ctx_b, dec_wih_c_ref[2]) + dec_bih_ref[2]
    fc_ctx = dotf(ctx_b, dec_wfc_c_ref[...]) + dec_bfc_ref[...]            # (B, Vp)

    # ---- decoder: batched per-gate input matmuls for ALL Tt steps at once ----
    xt = emb_tgt_ref[...].reshape(Tt * B, E)                               # bf16
    gi_dr_scr[...] = dotf(xt, dec_wih_x_ref[0]).reshape(Tt, B, H) + gi_cr[None, :, :]
    gi_dz_scr[...] = dotf(xt, dec_wih_x_ref[1]).reshape(Tt, B, H) + gi_cz[None, :, :]
    gi_dn_scr[...] = dotf(xt, dec_wih_x_ref[2]).reshape(Tt, B, H) + gi_cn[None, :, :]

    dwr, dwz, dwn = dec_whh_ref[0], dec_whh_ref[1], dec_whh_ref[2]
    dbr, dbz, dbn = dec_bhh_ref[0], dec_bhh_ref[1], dec_bhh_ref[2]

    # ---- decoder recurrence: only h@W_hh (bf16 MXU) + f32 gate math per step ----
    def dec_step(t, h):
        h_new = gru_step(h, gi_dr_scr[t], gi_dz_scr[t], gi_dn_scr[t],
                         dwr, dwz, dwn, dbr, dbz, dbn)
        hdec_scr[t] = h_new.astype(bf16)
        return h_new

    lax.fori_loop(0, Tt, dec_step, ctx, unroll=True)                       # decoder h0 = ctx

    # ---- batched, lane-dense vocab projection (no sequential dependence) ----
    hs = hdec_scr[...].reshape(Tt * B, H)                                  # bf16
    logits = dotf(xt, dec_wfc_x_ref[...]) + dotf(hs, dec_wfc_h_ref[...])   # (Tt*B, Vp) f32
    out_ref[...] = logits.reshape(Tt, B, Vp) + fc_ctx[None, :, :]


def _full_spec(shape):
    zeros = (0,) * len(shape)
    return pl.BlockSpec(shape, lambda i, _z=zeros: _z)


def run_seq2seq(emb_src, emb_tgt, kp):
    Ts, B, _ = emb_src.shape
    Tt = emb_tgt.shape[0]
    H = kp["H"]
    Vp = kp["Vp"]

    args = (emb_src, emb_tgt,
            kp["enc_wih"], kp["enc_whh"], kp["enc_bih"], kp["enc_bhh"],
            kp["dec_wih_x"], kp["dec_wih_c"], kp["dec_whh"], kp["dec_bih"], kp["dec_bhh"],
            kp["dec_wfc_x"], kp["dec_wfc_h"], kp["dec_wfc_c"], kp["dec_bfc"])

    in_specs = [_full_spec(a.shape) for a in args]

    out = pl.pallas_call(
        seq2seq_kernel,
        out_shape=jax.ShapeDtypeStruct((Tt, B, Vp), jnp.float32),
        grid_spec=pltpu.PrefetchScalarGridSpec(
            num_scalar_prefetch=0,
            grid=(1,),
            in_specs=in_specs,
            out_specs=_full_spec((Tt, B, Vp)),
            scratch_shapes=[
                pltpu.VMEM((Ts, B, H), jnp.float32),   # encoder gi (r)
                pltpu.VMEM((Ts, B, H), jnp.float32),   # encoder gi (z)
                pltpu.VMEM((Ts, B, H), jnp.float32),   # encoder gi (n)
                pltpu.VMEM((Tt, B, H), jnp.float32),   # decoder gi (r), ctx folded in
                pltpu.VMEM((Tt, B, H), jnp.float32),   # decoder gi (z)
                pltpu.VMEM((Tt, B, H), jnp.float32),   # decoder gi (n)
                pltpu.VMEM((Tt, B, H), jnp.bfloat16),  # decoder hidden states for batched fc
            ],
        ),
        compiler_params=pltpu.CompilerParams(
            dimension_semantics=("arbitrary",),
            vmem_limit_bytes=32 * 1024 * 1024,
        ),
    )(*args)
    return out


# ----------------------------- one-time parameter preparation ----------------------
def prepare_params(params):
    """One-time (outside the per-call path): per-gate split, bf16 cast, Vp lane-padding."""
    H = params["enc_whh"].shape[0]
    V = params["dec_wfc_x"].shape[1]
    Vp = max(128, ((V + 127) // 128) * 128)
    bf = jnp.bfloat16

    def split_w(w):   # (in, 3H) -> (3, in, H)   gate order r, z, n
        return jnp.stack([w[:, :H], w[:, H:2 * H], w[:, 2 * H:]], axis=0)

    def split_b(b):   # (1, 3H) -> (3, 1, H)
        return jnp.stack([b[:, :H], b[:, H:2 * H], b[:, 2 * H:]], axis=0)

    pad_v = lambda w: jnp.pad(w, ((0, 0), (0, Vp - V)))

    return {
        "H": H, "V": V, "Vp": Vp,
        "enc_emb": params["enc_emb"].astype(bf),
        "dec_emb": params["dec_emb"].astype(bf),
        "enc_wih": split_w(params["enc_wih"]).astype(bf),
        "enc_whh": split_w(params["enc_whh"]).astype(bf),
        "enc_bih": split_b(params["enc_bih"]).astype(jnp.float32),
        "enc_bhh": split_b(params["enc_bhh"]).astype(jnp.float32),
        "dec_wih_x": split_w(params["dec_wih_x"]).astype(bf),
        "dec_wih_c": split_w(params["dec_wih_c"]).astype(bf),
        "dec_whh": split_w(params["dec_whh"]).astype(bf),
        "dec_bih": split_b(params["dec_bih"]).astype(jnp.float32),
        "dec_bhh": split_b(params["dec_bhh"]).astype(jnp.float32),
        "dec_wfc_x": pad_v(params["dec_wfc_x"]).astype(bf),
        "dec_wfc_h": pad_v(params["dec_wfc_h"]).astype(bf),
        "dec_wfc_c": pad_v(params["dec_wfc_c"]).astype(bf),
        "dec_bfc": pad_v(params["dec_bfc"]).astype(jnp.float32),
    }


# ----------------------------- Seq2Seq forward (glue) ------------------------------
def seq2seq_forward(kp, origin, target):
    """origin: (Ts, B) int32 tokens, target: (Tt, B) int32 tokens.
    Returns outputs: (Tt, B, V_dec) float32 logits (teacher-forced decode)."""
    emb_src = kp["enc_emb"][origin]        # (Ts, B, E) bf16 embedding lookup (glue)
    emb_tgt = kp["dec_emb"][target]        # (Tt, B, E) bf16
    out = run_seq2seq(emb_src, emb_tgt, kp)
    return out[:, :, :kp["V"]]


# ----------------------------- pure-JAX f32 reference ------------------------------
def seq2seq_ref(params, origin, target):
    H = params["enc_whh"].shape[0]
    emb_src = params["enc_emb"][origin]
    B = origin.shape[1]
    h = jnp.zeros((B, H), jnp.float32)
    for t in range(emb_src.shape[0]):
        x = emb_src[t]
        gi = x @ params["enc_wih"] + params["enc_bih"]
        gh = h @ params["enc_whh"] + params["enc_bhh"]
        r = jax.nn.sigmoid(gi[:, :H] + gh[:, :H])
        z = jax.nn.sigmoid(gi[:, H:2 * H] + gh[:, H:2 * H])
        n = jnp.tanh(gi[:, 2 * H:] + r * gh[:, 2 * H:])
        h = (1.0 - z) * n + z * h
    ctx = h
    emb_tgt = params["dec_emb"][target]
    outs = []
    for t in range(emb_tgt.shape[0]):
        x = emb_tgt[t]
        gi = x @ params["dec_wih_x"] + ctx @ params["dec_wih_c"] + params["dec_bih"]
        gh = h @ params["dec_whh"] + params["dec_bhh"]
        r = jax.nn.sigmoid(gi[:, :H] + gh[:, :H])
        z = jax.nn.sigmoid(gi[:, H:2 * H] + gh[:, H:2 * H])
        n = jnp.tanh(gi[:, 2 * H:] + r * gh[:, 2 * H:])
        h = (1.0 - z) * n + z * h
        logits = (x @ params["dec_wfc_x"] + h @ params["dec_wfc_h"]
                  + ctx @ params["dec_wfc_c"] + params["dec_bfc"])
        outs.append(logits)
    return jnp.stack(outs, axis=0)


# ----------------------------- main -------------------------------------------------
if __name__ == "__main__":
    Ts, Tt, B, E, H = 10, 8, 8, 16, 32
    V_ENC, V_DEC = 50, 64

    key = jax.random.PRNGKey(0)
    ks = jax.random.split(key, 20)
    nrm = lambda k, shape: (0.1 * jax.random.normal(k, shape)).astype(jnp.float32)

    params = {
        "enc_emb":  nrm(ks[0], (V_ENC, E)),
        "enc_wih":  nrm(ks[1], (E, 3 * H)),
        "enc_whh":  nrm(ks[2], (H, 3 * H)),
        "enc_bih":  nrm(ks[3], (1, 3 * H)),
        "enc_bhh":  nrm(ks[4], (1, 3 * H)),
        "dec_emb":  nrm(ks[5], (V_DEC, E)),
        "dec_wih_x": nrm(ks[6], (E, 3 * H)),
        "dec_wih_c": nrm(ks[7], (H, 3 * H)),
        "dec_whh":  nrm(ks[8], (H, 3 * H)),
        "dec_bih":  nrm(ks[9], (1, 3 * H)),
        "dec_bhh":  nrm(ks[10], (1, 3 * H)),
        "dec_wfc_x": nrm(ks[11], (E, V_DEC)),
        "dec_wfc_h": nrm(ks[12], (H, V_DEC)),
        "dec_wfc_c": nrm(ks[13], (H, V_DEC)),
        "dec_bfc":  nrm(ks[14], (1, V_DEC)),
    }

    origin = jax.random.randint(ks[15], (Ts, B), 0, V_ENC, dtype=jnp.int32)
    target = jax.random.randint(ks[16], (Tt, B), 0, V_DEC, dtype=jnp.int32)

    kparams = prepare_params(params)            # one-time prep (split/cast/pad), not per-call

    outputs = seq2seq_forward(kparams, origin, target)
    outputs = jax.block_until_ready(outputs)

    expected = seq2seq_ref(params, origin, target)
    assert outputs.shape == (Tt, B, V_DEC), outputs.shape
    # bf16 MXU operands (f32 accumulation) vs the pure-f32 reference: loosened tolerance.
    assert jnp.allclose(outputs, expected, atol=2e-2, rtol=2e-2), "mismatch vs JAX reference"

    print("KERNEL_OK")
</pallas_src>

<mosaic_0001>
module attributes {stable_mosaic.version = 11 : i64} {
  func.func @seq2seq_kernel(%arg0: i32, %arg1: memref<10x8x16xbf16, #tpu.memory_space<vmem>>, %arg2: memref<8x8x16xbf16, #tpu.memory_space<vmem>>, %arg3: memref<3x16x32xbf16, #tpu.memory_space<vmem>>, %arg4: memref<3x32x32xbf16, #tpu.memory_space<vmem>>, %arg5: memref<3x1x32xf32, #tpu.memory_space<vmem>>, %arg6: memref<3x1x32xf32, #tpu.memory_space<vmem>>, %arg7: memref<3x16x32xbf16, #tpu.memory_space<vmem>>, %arg8: memref<3x32x32xbf16, #tpu.memory_space<vmem>>, %arg9: memref<3x32x32xbf16, #tpu.memory_space<vmem>>, %arg10: memref<3x1x32xf32, #tpu.memory_space<vmem>>, %arg11: memref<3x1x32xf32, #tpu.memory_space<vmem>>, %arg12: memref<16x128xbf16, #tpu.memory_space<vmem>>, %arg13: memref<32x128xbf16, #tpu.memory_space<vmem>>, %arg14: memref<32x128xbf16, #tpu.memory_space<vmem>>, %arg15: memref<1x128xf32, #tpu.memory_space<vmem>>, %arg16: memref<8x8x128xf32, #tpu.memory_space<vmem>>, %arg17: memref<10x8x32xf32, #tpu.memory_space<vmem>>, %arg18: memref<10x8x32xf32, #tpu.memory_space<vmem>>, %arg19: memref<10x8x32xf32, #tpu.memory_space<vmem>>, %arg20: memref<8x8x32xf32, #tpu.memory_space<vmem>>, %arg21: memref<8x8x32xf32, #tpu.memory_space<vmem>>, %arg22: memref<8x8x32xf32, #tpu.memory_space<vmem>>, %arg23: memref<8x8x32xbf16, #tpu.memory_space<vmem>>) attributes {dimension_semantics = [#tpu.dimension_semantics<arbitrary>], iteration_bounds = array<i64: 1>, scalar_prefetch = 0 : i64, scratch_operands = 7 : i64, tpu.core_type = #tpu.core_type<tc>, window_params = [{pipeline_mode = #tpu.pipeline_mode<synchronous>, transform_indices = @transform_0, window_bounds = array<i64: 10, 8, 16>}, {pipeline_mode = #tpu.pipeline_mode<synchronous>, transform_indices = @transform_1, window_bounds = array<i64: 8, 8, 16>}, {pipeline_mode = #tpu.pipeline_mode<synchronous>, transform_indices = @transform_2, window_bounds = array<i64: 3, 16, 32>}, {pipeline_mode = #tpu.pipeline_mode<synchronous>, transform_indices = @transform_3, window_bounds = array<i64: 3, 32, 32>}, {pipeline_mode = #tpu.pipeline_mode<synchronous>, transform_indices = @transform_4, window_bounds = array<i64: 3, 1, 32>}, {pipeline_mode = #tpu.pipeline_mode<synchronous>, transform_indices = @transform_5, window_bounds = array<i64: 3, 1, 32>}, {pipeline_mode = #tpu.pipeline_mode<synchronous>, transform_indices = @transform_6, window_bounds = array<i64: 3, 16, 32>}, {pipeline_mode = #tpu.pipeline_mode<synchronous>, transform_indices = @transform_7, window_bounds = array<i64: 3, 32, 32>}, {pipeline_mode = #tpu.pipeline_mode<synchronous>, transform_indices = @transform_8, window_bounds = array<i64: 3, 32, 32>}, {pipeline_mode = #tpu.pipeline_mode<synchronous>, transform_indices = @transform_9, window_bounds = array<i64: 3, 1, 32>}, {pipeline_mode = #tpu.pipeline_mode<synchronous>, transform_indices = @transform_10, window_bounds = array<i64: 3, 1, 32>}, {pipeline_mode = #tpu.pipeline_mode<synchronous>, transform_indices = @transform_11, window_bounds = array<i64: 16, 128>}, {pipeline_mode = #tpu.pipeline_mode<synchronous>, transform_indices = @transform_12, window_bounds = array<i64: 32, 128>}, {pipeline_mode = #tpu.pipeline_mode<synchronous>, transform_indices = @transform_13, window_bounds = array<i64: 32, 128>}, {pipeline_mode = #tpu.pipeline_mode<synchronous>, transform_indices = @transform_14, window_bounds = array<i64: 1, 128>}, {pipeline_mode = #tpu.pipeline_mode<synchronous>, transform_indices = @transform_15, window_bounds = array<i64: 8, 8, 128>}]} {
    %c0 = arith.constant 0 : index
    %c0_0 = arith.constant 0 : index
    %c0_1 = arith.constant 0 : index
    %0 = vector.load %arg1[%c0, %c0_0, %c0_1] : memref<10x8x16xbf16, #tpu.memory_space<vmem>>, vector<10x8x16xbf16>
    %1 = vector.shape_cast %0 : vector<10x8x16xbf16> to vector<80x16xbf16>
    %c0_2 = arith.constant 0 : index
    %c0_3 = arith.constant 0 : index
    %c0_4 = arith.constant 0 : index
    %2 = vector.load %arg3[%c0_2, %c0_3, %c0_4] : memref<3x16x32xbf16, #tpu.memory_space<vmem>>, vector<1x16x32xbf16>
    %3 = vector.shape_cast %2 : vector<1x16x32xbf16> to vector<16x32xbf16>
    %cst = arith.constant dense<0.000000e+00> : vector<80x32xf32>
    %4 = tpu.matmul %1, %3, %cst {dimension_numbers = #tpu.dot_dimension_numbers<[1], [0], [0], [1], [0, 0, 1, 1], [], []>} : vector<80x16xbf16>, vector<16x32xbf16>, vector<80x32xf32> -> vector<80x32xf32>
    %c0_5 = arith.constant 0 : index
    %c0_6 = arith.constant 0 : index
    %c0_7 = arith.constant 0 : index
    %5 = vector.load %arg5[%c0_5, %c0_6, %c0_7] : memref<3x1x32xf32, #tpu.memory_space<vmem>>, vector<1x1x32xf32>
    %6 = vector.shape_cast %5 : vector<1x1x32xf32> to vector<1x32xf32>
    %7 = vector.broadcast %6 : vector<1x32xf32> to vector<80x32xf32>
    %8 = arith.addf %4, %7 : vector<80x32xf32>
    %9 = vector.shape_cast %8 : vector<80x32xf32> to vector<10x8x32xf32>
    %c0_8 = arith.constant 0 : index
    %c0_9 = arith.constant 0 : index
    %c0_10 = arith.constant 0 : index
    %10 = vector.load %arg17[%c0_8, %c0_9, %c0_10] : memref<10x8x32xf32, #tpu.memory_space<vmem>>, vector<10x8x32xf32>
    tpu.vector_store %arg17[%c0_8, %c0_9, %c0_10], %9 {strides = array<i32>} : memref<10x8x32xf32, #tpu.memory_space<vmem>>, vector<10x8x32xf32>,
    %c1 = arith.constant 1 : index
    %c0_11 = arith.constant 0 : index
    %c0_12 = arith.constant 0 : index
    %11 = vector.load %arg3[%c1, %c0_11, %c0_12] : memref<3x16x32xbf16, #tpu.memory_space<vmem>>, vector<1x16x32xbf16>
    %12 = vector.shape_cast %11 : vector<1x16x32xbf16> to vector<16x32xbf16>
    %cst_13 = arith.constant dense<0.000000e+00> : vector<80x32xf32>
    %13 = tpu.matmul %1, %12, %cst_13 {dimension_numbers = #tpu.dot_dimension_numbers<[1], [0], [0], [1], [0, 0, 1, 1], [], []>} : vector<80x16xbf16>, vector<16x32xbf16>, vector<80x32xf32> -> vector<80x32xf32>
    %c1_14 = arith.constant 1 : index
    %c0_15 = arith.constant 0 : index
    %c0_16 = arith.constant 0 : index
    %14 = vector.load %arg5[%c1_14, %c0_15, %c0_16] : memref<3x1x32xf32, #tpu.memory_space<vmem>>, vector<1x1x32xf32>
    %15 = vector.shape_cast %14 : vector<1x1x32xf32> to vector<1x32xf32>
    %16 = vector.broadcast %15 : vector<1x32xf32> to vector<80x32xf32>
    %17 = arith.addf %13, %16 : vector<80x32xf32>
    %18 = vector.shape_cast %17 : vector<80x32xf32> to vector<10x8x32xf32>
    %c0_17 = arith.constant 0 : index
    %c0_18 = arith.constant 0 : index
    %c0_19 = arith.constant 0 : index
    %19 = vector.load %arg18[%c0_17, %c0_18, %c0_19] : memref<10x8x32xf32, #tpu.memory_space<vmem>>, vector<10x8x32xf32>
    tpu.vector_store %arg18[%c0_17, %c0_18, %c0_19], %18 {strides = array<i32>} : memref<10x8x32xf32, #tpu.memory_space<vmem>>, vector<10x8x32xf32>,
    %c2 = arith.constant 2 : index
    %c0_20 = arith.constant 0 : index
    %c0_21 = arith.constant 0 : index
    %20 = vector.load %arg3[%c2, %c0_20, %c0_21] : memref<3x16x32xbf16, #tpu.memory_space<vmem>>, vector<1x16x32xbf16>
    %21 = vector.shape_cast %20 : vector<1x16x32xbf16> to vector<16x32xbf16>
    %cst_22 = arith.constant dense<0.000000e+00> : vector<80x32xf32>
    %22 = tpu.matmul %1, %21, %cst_22 {dimension_numbers = #tpu.dot_dimension_numbers<[1], [0], [0], [1], [0, 0, 1, 1], [], []>} : vector<80x16xbf16>, vector<16x32xbf16>, vector<80x32xf32> -> vector<80x32xf32>
    %c2_23 = arith.constant 2 : index
    %c0_24 = arith.constant 0 : index
    %c0_25 = arith.constant 0 : index
    %23 = vector.load %arg5[%c2_23, %c0_24, %c0_25] : memref<3x1x32xf32, #tpu.memory_space<vmem>>, vector<1x1x32xf32>
    %24 = vector.shape_cast %23 : vector<1x1x32xf32> to vector<1x32xf32>
    %25 = vector.broadcast %24 : vector<1x32xf32> to vector<80x32xf32>
    %26 = arith.addf %22, %25 : vector<80x32xf32>
    %27 = vector.shape_cast %26 : vector<80x32xf32> to vector<10x8x32xf32>
    %c0_26 = arith.constant 0 : index
    %c0_27 = arith.constant 0 : index
    %c0_28 = arith.constant 0 : index
    %28 = vector.load %arg19[%c0_26, %c0_27, %c0_28] : memref<10x8x32xf32, #tpu.memory_space<vmem>>, vector<10x8x32xf32>
    tpu.vector_store %arg19[%c0_26, %c0_27, %c0_28], %27 {strides = array<i32>} : memref<10x8x32xf32, #tpu.memory_space<vmem>>, vector<10x8x32xf32>,
    %c0_29 = arith.constant 0 : index
    %c0_30 = arith.constant 0 : index
    %c0_31 = arith.constant 0 : index
    %29 = vector.load %arg4[%c0_29, %c0_30, %c0_31] : memref<3x32x32xbf16, #tpu.memory_space<vmem>>, vector<1x32x32xbf16>
    %30 = vector.shape_cast %29 : vector<1x32x32xbf16> to vector<32x32xbf16>
    %c1_32 = arith.constant 1 : index
    %c0_33 = arith.constant 0 : index
    %c0_34 = arith.constant 0 : index
    %31 = vector.load %arg4[%c1_32, %c0_33, %c0_34] : memref<3x32x32xbf16, #tpu.memory_space<vmem>>, vector<1x32x32xbf16>
    %32 = vector.shape_cast %31 : vector<1x32x32xbf16> to vector<32x32xbf16>
    %c2_35 = arith.constant 2 : index
    %c0_36 = arith.constant 0 : index
    %c0_37 = arith.constant 0 : index
    %33 = vector.load %arg4[%c2_35, %c0_36, %c0_37] : memref<3x32x32xbf16, #tpu.memory_space<vmem>>, vector<1x32x32xbf16>
    %34 = vector.shape_cast %33 : vector<1x32x32xbf16> to vector<32x32xbf16>
    %c0_38 = arith.constant 0 : index
    %c0_39 = arith.constant 0 : index
    %c0_40 = arith.constant 0 : index
    %35 = vector.load %arg6[%c0_38, %c0_39, %c0_40] : memref<3x1x32xf32, #tpu.memory_space<vmem>>, vector<1x1x32xf32>
    %36 = vector.shape_cast %35 : vector<1x1x32xf32> to vector<1x32xf32>
    %c1_41 = arith.constant 1 : index
    %c0_42 = arith.constant 0 : index
    %c0_43 = arith.constant 0 : index
    %37 = vector.load %arg6[%c1_41, %c0_42, %c0_43] : memref<3x1x32xf32, #tpu.memory_space<vmem>>, vector<1x1x32xf32>
    %38 = vector.shape_cast %37 : vector<1x1x32xf32> to vector<1x32xf32>
    %c2_44 = arith.constant 2 : index
    %c0_45 = arith.constant 0 : index
    %c0_46 = arith.constant 0 : index
    %39 = vector.load %arg6[%c2_44, %c0_45, %c0_46] : memref<3x1x32xf32, #tpu.memory_space<vmem>>, vector<1x1x32xf32>
    %40 = vector.shape_cast %39 : vector<1x1x32xf32> to vector<1x32xf32>
    %cst_47 = arith.constant 0.000000e+00 : f32
    %41 = vector.broadcast %cst_47 : f32 to vector<8x32xf32>
    %c0_i32 = arith.constant 0 : i32
    %42 = arith.index_cast %c0_i32 : i32 to index
    %c0_48 = arith.constant 0 : index
    %c0_49 = arith.constant 0 : index
    %43 = vector.load %arg17[%42, %c0_48, %c0_49] : memref<10x8x32xf32, #tpu.memory_space<vmem>>, vector<1x8x32xf32>
    %44 = vector.shape_cast %43 : vector<1x8x32xf32> to vector<8x32xf32>
    %45 = arith.index_cast %c0_i32 : i32 to index
    %c0_50 = arith.constant 0 : index
    %c0_51 = arith.constant 0 : index
    %46 = vector.load %arg18[%45, %c0_50, %c0_51] : memref<10x8x32xf32, #tpu.memory_space<vmem>>, vector<1x8x32xf32>
    %47 = vector.shape_cast %46 : vector<1x8x32xf32> to vector<8x32xf32>
    %48 = arith.index_cast %c0_i32 : i32 to index
    %c0_52 = arith.constant 0 : index
    %c0_53 = arith.constant 0 : index
    %49 = vector.load %arg19[%48, %c0_52, %c0_53] : memref<10x8x32xf32, #tpu.memory_space<vmem>>, vector<1x8x32xf32>
    %50 = vector.shape_cast %49 : vector<1x8x32xf32> to vector<8x32xf32>
    %51 = arith.truncf %41 : vector<8x32xf32> to vector<8x32xbf16>
    %cst_54 = arith.constant dense<0.000000e+00> : vector<8x32xf32>
    %52 = tpu.matmul %51, %30, %cst_54 {dimension_numbers = #tpu.dot_dimension_numbers<[1], [0], [0], [1], [0, 0, 1, 1], [], []>} : vector<8x32xbf16>, vector<32x32xbf16>, vector<8x32xf32> -> vector<8x32xf32>
    %53 = vector.broadcast %36 : vector<1x32xf32> to vector<8x32xf32>
    %54 = arith.addf %52, %53 : vector<8x32xf32>
    %cst_55 = arith.constant dense<0.000000e+00> : vector<8x32xf32>
    %55 = tpu.matmul %51, %32, %cst_55 {dimension_numbers = #tpu.dot_dimension_numbers<[1], [0], [0], [1], [0, 0, 1, 1], [], []>} : vector<8x32xbf16>, vector<32x32xbf16>, vector<8x32xf32> -> vector<8x32xf32>
    %56 = vector.broadcast %38 : vector<1x32xf32> to vector<8x32xf32>
    %57 = arith.addf %55, %56 : vector<8x32xf32>
    %cst_56 = arith.constant dense<0.000000e+00> : vector<8x32xf32>
    %58 = tpu.matmul %51, %34, %cst_56 {dimension_numbers = #tpu.dot_dimension_numbers<[1], [0], [0], [1], [0, 0, 1, 1], [], []>} : vector<8x32xbf16>, vector<32x32xbf16>, vector<8x32xf32> -> vector<8x32xf32>
    %59 = vector.broadcast %40 : vector<1x32xf32> to vector<8x32xf32>
    %60 = arith.addf %58, %59 : vector<8x32xf32>
    %61 = arith.addf %44, %54 : vector<8x32xf32>
    %62 = arith.negf %61 : vector<8x32xf32>
    %63 = math.exp %62 : vector<8x32xf32>
    %cst_57 = arith.constant 1.000000e+00 : f32
    %64 = vector.broadcast %cst_57 : f32 to vector<8x32xf32>
    %65 = arith.addf %64, %63 : vector<8x32xf32>
    %66 = arith.divf %64, %65 : vector<8x32xf32>
    %67 = arith.addf %47, %57 : vector<8x32xf32>
    %68 = arith.negf %67 : vector<8x32xf32>
    %69 = math.exp %68 : vector<8x32xf32>
    %cst_58 = arith.constant 1.000000e+00 : f32
    %70 = vector.broadcast %cst_58 : f32 to vector<8x32xf32>
    %71 = arith.addf %70, %69 : vector<8x32xf32>
    %72 = arith.divf %70, %71 : vector<8x32xf32>
    %73 = arith.mulf %66, %60 : vector<8x32xf32>
    %74 = arith.addf %50, %73 : vector<8x32xf32>
    %75 = math.tanh %74 : vector<8x32xf32>
    %cst_59 = arith.constant 1.000000e+00 : f32
    %76 = vector.broadcast %cst_59 : f32 to vector<8x32xf32>
    %77 = arith.subf %76, %72 : vector<8x32xf32>
    %78 = arith.mulf %77, %75 : vector<8x32xf32>
    %79 = arith.mulf %72, %41 : vector<8x32xf32>
    %80 = arith.addf %78, %79 : vector<8x32xf32>
    %c1_i32 = arith.constant 1 : i32
    %81 = arith.index_cast %c1_i32 : i32 to index
    %c0_60 = arith.constant 0 : index
    %c0_61 = arith.constant 0 : index
    %82 = vector.load %arg17[%81, %c0_60, %c0_61] : memref<10x8x32xf32, #tpu.memory_space<vmem>>, vector<1x8x32xf32>
    %83 = vector.shape_cast %82 : vector<1x8x32xf32> to vector<8x32xf32>
    %84 = arith.index_cast %c1_i32 : i32 to index
    %c0_62 = arith.constant 0 : index
    %c0_63 = arith.constant 0 : index
    %85 = vector.load %arg18[%84, %c0_62, %c0_63] : memref<10x8x32xf32, #tpu.memory_space<vmem>>, vector<1x8x32xf32>
    %86 = vector.shape_cast %85 : vector<1x8x32xf32> to vector<8x32xf32>
    %87 = arith.index_cast %c1_i32 : i32 to index
    %c0_64 = arith.constant 0 : index
    %c0_65 = arith.constant 0 : index
    %88 = vector.load %arg19[%87, %c0_64, %c0_65] : memref<10x8x32xf32, #tpu.memory_space<vmem>>, vector<1x8x32xf32>
    %89 = vector.shape_cast %88 : vector<1x8x32xf32> to vector<8x32xf32>
    %90 = arith.truncf %80 : vector<8x32xf32> to vector<8x32xbf16>
    %cst_66 = arith.constant dense<0.000000e+00> : vector<8x32xf32>
    %91 = tpu.matmul %90, %30, %cst_66 {dimension_numbers = #tpu.dot_dimension_numbers<[1], [0], [0], [1], [0, 0, 1, 1], [], []>} : vector<8x32xbf16>, vector<32x32xbf16>, vector<8x32xf32> -> vector<8x32xf32>
    %92 = vector.broadcast %36 : vector<1x32xf32> to vector<8x32xf32>
    %93 = arith.addf %91, %92 : vector<8x32xf32>
    %cst_67 = arith.constant dense<0.000000e+00> : vector<8x32xf32>
    %94 = tpu.matmul %90, %32, %cst_67 {dimension_numbers = #tpu.dot_dimension_numbers<[1], [0], [0], [1], [0, 0, 1, 1], [], []>} : vector<8x32xbf16>, vector<32x32xbf16>, vector<8x32xf32> -> vector<8x32xf32>
    %95 = vector.broadcast %38 : vector<1x32xf32> to vector<8x32xf32>
    %96 = arith.addf %94, %95 : vector<8x32xf32>
    %cst_68 = arith.constant dense<0.000000e+00> : vector<8x32xf32>
    %97 = tpu.matmul %90, %34, %cst_68 {dimension_numbers = #tpu.dot_dimension_numbers<[1], [0], [0], [1], [0, 0, 1, 1], [], []>} : vector<8x32xbf16>, vector<32x32xbf16>, vector<8x32xf32> -> vector<8x32xf32>
    %98 = vector.broadcast %40 : vector<1x32xf32> to vector<8x32xf32>
    %99 = arith.addf %97, %98 : vector<8x32xf32>
    %100 = arith.addf %83, %93 : vector<8x32xf32>
    %101 = arith.negf %100 : vector<8x32xf32>
    %102 = math.exp %101 : vector<8x32xf32>
    %cst_69 = arith.constant 1.000000e+00 : f32
    %103 = vector.broadcast %cst_69 : f32 to vector<8x32xf32>
    %104 = arith.addf %103, %102 : vector<8x32xf32>
    %105 = arith.divf %103, %104 : vector<8x32xf32>
    %106 = arith.addf %86, %96 : vector<8x32xf32>
    %107 = arith.negf %106 : vector<8x32xf32>
    %108 = math.exp %107 : vector<8x32xf32>
    %cst_70 = arith.constant 1.000000e+00 : f32
    %109 = vector.broadcast %cst_70 : f32 to vector<8x32xf32>
    %110 = arith.addf %109, %108 : vector<8x32xf32>
    %111 = arith.divf %109, %110 : vector<8x32xf32>
    %112 = arith.mulf %105, %99 : vector<8x32xf32>
    %113 = arith.addf %89, %112 : vector<8x32xf32>
    %114 = math.tanh %113 : vector<8x32xf32>
    %cst_71 = arith.constant 1.000000e+00 : f32
    %115 = vector.broadcast %cst_71 : f32 to vector<8x32xf32>
    %116 = arith.subf %115, %111 : vector<8x32xf32>
    %117 = arith.mulf %116, %114 : vector<8x32xf32>
    %118 = arith.mulf %111, %80 : vector<8x32xf32>
    %119 = arith.addf %117, %118 : vector<8x32xf32>
    %c2_i32 = arith.constant 2 : i32
    %120 = arith.index_cast %c2_i32 : i32 to index
    %c0_72 = arith.constant 0 : index
    %c0_73 = arith.constant 0 : index
    %121 = vector.load %arg17[%120, %c0_72, %c0_73] : memref<10x8x32xf32, #tpu.memory_space<vmem>>, vector<1x8x32xf32>
    %122 = vector.shape_cast %121 : vector<1x8x32xf32> to vector<8x32xf32>
    %123 = arith.index_cast %c2_i32 : i32 to index
    %c0_74 = arith.constant 0 : index
    %c0_75 = arith.constant 0 : index
    %124 = vector.load %arg18[%123, %c0_74, %c0_75] : memref<10x8x32xf32, #tpu.memory_space<vmem>>, vector<1x8x32xf32>
    %125 = vector.shape_cast %124 : vector<1x8x32xf32> to vector<8x32xf32>
    %126 = arith.index_cast %c2_i32 : i32 to index
    %c0_76 = arith.constant 0 : index
    %c0_77 = arith.constant 0 : index
    %127 = vector.load %arg19[%126, %c0_76, %c0_77] : memref<10x8x32xf32, #tpu.memory_space<vmem>>, vector<1x8x32xf32>
    %128 = vector.shape_cast %127 : vector<1x8x32xf32> to vector<8x32xf32>
    %129 = arith.truncf %119 : vector<8x32xf32> to vector<8x32xbf16>
    %cst_78 = arith.constant dense<0.000000e+00> : vector<8x32xf32>
    %130 = tpu.matmul %129, %30, %cst_78 {dimension_numbers = #tpu.dot_dimension_numbers<[1], [0], [0], [1], [0, 0, 1, 1], [], []>} : vector<8x32xbf16>, vector<32x32xbf16>, vector<8x32xf32> -> vector<8x32xf32>
    %131 = vector.broadcast %36 : vector<1x32xf32> to vector<8x32xf32>
    %132 = arith.addf %130, %131 : vector<8x32xf32>
    %cst_79 = arith.constant dense<0.000000e+00> : vector<8x32xf32>
    %133 = tpu.matmul %129, %32, %cst_79 {dimension_numbers = #tpu.dot_dimension_numbers<[1], [0], [0], [1], [0, 0, 1, 1], [], []>} : vector<8x32xbf16>, vector<32x32xbf16>, vector<8x32xf32> -> vector<8x32xf32>
    %134 = vector.broadcast %38 : vector<1x32xf32> to vector<8x32xf32>
    %135 = arith.addf %133, %134 : vector<8x32xf32>
    %cst_80 = arith.constant dense<0.000000e+00> : vector<8x32xf32>
    %136 = tpu.matmul %129, %34, %cst_80 {dimension_numbers = #tpu.dot_dimension_numbers<[1], [0], [0], [1], [0, 0, 1, 1], [], []>} : vector<8x32xbf16>, vector<32x32xbf16>, vector<8x32xf32> -> vector<8x32xf32>
    %137 = vector.broadcast %40 : vector<1x32xf32> to vector<8x32xf32>
    %138 = arith.addf %136, %137 : vector<8x32xf32>
    %139 = arith.addf %122, %132 : vector<8x32xf32>
    %140 = arith.negf %139 : vector<8x32xf32>
    %141 = math.exp %140 : vector<8x32xf32>
    %cst_81 = arith.constant 1.000000e+00 : f32
    %142 = vector.broadcast %cst_81 : f32 to vector<8x32xf32>
    %143 = arith.addf %142, %141 : vector<8x32xf32>
    %144 = arith.divf %142, %143 : vector<8x32xf32>
    %145 = arith.addf %125, %135 : vector<8x32xf32>
    %146 = arith.negf %145 : vector<8x32xf32>
    %147 = math.exp %146 : vector<8x32xf32>
    %cst_82 = arith.constant 1.000000e+00 : f32
    %148 = vector.broadcast %cst_82 : f32 to vector<8x32xf32>
    %149 = arith.addf %148, %147 : vector<8x32xf32>
    %150 = arith.divf %148, %149 : vector<8x32xf32>
    %151 = arith.mulf %144, %138 : vector<8x32xf32>
    %152 = arith.addf %128, %151 : vector<8x32xf32>
    %153 = math.tanh %152 : vector<8x32xf32>
    %cst_83 = arith.constant 1.000000e+00 : f32
    %154 = vector.broadcast %cst_83 : f32 to vector<8x32xf32>
    %155 = arith.subf %154, %150 : vector<8x32xf32>
    %156 = arith.mulf %155, %153 : vector<8x32xf32>
    %157 = arith.mulf %150, %119 : vector<8x32xf32>
    %158 = arith.addf %156, %157 : vector<8x32xf32>
    %c3_i32 = arith.constant 3 : i32
    %159 = arith.index_cast %c3_i32 : i32 to index
    %c0_84 = arith.constant 0 : index
    %c0_85 = arith.constant 0 : index
    %160 = vector.load %arg17[%159, %c0_84, %c0_85] : memref<10x8x32xf32, #tpu.memory_space<vmem>>, vector<1x8x32xf32>
    %161 = vector.shape_cast %160 : vector<1x8x32xf32> to vector<8x32xf32>
    %162 = arith.index_cast %c3_i32 : i32 to index
    %c0_86 = arith.constant 0 : index
    %c0_87 = arith.constant 0 : index
    %163 = vector.load %arg18[%162, %c0_86, %c0_87] : memref<10x8x32xf32, #tpu.memory_space<vmem>>, vector<1x8x32xf32>
    %164 = vector.shape_cast %163 : vector<1x8x32xf32> to vector<8x32xf32>
    %165 = arith.index_cast %c3_i32 : i32 to index
    %c0_88 = arith.constant 0 : index
    %c0_89 = arith.constant 0 : index
    %166 = vector.load %arg19[%165, %c0_88, %c0_89] : memref<10x8x32xf32, #tpu.memory_space<vmem>>, vector<1x8x32xf32>
    %167 = vector.shape_cast %166 : vector<1x8x32xf32> to vector<8x32xf32>
    %168 = arith.truncf %158 : vector<8x32xf32> to vector<8x32xbf16>
    %cst_90 = arith.constant dense<0.000000e+00> : vector<8x32xf32>
    %169 = tpu.matmul %168, %30, %cst_90 {dimension_numbers = #tpu.dot_dimension_numbers<[1], [0], [0], [1], [0, 0, 1, 1], [], []>} : vector<8x32xbf16>, vector<32x32xbf16>, vector<8x32xf32> -> vector<8x32xf32>
    %170 = vector.broadcast %36 : vector<1x32xf32> to vector<8x32xf32>
    %171 = arith.addf %169, %170 : vector<8x32xf32>
    %cst_91 = arith.constant dense<0.000000e+00> : vector<8x32xf32>
    %172 = tpu.matmul %168, %32, %cst_91 {dimension_numbers = #tpu.dot_dimension_numbers<[1], [0], [0], [1], [0, 0, 1, 1], [], []>} : vector<8x32xbf16>, vector<32x32xbf16>, vector<8x32xf32> -> vector<8x32xf32>
    %173 = vector.broadcast %38 : vector<1x32xf32> to vector<8x32xf32>
    %174 = arith.addf %172, %173 : vector<8x32xf32>
    %cst_92 = arith.constant dense<0.000000e+00> : vector<8x32xf32>
    %175 = tpu.matmul %168, %34, %cst_92 {dimension_numbers = #tpu.dot_dimension_numbers<[1], [0], [0], [1], [0, 0, 1, 1], [], []>} : vector<8x32xbf16>, vector<32x32xbf16>, vector<8x32xf32> -> vector<8x32xf32>
    %176 = vector.broadcast %40 : vector<1x32xf32> to vector<8x32xf32>
    %177 = arith.addf %175, %176 : vector<8x32xf32>
    %178 = arith.addf %161, %171 : vector<8x32xf32>
    %179 = arith.negf %178 : vector<8x32xf32>
    %180 = math.exp %179 : vector<8x32xf32>
    %cst_93 = arith.constant 1.000000e+00 : f32
    %181 = vector.broadcast %cst_93 : f32 to vector<8x32xf32>
    %182 = arith.addf %181, %180 : vector<8x32xf32>
    %183 = arith.divf %181, %182 : vector<8x32xf32>
    %184 = arith.addf %164, %174 : vector<8x32xf32>
    %185 = arith.negf %184 : vector<8x32xf32>
    %186 = math.exp %185 : vector<8x32xf32>
    %cst_94 = arith.constant 1.000000e+00 : f32
    %187 = vector.broadcast %cst_94 : f32 to vector<8x32xf32>
    %188 = arith.addf %187, %186 : vector<8x32xf32>
    %189 = arith.divf %187, %188 : vector<8x32xf32>
    %190 = arith.mulf %183, %177 : vector<8x32xf32>
    %191 = arith.addf %167, %190 : vector<8x32xf32>
    %192 = math.tanh %191 : vector<8x32xf32>
    %cst_95 = arith.constant 1.000000e+00 : f32
    %193 = vector.broadcast %cst_95 : f32 to vector<8x32xf32>
    %194 = arith.subf %193, %189 : vector<8x32xf32>
    %195 = arith.mulf %194, %192 : vector<8x32xf32>
    %196 = arith.mulf %189, %158 : vector<8x32xf32>
    %197 = arith.addf %195, %196 : vector<8x32xf32>
    %c4_i32 = arith.constant 4 : i32
    %198 = arith.index_cast %c4_i32 : i32 to index
    %c0_96 = arith.constant 0 : index
    %c0_97 = arith.constant 0 : index
    %199 = vector.load %arg17[%198, %c0_96, %c0_97] : memref<10x8x32xf32, #tpu.memory_space<vmem>>, vector<1x8x32xf32>
    %200 = vector.shape_cast %199 : vector<1x8x32xf32> to vector<8x32xf32>
    %201 = arith.index_cast %c4_i32 : i32 to index
    %c0_98 = arith.constant 0 : index
    %c0_99 = arith.constant 0 : index
    %202 = vector.load %arg18[%201, %c0_98, %c0_99] : memref<10x8x32xf32, #tpu.memory_space<vmem>>, vector<1x8x32xf32>
    %203 = vector.shape_cast %202 : vector<1x8x32xf32> to vector<8x32xf32>
    %204 = arith.index_cast %c4_i32 : i32 to index
    %c0_100 = arith.constant 0 : index
    %c0_101 = arith.constant 0 : index
    %205 = vector.load %arg19[%204, %c0_100, %c0_101] : memref<10x8x32xf32, #tpu.memory_space<vmem>>, vector<1x8x32xf32>
    %206 = vector.shape_cast %205 : vector<1x8x32xf32> to vector<8x32xf32>
    %207 = arith.truncf %197 : vector<8x32xf32> to vector<8x32xbf16>
    %cst_102 = arith.constant dense<0.000000e+00> : vector<8x32xf32>
    %208 = tpu.matmul %207, %30, %cst_102 {dimension_numbers = #tpu.dot_dimension_numbers<[1], [0], [0], [1], [0, 0, 1, 1], [], []>} : vector<8x32xbf16>, vector<32x32xbf16>, vector<8x32xf32> -> vector<8x32xf32>
    %209 = vector.broadcast %36 : vector<1x32xf32> to vector<8x32xf32>
    %210 = arith.addf %208, %209 : vector<8x32xf32>
    %cst_103 = arith.constant dense<0.000000e+00> : vector<8x32xf32>
    %211 = tpu.matmul %207, %32, %cst_103 {dimension_numbers = #tpu.dot_dimension_numbers<[1], [0], [0], [1], [0, 0, 1, 1], [], []>} : vector<8x32xbf16>, vector<32x32xbf16>, vector<8x32xf32> -> vector<8x32xf32>
    %212 = vector.broadcast %38 : vector<1x32xf32> to vector<8x32xf32>
    %213 = arith.addf %211, %212 : vector<8x32xf32>
    %cst_104 = arith.constant dense<0.000000e+00> : vector<8x32xf32>
    %214 = tpu.matmul %207, %34, %cst_104 {dimension_numbers = #tpu.dot_dimension_numbers<[1], [0], [0], [1], [0, 0, 1, 1], [], []>} : vector<8x32xbf16>, vector<32x32xbf16>, vector<8x32xf32> -> vector<8x32xf32>
    %215 = vector.broadcast %40 : vector<1x32xf32> to vector<8x32xf32>
    %216 = arith.addf %214, %215 : vector<8x32xf32>
    %217 = arith.addf %200, %210 : vector<8x32xf32>
    %218 = arith.negf %217 : vector<8x32xf32>
    %219 = math.exp %218 : vector<8x32xf32>
    %cst_105 = arith.constant 1.000000e+00 : f32
    %220 = vector.broadcast %cst_105 : f32 to vector<8x32xf32>
    %221 = arith.addf %220, %219 : vector<8x32xf32>
    %222 = arith.divf %220, %221 : vector<8x32xf32>
    %223 = arith.addf %203, %213 : vector<8x32xf32>
    %224 = arith.negf %223 : vector<8x32xf32>
    %225 = math.exp %224 : vector<8x32xf32>
    %cst_106 = arith.constant 1.000000e+00 : f32
    %226 = vector.broadcast %cst_106 : f32 to vector<8x32xf32>
    %227 = arith.addf %226, %225 : vector<8x32xf32>
    %228 = arith.divf %226, %227 : vector<8x32xf32>
    %229 = arith.mulf %222, %216 : vector<8x32xf32>
    %230 = arith.addf %206, %229 : vector<8x32xf32>
    %231 = math.tanh %230 : vector<8x32xf32>
    %cst_107 = arith.constant 1.000000e+00 : f32
    %232 = vector.broadcast %cst_107 : f32 to vector<8x32xf32>
    %233 = arith.subf %232, %228 : vector<8x32xf32>
    %234 = arith.mulf %233, %231 : vector<8x32xf32>
    %235 = arith.mulf %228, %197 : vector<8x32xf32>
    %236 = arith.addf %234, %235 : vector<8x32xf32>
    %c5_i32 = arith.constant 5 : i32
    %237 = arith.index_cast %c5_i32 : i32 to index
    %c0_108 = arith.constant 0 : index
    %c0_109 = arith.constant 0 : index
    %238 = vector.load %arg17[%237, %c0_108, %c0_109] : memref<10x8x32xf32, #tpu.memory_space<vmem>>, vector<1x8x32xf32>
    %239 = vector.shape_cast %238 : vector<1x8x32xf32> to vector<8x32xf32>
    %240 = arith.index_cast %c5_i32 : i32 to index
    %c0_110 = arith.constant 0 : index
    %c0_111 = arith.constant 0 : index
    %241 = vector.load %arg18[%240, %c0_110, %c0_111] : memref<10x8x32xf32, #tpu.memory_space<vmem>>, vector<1x8x32xf32>
    %242 = vector.shape_cast %241 : vector<1x8x32xf32> to vector<8x32xf32>
    %243 = arith.index_cast %c5_i32 : i32 to index
    %c0_112 = arith.constant 0 : index
    %c0_113 = arith.constant 0 : index
    %244 = vector.load %arg19[%243, %c0_112, %c0_113] : memref<10x8x32xf32, #tpu.memory_space<vmem>>, vector<1x8x32xf32>
    %245 = vector.shape_cast %244 : vector<1x8x32xf32> to vector<8x32xf32>
    %246 = arith.truncf %236 : vector<8x32xf32> to vector<8x32xbf16>
    %cst_114 = arith.constant dense<0.000000e+00> : vector<8x32xf32>
    %247 = tpu.matmul %246, %30, %cst_114 {dimension_numbers = #tpu.dot_dimension_numbers<[1], [0], [0], [1], [0, 0, 1, 1], [], []>} : vector<8x32xbf16>, vector<32x32xbf16>, vector<8x32xf32> -> vector<8x32xf32>
    %248 = vector.broadcast %36 : vector<1x32xf32> to vector<8x32xf32>
    %249 = arith.addf %247, %248 : vector<8x32xf32>
    %cst_115 = arith.constant dense<0.000000e+00> : vector<8x32xf32>
    %250 = tpu.matmul %246, %32, %cst_115 {dimension_numbers = #tpu.dot_dimension_numbers<[1], [0], [0], [1], [0, 0, 1, 1], [], []>} : vector<8x32xbf16>, vector<32x32xbf16>, vector<8x32xf32> -> vector<8x32xf32>
    %251 = vector.broadcast %38 : vector<1x32xf32> to vector<8x32xf32>
    %252 = arith.addf %250, %251 : vector<8x32xf32>
    %cst_116 = arith.constant dense<0.000000e+00> : vector<8x32xf32>
    %253 = tpu.matmul %246, %34, %cst_116 {dimension_numbers = #tpu.dot_dimension_numbers<[1], [0], [0], [1], [0, 0, 1, 1], [], []>} : vector<8x32xbf16>, vector<32x32xbf16>, vector<8x32xf32> -> vector<8x32xf32>
    %254 = vector.broadcast %40 : vector<1x32xf32> to vector<8x32xf32>
    %255 = arith.addf %253, %254 : vector<8x32xf32>
    %256 = arith.addf %239, %249 : vector<8x32xf32>
    %257 = arith.negf %256 : vector<8x32xf32>
    %258 = math.exp %257 : vector<8x32xf32>
    %cst_117 = arith.constant 1.000000e+00 : f32
    %259 = vector.broadcast %cst_117 : f32 to vector<8x32xf32>
    %260 = arith.addf %259, %258 : vector<8x32xf32>
    %261 = arith.divf %259, %260 : vector<8x32xf32>
    %262 = arith.addf %242, %252 : vector<8x32xf32>
    %263 = arith.negf %262 : vector<8x32xf32>
    %264 = math.exp %263 : vector<8x32xf32>
    %cst_118 = arith.constant 1.000000e+00 : f32
    %265 = vector.broadcast %cst_118 : f32 to vector<8x32xf32>
    %266 = arith.addf %265, %264 : vector<8x32xf32>
    %267 = arith.divf %265, %266 : vector<8x32xf32>
    %268 = arith.mulf %261, %255 : vector<8x32xf32>
    %269 = arith.addf %245, %268 : vector<8x32xf32>
    %270 = math.tanh %269 : vector<8x32xf32>
    %cst_119 = arith.constant 1.000000e+00 : f32
    %271 = vector.broadcast %cst_119 : f32 to vector<8x32xf32>
    %272 = arith.subf %271, %267 : vector<8x32xf32>
    %273 = arith.mulf %272, %270 : vector<8x32xf32>
    %274 = arith.mulf %267, %236 : vector<8x32xf32>
    %275 = arith.addf %273, %274 : vector<8x32xf32>
    %c6_i32 = arith.constant 6 : i32
    %276 = arith.index_cast %c6_i32 : i32 to index
    %c0_120 = arith.constant 0 : index
    %c0_121 = arith.constant 0 : index
    %277 = vector.load %arg17[%276, %c0_120, %c0_121] : memref<10x8x32xf32, #tpu.memory_space<vmem>>, vector<1x8x32xf32>
    %278 = vector.shape_cast %277 : vector<1x8x32xf32> to vector<8x32xf32>
    %279 = arith.index_cast %c6_i32 : i32 to index
    %c0_122 = arith.constant 0 : index
    %c0_123 = arith.constant 0 : index
    %280 = vector.load %arg18[%279, %c0_122, %c0_123] : memref<10x8x32xf32, #tpu.memory_space<vmem>>, vector<1x8x32xf32>
    %281 = vector.shape_cast %280 : vector<1x8x32xf32> to vector<8x32xf32>
    %282 = arith.index_cast %c6_i32 : i32 to index
    %c0_124 = arith.constant 0 : index
    %c0_125 = arith.constant 0 : index
    %283 = vector.load %arg19[%282, %c0_124, %c0_125] : memref<10x8x32xf32, #tpu.memory_space<vmem>>, vector<1x8x32xf32>
    %284 = vector.shape_cast %283 : vector<1x8x32xf32> to vector<8x32xf32>
    %285 = arith.truncf %275 : vector<8x32xf32> to vector<8x32xbf16>
    %cst_126 = arith.constant dense<0.000000e+00> : vector<8x32xf32>
    %286 = tpu.matmul %285, %30, %cst_126 {dimension_numbers = #tpu.dot_dimension_numbers<[1], [0], [0], [1], [0, 0, 1, 1], [], []>} : vector<8x32xbf16>, vector<32x32xbf16>, vector<8x32xf32> -> vector<8x32xf32>
    %287 = vector.broadcast %36 : vector<1x32xf32> to vector<8x32xf32>
    %288 = arith.addf %286, %287 : vector<8x32xf32>
    %cst_127 = arith.constant dense<0.000000e+00> : vector<8x32xf32>
    %289 = tpu.matmul %285, %32, %cst_127 {dimension_numbers = #tpu.dot_dimension_numbers<[1], [0], [0], [1], [0, 0, 1, 1], [], []>} : vector<8x32xbf16>, vector<32x32xbf16>, vector<8x32xf32> -> vector<8x32xf32>
    %290 = vector.broadcast %38 : vector<1x32xf32> to vector<8x32xf32>
    %291 = arith.addf %289, %290 : vector<8x32xf32>
    %cst_128 = arith.constant dense<0.000000e+00> : vector<8x32xf32>
    %292 = tpu.matmul %285, %34, %cst_128 {dimension_numbers = #tpu.dot_dimension_numbers<[1], [0], [0], [1], [0, 0, 1, 1], [], []>} : vector<8x32xbf16>, vector<32x32xbf16>, vector<8x32xf32> -> vector<8x32xf32>
    %293 = vector.broadcast %40 : vector<1x32xf32> to vector<8x32xf32>
    %294 = arith.addf %292, %293 : vector<8x32xf32>
    %295 = arith.addf %278, %288 : vector<8x32xf32>
    %296 = arith.negf %295 : vector<8x32xf32>
    %297 = math.exp %296 : vector<8x32xf32>
    %cst_129 = arith.constant 1.000000e+00 : f32
    %298 = vector.broadcast %cst_129 : f32 to vector<8x32xf32>
    %299 = arith.addf %298, %297 : vector<8x32xf32>
    %300 = arith.divf %298, %299 : vector<8x32xf32>
    %301 = arith.addf %281, %291 : vector<8x32xf32>
    %302 = arith.negf %301 : vector<8x32xf32>
    %303 = math.exp %302 : vector<8x32xf32>
    %cst_130 = arith.constant 1.000000e+00 : f32
    %304 = vector.broadcast %cst_130 : f32 to vector<8x32xf32>
    %305 = arith.addf %304, %303 : vector<8x32xf32>
    %306 = arith.divf %304, %305 : vector<8x32xf32>
    %307 = arith.mulf %300, %294 : vector<8x32xf32>
    %308 = arith.addf %284, %307 : vector<8x32xf32>
    %309 = math.tanh %308 : vector<8x32xf32>
    %cst_131 = arith.constant 1.000000e+00 : f32
    %310 = vector.broadcast %cst_131 : f32 to vector<8x32xf32>
    %311 = arith.subf %310, %306 : vector<8x32xf32>
    %312 = arith.mulf %311, %309 : vector<8x32xf32>
    %313 = arith.mulf %306, %275 : vector<8x32xf32>
    %314 = arith.addf %312, %313 : vector<8x32xf32>
    %c7_i32 = arith.constant 7 : i32
    %315 = arith.index_cast %c7_i32 : i32 to index
    %c0_132 = arith.constant 0 : index
    %c0_133 = arith.constant 0 : index
    %316 = vector.load %arg17[%315, %c0_132, %c0_133] : memref<10x8x32xf32, #tpu.memory_space<vmem>>, vector<1x8x32xf32>
    %317 = vector.shape_cast %316 : vector<1x8x32xf32> to vector<8x32xf32>
    %318 = arith.index_cast %c7_i32 : i32 to index
    %c0_134 = arith.constant 0 : index
    %c0_135 = arith.constant 0 : index
    %319 = vector.load %arg18[%318, %c0_134, %c0_135] : memref<10x8x32xf32, #tpu.memory_space<vmem>>, vector<1x8x32xf32>
    %320 = vector.shape_cast %319 : vector<1x8x32xf32> to vector<8x32xf32>
    %321 = arith.index_cast %c7_i32 : i32 to index
    %c0_136 = arith.constant 0 : index
    %c0_137 = arith.constant 0 : index
    %322 = vector.load %arg19[%321, %c0_136, %c0_137] : memref<10x8x32xf32, #tpu.memory_space<vmem>>, vector<1x8x32xf32>
    %323 = vector.shape_cast %322 : vector<1x8x32xf32> to vector<8x32xf32>
    %324 = arith.truncf %314 : vector<8x32xf32> to vector<8x32xbf16>
    %cst_138 = arith.constant dense<0.000000e+00> : vector<8x32xf32>
    %325 = tpu.matmul %324, %30, %cst_138 {dimension_numbers = #tpu.dot_dimension_numbers<[1], [0], [0], [1], [0, 0, 1, 1], [], []>} : vector<8x32xbf16>, vector<32x32xbf16>, vector<8x32xf32> -> vector<8x32xf32>
    %326 = vector.broadcast %36 : vector<1x32xf32> to vector<8x32xf32>
    %327 = arith.addf %325, %326 : vector<8x32xf32>
    %cst_139 = arith.constant dense<0.000000e+00> : vector<8x32xf32>
    %328 = tpu.matmul %324, %32, %cst_139 {dimension_numbers = #tpu.dot_dimension_numbers<[1], [0], [0], [1], [0, 0, 1, 1], [], []>} : vector<8x32xbf16>, vector<32x32xbf16>, vector<8x32xf32> -> vector<8x32xf32>
    %329 = vector.broadcast %38 : vector<1x32xf32> to vector<8x32xf32>
    %330 = arith.addf %328, %329 : vector<8x32xf32>
    %cst_140 = arith.constant dense<0.000000e+00> : vector<8x32xf32>
    %331 = tpu.matmul %324, %34, %cst_140 {dimension_numbers = #tpu.dot_dimension_numbers<[1], [0], [0], [1], [0, 0, 1, 1], [], []>} : vector<8x32xbf16>, vector<32x32xbf16>, vector<8x32xf32> -> vector<8x32xf32>
    %332 = vector.broadcast %40 : vector<1x32xf32> to vector<8x32xf32>
    %333 = arith.addf %331, %332 : vector<8x32xf32>
    %334 = arith.addf %317, %327 : vector<8x32xf32>
    %335 = arith.negf %334 : vector<8x32xf32>
    %336 = math.exp %335 : vector<8x32xf32>
    %cst_141 = arith.constant 1.000000e+00 : f32
    %337 = vector.broadcast %cst_141 : f32 to vector<8x32xf32>
    %338 = arith.addf %337, %336 : vector<8x32xf32>
    %339 = arith.divf %337, %338 : vector<8x32xf32>
    %340 = arith.addf %320, %330 : vector<8x32xf32>
    %341 = arith.negf %340 : vector<8x32xf32>
    %342 = math.exp %341 : vector<8x32xf32>
    %cst_142 = arith.constant 1.000000e+00 : f32
    %343 = vector.broadcast %cst_142 : f32 to vector<8x32xf32>
    %344 = arith.addf %343, %342 : vector<8x32xf32>
    %345 = arith.divf %343, %344 : vector<8x32xf32>
    %346 = arith.mulf %339, %333 : vector<8x32xf32>
    %347 = arith.addf %323, %346 : vector<8x32xf32>
    %348 = math.tanh %347 : vector<8x32xf32>
    %cst_143 = arith.constant 1.000000e+00 : f32
    %349 = vector.broadcast %cst_143 : f32 to vector<8x32xf32>
    %350 = arith.subf %349, %345 : vector<8x32xf32>
    %351 = arith.mulf %350, %348 : vector<8x32xf32>
    %352 = arith.mulf %345, %314 : vector<8x32xf32>
    %353 = arith.addf %351, %352 : vector<8x32xf32>
    %c8_i32 = arith.constant 8 : i32
    %354 = arith.index_cast %c8_i32 : i32 to index
    %c0_144 = arith.constant 0 : index
    %c0_145 = arith.constant 0 : index
    %355 = vector.load %arg17[%354, %c0_144, %c0_145] : memref<10x8x32xf32, #tpu.memory_space<vmem>>, vector<1x8x32xf32>
    %356 = vector.shape_cast %355 : vector<1x8x32xf32> to vector<8x32xf32>
    %357 = arith.index_cast %c8_i32 : i32 to index
    %c0_146 = arith.constant 0 : index
    %c0_147 = arith.constant 0 : index
    %358 = vector.load %arg18[%357, %c0_146, %c0_147] : memref<10x8x32xf32, #tpu.memory_space<vmem>>, vector<1x8x32xf32>
    %359 = vector.shape_cast %358 : vector<1x8x32xf32> to vector<8x32xf32>
    %360 = arith.index_cast %c8_i32 : i32 to index
    %c0_148 = arith.constant 0 : index
    %c0_149 = arith.constant 0 : index
    %361 = vector.load %arg19[%360, %c0_148, %c0_149] : memref<10x8x32xf32, #tpu.memory_space<vmem>>, vector<1x8x32xf32>
    %362 = vector.shape_cast %361 : vector<1x8x32xf32> to vector<8x32xf32>
    %363 = arith.truncf %353 : vector<8x32xf32> to vector<8x32xbf16>
    %cst_150 = arith.constant dense<0.000000e+00> : vector<8x32xf32>
    %364 = tpu.matmul %363, %30, %cst_150 {dimension_numbers = #tpu.dot_dimension_numbers<[1], [0], [0], [1], [0, 0, 1, 1], [], []>} : vector<8x32xbf16>, vector<32x32xbf16>, vector<8x32xf32> -> vector<8x32xf32>
    %365 = vector.broadcast %36 : vector<1x32xf32> to vector<8x32xf32>
    %366 = arith.addf %364, %365 : vector<8x32xf32>
    %cst_151 = arith.constant dense<0.000000e+00> : vector<8x32xf32>
    %367 = tpu.matmul %363, %32, %cst_151 {dimension_numbers = #tpu.dot_dimension_numbers<[1], [0], [0], [1], [0, 0, 1, 1], [], []>} : vector<8x32xbf16>, vector<32x32xbf16>, vector<8x32xf32> -> vector<8x32xf32>
    %368 = vector.broadcast %38 : vector<1x32xf32> to vector<8x32xf32>
    %369 = arith.addf %367, %368 : vector<8x32xf32>
    %cst_152 = arith.constant dense<0.000000e+00> : vector<8x32xf32>
    %370 = tpu.matmul %363, %34, %cst_152 {dimension_numbers = #tpu.dot_dimension_numbers<[1], [0], [0], [1], [0, 0, 1, 1], [], []>} : vector<8x32xbf16>, vector<32x32xbf16>, vector<8x32xf32> -> vector<8x32xf32>
    %371 = vector.broadcast %40 : vector<1x32xf32> to vector<8x32xf32>
    %372 = arith.addf %370, %371 : vector<8x32xf32>
    %373 = arith.addf %356, %366 : vector<8x32xf32>
    %374 = arith.negf %373 : vector<8x32xf32>
    %375 = math.exp %374 : vector<8x32xf32>
    %cst_153 = arith.constant 1.000000e+00 : f32
    %376 = vector.broadcast %cst_153 : f32 to vector<8x32xf32>
    %377 = arith.addf %376, %375 : vector<8x32xf32>
    %378 = arith.divf %376, %377 : vector<8x32xf32>
    %379 = arith.addf %359, %369 : vector<8x32xf32>
    %380 = arith.negf %379 : vector<8x32xf32>
    %381 = math.exp %380 : vector<8x32xf32>
    %cst_154 = arith.constant 1.000000e+00 : f32
    %382 = vector.broadcast %cst_154 : f32 to vector<8x32xf32>
    %383 = arith.addf %382, %381 : vector<8x32xf32>
    %384 = arith.divf %382, %383 : vector<8x32xf32>
    %385 = arith.mulf %378, %372 : vector<8x32xf32>
    %386 = arith.addf %362, %385 : vector<8x32xf32>
    %387 = math.tanh %386 : vector<8x32xf32>
    %cst_155 = arith.constant 1.000000e+00 : f32
    %388 = vector.broadcast %cst_155 : f32 to vector<8x32xf32>
    %389 = arith.subf %388, %384 : vector<8x32xf32>
    %390 = arith.mulf %389, %387 : vector<8x32xf32>
    %391 = arith.mulf %384, %353 : vector<8x32xf32>
    %392 = arith.addf %390, %391 : vector<8x32xf32>
    %c9_i32 = arith.constant 9 : i32
    %393 = arith.index_cast %c9_i32 : i32 to index
    %c0_156 = arith.constant 0 : index
    %c0_157 = arith.constant 0 : index
    %394 = vector.load %arg17[%393, %c0_156, %c0_157] : memref<10x8x32xf32, #tpu.memory_space<vmem>>, vector<1x8x32xf32>
    %395 = vector.shape_cast %394 : vector<1x8x32xf32> to vector<8x32xf32>
    %396 = arith.index_cast %c9_i32 : i32 to index
    %c0_158 = arith.constant 0 : index
    %c0_159 = arith.constant 0 : index
    %397 = vector.load %arg18[%396, %c0_158, %c0_159] : memref<10x8x32xf32, #tpu.memory_space<vmem>>, vector<1x8x32xf32>
    %398 = vector.shape_cast %397 : vector<1x8x32xf32> to vector<8x32xf32>
    %399 = arith.index_cast %c9_i32 : i32 to index
    %c0_160 = arith.constant 0 : index
    %c0_161 = arith.constant 0 : index
    %400 = vector.load %arg19[%399, %c0_160, %c0_161] : memref<10x8x32xf32, #tpu.memory_space<vmem>>, vector<1x8x32xf32>
    %401 = vector.shape_cast %400 : vector<1x8x32xf32> to vector<8x32xf32>
    %402 = arith.truncf %392 : vector<8x32xf32> to vector<8x32xbf16>
    %cst_162 = arith.constant dense<0.000000e+00> : vector<8x32xf32>
    %403 = tpu.matmul %402, %30, %cst_162 {dimension_numbers = #tpu.dot_dimension_numbers<[1], [0], [0], [1], [0, 0, 1, 1], [], []>} : vector<8x32xbf16>, vector<32x32xbf16>, vector<8x32xf32> -> vector<8x32xf32>
    %404 = vector.broadcast %36 : vector<1x32xf32> to vector<8x32xf32>
    %405 = arith.addf %403, %404 : vector<8x32xf32>
    %cst_163 = arith.constant dense<0.000000e+00> : vector<8x32xf32>
    %406 = tpu.matmul %402, %32, %cst_163 {dimension_numbers = #tpu.dot_dimension_numbers<[1], [0], [0], [1], [0, 0, 1, 1], [], []>} : vector<8x32xbf16>, vector<32x32xbf16>, vector<8x32xf32> -> vector<8x32xf32>
    %407 = vector.broadcast %38 : vector<1x32xf32> to vector<8x32xf32>
    %408 = arith.addf %406, %407 : vector<8x32xf32>
    %cst_164 = arith.constant dense<0.000000e+00> : vector<8x32xf32>
    %409 = tpu.matmul %402, %34, %cst_164 {dimension_numbers = #tpu.dot_dimension_numbers<[1], [0], [0], [1], [0, 0, 1, 1], [], []>} : vector<8x32xbf16>, vector<32x32xbf16>, vector<8x32xf32> -> vector<8x32xf32>
    %410 = vector.broadcast %40 : vector<1x32xf32> to vector<8x32xf32>
    %411 = arith.addf %409, %410 : vector<8x32xf32>
    %412 = arith.addf %395, %405 : vector<8x32xf32>
    %413 = arith.negf %412 : vector<8x32xf32>
    %414 = math.exp %413 : vector<8x32xf32>
    %cst_165 = arith.constant 1.000000e+00 : f32
    %415 = vector.broadcast %cst_165 : f32 to vector<8x32xf32>
    %416 = arith.addf %415, %414 : vector<8x32xf32>
    %417 = arith.divf %415, %416 : vector<8x32xf32>
    %418 = arith.addf %398, %408 : vector<8x32xf32>
    %419 = arith.negf %418 : vector<8x32xf32>
    %420 = math.exp %419 : vector<8x32xf32>
    %cst_166 = arith.constant 1.000000e+00 : f32
    %421 = vector.broadcast %cst_166 : f32 to vector<8x32xf32>
    %422 = arith.addf %421, %420 : vector<8x32xf32>
    %423 = arith.divf %421, %422 : vector<8x32xf32>
    %424 = arith.mulf %417, %411 : vector<8x32xf32>
    %425 = arith.addf %401, %424 : vector<8x32xf32>
    %426 = math.tanh %425 : vector<8x32xf32>
    %cst_167 = arith.constant 1.000000e+00 : f32
    %427 = vector.broadcast %cst_167 : f32 to vector<8x32xf32>
    %428 = arith.subf %427, %423 : vector<8x32xf32>
    %429 = arith.mulf %428, %426 : vector<8x32xf32>
    %430 = arith.mulf %423, %392 : vector<8x32xf32>
    %431 = arith.addf %429, %430 : vector<8x32xf32>
    %c10_i32 = arith.constant 10 : i32
    %432 = arith.truncf %431 : vector<8x32xf32> to vector<8x32xbf16>
    %c0_168 = arith.constant 0 : index
    %c0_169 = arith.constant 0 : index
    %c0_170 = arith.constant 0 : index
    %433 = vector.load %arg8[%c0_168, %c0_169, %c0_170] : memref<3x32x32xbf16, #tpu.memory_space<vmem>>, vector<1x32x32xbf16>
    %434 = vector.shape_cast %433 : vector<1x32x32xbf16> to vector<32x32xbf16>
    %cst_171 = arith.constant dense<0.000000e+00> : vector<8x32xf32>
    %435 = tpu.matmul %432, %434, %cst_171 {dimension_numbers = #tpu.dot_dimension_numbers<[1], [0], [0], [1], [0, 0, 1, 1], [], []>} : vector<8x32xbf16>, vector<32x32xbf16>, vector<8x32xf32> -> vector<8x32xf32>
    %c0_172 = arith.constant 0 : index
    %c0_173 = arith.constant 0 : index
    %c0_174 = arith.constant 0 : index
    %436 = vector.load %arg10[%c0_172, %c0_173, %c0_174] : memref<3x1x32xf32, #tpu.memory_space<vmem>>, vector<1x1x32xf32>
    %437 = vector.shape_cast %436 : vector<1x1x32xf32> to vector<1x32xf32>
    %438 = vector.broadcast %437 : vector<1x32xf32> to vector<8x32xf32>
    %439 = arith.addf %435, %438 : vector<8x32xf32>
    %c1_175 = arith.constant 1 : index
    %c0_176 = arith.constant 0 : index
    %c0_177 = arith.constant 0 : index
    %440 = vector.load %arg8[%c1_175, %c0_176, %c0_177] : memref<3x32x32xbf16, #tpu.memory_space<vmem>>, vector<1x32x32xbf16>
    %441 = vector.shape_cast %440 : vector<1x32x32xbf16> to vector<32x32xbf16>
    %cst_178 = arith.constant dense<0.000000e+00> : vector<8x32xf32>
    %442 = tpu.matmul %432, %441, %cst_178 {dimension_numbers = #tpu.dot_dimension_numbers<[1], [0], [0], [1], [0, 0, 1, 1], [], []>} : vector<8x32xbf16>, vector<32x32xbf16>, vector<8x32xf32> -> vector<8x32xf32>
    %c1_179 = arith.constant 1 : index
    %c0_180 = arith.constant 0 : index
    %c0_181 = arith.constant 0 : index
    %443 = vector.load %arg10[%c1_179, %c0_180, %c0_181] : memref<3x1x32xf32, #tpu.memory_space<vmem>>, vector<1x1x32xf32>
    %444 = vector.shape_cast %443 : vector<1x1x32xf32> to vector<1x32xf32>
    %445 = vector.broadcast %444 : vector<1x32xf32> to vector<8x32xf32>
    %446 = arith.addf %442, %445 : vector<8x32xf32>
    %c2_182 = arith.constant 2 : index
    %c0_183 = arith.constant 0 : index
    %c0_184 = arith.constant 0 : index
    %447 = vector.load %arg8[%c2_182, %c0_183, %c0_184] : memref<3x32x32xbf16, #tpu.memory_space<vmem>>, vector<1x32x32xbf16>
    %448 = vector.shape_cast %447 : vector<1x32x32xbf16> to vector<32x32xbf16>
    %cst_185 = arith.constant dense<0.000000e+00> : vector<8x32xf32>
    %449 = tpu.matmul %432, %448, %cst_185 {dimension_numbers = #tpu.dot_dimension_numbers<[1], [0], [0], [1], [0, 0, 1, 1], [], []>} : vector<8x32xbf16>, vector<32x32xbf16>, vector<8x32xf32> -> vector<8x32xf32>
    %c2_186 = arith.constant 2 : index
    %c0_187 = arith.constant 0 : index
    %c0_188 = arith.constant 0 : index
    %450 = vector.load %arg10[%c2_186, %c0_187, %c0_188] : memref<3x1x32xf32, #tpu.memory_space<vmem>>, vector<1x1x32xf32>
    %451 = vector.shape_cast %450 : vector<1x1x32xf32> to vector<1x32xf32>
    %452 = vector.broadcast %451 : vector<1x32xf32> to vector<8x32xf32>
    %453 = arith.addf %449, %452 : vector<8x32xf32>
    %c0_189 = arith.constant 0 : index
    %c0_190 = arith.constant 0 : index
    %454 = vector.load %arg14[%c0_189, %c0_190] : memref<32x128xbf16, #tpu.memory_space<vmem>>, vector<32x128xbf16>
    %cst_191 = arith.constant dense<0.000000e+00> : vector<8x128xf32>
    %455 = tpu.matmul %432, %454, %cst_191 {dimension_numbers = #tpu.dot_dimension_numbers<[1], [0], [0], [1], [0, 0, 1, 1], [], []>} : vector<8x32xbf16>, vector<32x128xbf16>, vector<8x128xf32> -> vector<8x128xf32>
    %c0_192 = arith.constant 0 : index
    %c0_193 = arith.constant 0 : index
    %456 = vector.load %arg15[%c0_192, %c0_193] : memref<1x128xf32, #tpu.memory_space<vmem>>, vector<1x128xf32>
    %457 = vector.broadcast %456 : vector<1x128xf32> to vector<8x128xf32>
    %458 = arith.addf %455, %457 : vector<8x128xf32>
    %c0_194 = arith.constant 0 : index
    %c0_195 = arith.constant 0 : index
    %c0_196 = arith.constant 0 : index
    %459 = vector.load %arg2[%c0_194, %c0_195, %c0_196] : memref<8x8x16xbf16, #tpu.memory_space<vmem>>, vector<8x8x16xbf16>
    %460 = vector.shape_cast %459 : vector<8x8x16xbf16> to vector<64x16xbf16>
    %c0_197 = arith.constant 0 : index
    %c0_198 = arith.constant 0 : index
    %c0_199 = arith.constant 0 : index
    %461 = vector.load %arg7[%c0_197, %c0_198, %c0_199] : memref<3x16x32xbf16, #tpu.memory_space<vmem>>, vector<1x16x32xbf16>
    %462 = vector.shape_cast %461 : vector<1x16x32xbf16> to vector<16x32xbf16>
    %cst_200 = arith.constant dense<0.000000e+00> : vector<64x32xf32>
    %463 = tpu.matmul %460, %462, %cst_200 {dimension_numbers = #tpu.dot_dimension_numbers<[1], [0], [0], [1], [0, 0, 1, 1], [], []>} : vector<64x16xbf16>, vector<16x32xbf16>, vector<64x32xf32> -> vector<64x32xf32>
    %464 = vector.shape_cast %463 : vector<64x32xf32> to vector<8x8x32xf32>
    %465 = vector.shape_cast %439 : vector<8x32xf32> to vector<1x8x32xf32>
    %466 = vector.broadcast %465 : vector<1x8x32xf32> to vector<8x8x32xf32>
    %467 = arith.addf %464, %466 : vector<8x8x32xf32>
    %c0_201 = arith.constant 0 : index
    %c0_202 = arith.constant 0 : index
    %c0_203 = arith.constant 0 : index
    %468 = vector.load %arg20[%c0_201, %c0_202, %c0_203] : memref<8x8x32xf32, #tpu.memory_space<vmem>>, vector<8x8x32xf32>
    tpu.vector_store %arg20[%c0_201, %c0_202, %c0_203], %467 {strides = array<i32>} : memref<8x8x32xf32, #tpu.memory_space<vmem>>, vector<8x8x32xf32>,
    %c1_204 = arith.constant 1 : index
    %c0_205 = arith.constant 0 : index
    %c0_206 = arith.constant 0 : index
    %469 = vector.load %arg7[%c1_204, %c0_205, %c0_206] : memref<3x16x32xbf16, #tpu.memory_space<vmem>>, vector<1x16x32xbf16>
    %470 = vector.shape_cast %469 : vector<1x16x32xbf16> to vector<16x32xbf16>
    %cst_207 = arith.constant dense<0.000000e+00> : vector<64x32xf32>
    %471 = tpu.matmul %460, %470, %cst_207 {dimension_numbers = #tpu.dot_dimension_numbers<[1], [0], [0], [1], [0, 0, 1, 1], [], []>} : vector<64x16xbf16>, vector<16x32xbf16>, vector<64x32xf32> -> vector<64x32xf32>
    %472 = vector.shape_cast %471 : vector<64x32xf32> to vector<8x8x32xf32>
    %473 = vector.shape_cast %446 : vector<8x32xf32> to vector<1x8x32xf32>
    %474 = vector.broadcast %473 : vector<1x8x32xf32> to vector<8x8x32xf32>
    %475 = arith.addf %472, %474 : vector<8x8x32xf32>
    %c0_208 = arith.constant 0 : index
    %c0_209 = arith.constant 0 : index
    %c0_210 = arith.constant 0 : index
    %476 = vector.load %arg21[%c0_208, %c0_209, %c0_210] : memref<8x8x32xf32, #tpu.memory_space<vmem>>, vector<8x8x32xf32>
    tpu.vector_store %arg21[%c0_208, %c0_209, %c0_210], %475 {strides = array<i32>} : memref<8x8x32xf32, #tpu.memory_space<vmem>>, vector<8x8x32xf32>,
    %c2_211 = arith.constant 2 : index
    %c0_212 = arith.constant 0 : index
    %c0_213 = arith.constant 0 : index
    %477 = vector.load %arg7[%c2_211, %c0_212, %c0_213] : memref<3x16x32xbf16, #tpu.memory_space<vmem>>, vector<1x16x32xbf16>
    %478 = vector.shape_cast %477 : vector<1x16x32xbf16> to vector<16x32xbf16>
    %cst_214 = arith.constant dense<0.000000e+00> : vector<64x32xf32>
    %479 = tpu.matmul %460, %478, %cst_214 {dimension_numbers = #tpu.dot_dimension_numbers<[1], [0], [0], [1], [0, 0, 1, 1], [], []>} : vector<64x16xbf16>, vector<16x32xbf16>, vector<64x32xf32> -> vector<64x32xf32>
    %480 = vector.shape_cast %479 : vector<64x32xf32> to vector<8x8x32xf32>
    %481 = vector.shape_cast %453 : vector<8x32xf32> to vector<1x8x32xf32>
    %482 = vector.broadcast %481 : vector<1x8x32xf32> to vector<8x8x32xf32>
    %483 = arith.addf %480, %482 : vector<8x8x32xf32>
    %c0_215 = arith.constant 0 : index
    %c0_216 = arith.constant 0 : index
    %c0_217 = arith.constant 0 : index
    %484 = vector.load %arg22[%c0_215, %c0_216, %c0_217] : memref<8x8x32xf32, #tpu.memory_space<vmem>>, vector<8x8x32xf32>
    tpu.vector_store %arg22[%c0_215, %c0_216, %c0_217], %483 {strides = array<i32>} : memref<8x8x32xf32, #tpu.memory_space<vmem>>, vector<8x8x32xf32>,
    %c0_218 = arith.constant 0 : index
    %c0_219 = arith.constant 0 : index
    %c0_220 = arith.constant 0 : index
    %485 = vector.load %arg9[%c0_218, %c0_219, %c0_220] : memref<3x32x32xbf16, #tpu.memory_space<vmem>>, vector<1x32x32xbf16>
    %486 = vector.shape_cast %485 : vector<1x32x32xbf16> to vector<32x32xbf16>
    %c1_221 = arith.constant 1 : index
    %c0_222 = arith.constant 0 : index
    %c0_223 = arith.constant 0 : index
    %487 = vector.load %arg9[%c1_221, %c0_222, %c0_223] : memref<3x32x32xbf16, #tpu.memory_space<vmem>>, vector<1x32x32xbf16>
    %488 = vector.shape_cast %487 : vector<1x32x32xbf16> to vector<32x32xbf16>
    %c2_224 = arith.constant 2 : index
    %c0_225 = arith.constant 0 : index
    %c0_226 = arith.constant 0 : index
    %489 = vector.load %arg9[%c2_224, %c0_225, %c0_226] : memref<3x32x32xbf16, #tpu.memory_space<vmem>>, vector<1x32x32xbf16>
    %490 = vector.shape_cast %489 : vector<1x32x32xbf16> to vector<32x32xbf16>
    %c0_227 = arith.constant 0 : index
    %c0_228 = arith.constant 0 : index
    %c0_229 = arith.constant 0 : index
    %491 = vector.load %arg11[%c0_227, %c0_228, %c0_229] : memref<3x1x32xf32, #tpu.memory_space<vmem>>, vector<1x1x32xf32>
    %492 = vector.shape_cast %491 : vector<1x1x32xf32> to vector<1x32xf32>
    %c1_230 = arith.constant 1 : index
    %c0_231 = arith.constant 0 : index
    %c0_232 = arith.constant 0 : index
    %493 = vector.load %arg11[%c1_230, %c0_231, %c0_232] : memref<3x1x32xf32, #tpu.memory_space<vmem>>, vector<1x1x32xf32>
    %494 = vector.shape_cast %493 : vector<1x1x32xf32> to vector<1x32xf32>
    %c2_233 = arith.constant 2 : index
    %c0_234 = arith.constant 0 : index
    %c0_235 = arith.constant 0 : index
    %495 = vector.load %arg11[%c2_233, %c0_234, %c0_235] : memref<3x1x32xf32, #tpu.memory_space<vmem>>, vector<1x1x32xf32>
    %496 = vector.shape_cast %495 : vector<1x1x32xf32> to vector<1x32xf32>
    %c0_i32_236 = arith.constant 0 : i32
    %497 = arith.index_cast %c0_i32_236 : i32 to index
    %c0_237 = arith.constant 0 : index
    %c0_238 = arith.constant 0 : index
    %498 = vector.load %arg20[%497, %c0_237, %c0_238] : memref<8x8x32xf32, #tpu.memory_space<vmem>>, vector<1x8x32xf32>
    %499 = vector.shape_cast %498 : vector<1x8x32xf32> to vector<8x32xf32>
    %500 = arith.index_cast %c0_i32_236 : i32 to index
    %c0_239 = arith.constant 0 : index
    %c0_240 = arith.constant 0 : index
    %501 = vector.load %arg21[%500, %c0_239, %c0_240] : memref<8x8x32xf32, #tpu.memory_space<vmem>>, vector<1x8x32xf32>
    %502 = vector.shape_cast %501 : vector<1x8x32xf32> to vector<8x32xf32>
    %503 = arith.index_cast %c0_i32_236 : i32 to index
    %c0_241 = arith.constant 0 : index
    %c0_242 = arith.constant 0 : index
    %504 = vector.load %arg22[%503, %c0_241, %c0_242] : memref<8x8x32xf32, #tpu.memory_space<vmem>>, vector<1x8x32xf32>
    %505 = vector.shape_cast %504 : vector<1x8x32xf32> to vector<8x32xf32>
    %506 = arith.truncf %431 : vector<8x32xf32> to vector<8x32xbf16>
    %cst_243 = arith.constant dense<0.000000e+00> : vector<8x32xf32>
    %507 = tpu.matmul %506, %486, %cst_243 {dimension_numbers = #tpu.dot_dimension_numbers<[1], [0], [0], [1], [0, 0, 1, 1], [], []>} : vector<8x32xbf16>, vector<32x32xbf16>, vector<8x32xf32> -> vector<8x32xf32>
    %508 = vector.broadcast %492 : vector<1x32xf32> to vector<8x32xf32>
    %509 = arith.addf %507, %508 : vector<8x32xf32>
    %cst_244 = arith.constant dense<0.000000e+00> : vector<8x32xf32>
    %510 = tpu.matmul %506, %488, %cst_244 {dimension_numbers = #tpu.dot_dimension_numbers<[1], [0], [0], [1], [0, 0, 1, 1], [], []>} : vector<8x32xbf16>, vector<32x32xbf16>, vector<8x32xf32> -> vector<8x32xf32>
    %511 = vector.broadcast %494 : vector<1x32xf32> to vector<8x32xf32>
    %512 = arith.addf %510, %511 : vector<8x32xf32>
    %cst_245 = arith.constant dense<0.000000e+00> : vector<8x32xf32>
    %513 = tpu.matmul %506, %490, %cst_245 {dimension_numbers = #tpu.dot_dimension_numbers<[1], [0], [0], [1], [0, 0, 1, 1], [], []>} : vector<8x32xbf16>, vector<32x32xbf16>, vector<8x32xf32> -> vector<8x32xf32>
    %514 = vector.broadcast %496 : vector<1x32xf32> to vector<8x32xf32>
    %515 = arith.addf %513, %514 : vector<8x32xf32>
    %516 = arith.addf %499, %509 : vector<8x32xf32>
    %517 = arith.negf %516 : vector<8x32xf32>
    %518 = math.exp %517 : vector<8x32xf32>
    %cst_246 = arith.constant 1.000000e+00 : f32
    %519 = vector.broadcast %cst_246 : f32 to vector<8x32xf32>
    %520 = arith.addf %519, %518 : vector<8x32xf32>
    %521 = arith.divf %519, %520 : vector<8x32xf32>
    %522 = arith.addf %502, %512 : vector<8x32xf32>
    %523 = arith.negf %522 : vector<8x32xf32>
    %524 = math.exp %523 : vector<8x32xf32>
    %cst_247 = arith.constant 1.000000e+00 : f32
    %525 = vector.broadcast %cst_247 : f32 to vector<8x32xf32>
    %526 = arith.addf %525, %524 : vector<8x32xf32>
    %527 = arith.divf %525, %526 : vector<8x32xf32>
    %528 = arith.mulf %521, %515 : vector<8x32xf32>
    %529 = arith.addf %505, %528 : vector<8x32xf32>
    %530 = math.tanh %529 : vector<8x32xf32>
    %cst_248 = arith.constant 1.000000e+00 : f32
    %531 = vector.broadcast %cst_248 : f32 to vector<8x32xf32>
    %532 = arith.subf %531, %527 : vector<8x32xf32>
    %533 = arith.mulf %532, %530 : vector<8x32xf32>
    %534 = arith.mulf %527, %431 : vector<8x32xf32>
    %535 = arith.addf %533, %534 : vector<8x32xf32>
    %536 = arith.truncf %535 : vector<8x32xf32> to vector<8x32xbf16>
    %537 = arith.index_cast %c0_i32_236 : i32 to index
    %c0_249 = arith.constant 0 : index
    %c0_250 = arith.constant 0 : index
    %538 = vector.load %arg23[%537, %c0_249, %c0_250] : memref<8x8x32xbf16, #tpu.memory_space<vmem>>, vector<1x8x32xbf16>
    %539 = vector.shape_cast %538 : vector<1x8x32xbf16> to vector<8x32xbf16>
    %540 = vector.shape_cast %536 : vector<8x32xbf16> to vector<1x8x32xbf16>
    tpu.vector_store %arg23[%537, %c0_249, %c0_250], %540 {strides = array<i32>} : memref<8x8x32xbf16, #tpu.memory_space<vmem>>, vector<1x8x32xbf16>,
    %c1_i32_251 = arith.constant 1 : i32
    %541 = arith.index_cast %c1_i32_251 : i32 to index
    %c0_252 = arith.constant 0 : index
    %c0_253 = arith.constant 0 : index
    %542 = vector.load %arg20[%541, %c0_252, %c0_253] : memref<8x8x32xf32, #tpu.memory_space<vmem>>, vector<1x8x32xf32>
    %543 = vector.shape_cast %542 : vector<1x8x32xf32> to vector<8x32xf32>
    %544 = arith.index_cast %c1_i32_251 : i32 to index
    %c0_254 = arith.constant 0 : index
    %c0_255 = arith.constant 0 : index
    %545 = vector.load %arg21[%544, %c0_254, %c0_255] : memref<8x8x32xf32, #tpu.memory_space<vmem>>, vector<1x8x32xf32>
    %546 = vector.shape_cast %545 : vector<1x8x32xf32> to vector<8x32xf32>
    %547 = arith.index_cast %c1_i32_251 : i32 to index
    %c0_256 = arith.constant 0 : index
    %c0_257 = arith.constant 0 : index
    %548 = vector.load %arg22[%547, %c0_256, %c0_257] : memref<8x8x32xf32, #tpu.memory_space<vmem>>, vector<1x8x32xf32>
    %549 = vector.shape_cast %548 : vector<1x8x32xf32> to vector<8x32xf32>
    %550 = arith.truncf %535 : vector<8x32xf32> to vector<8x32xbf16>
    %cst_258 = arith.constant dense<0.000000e+00> : vector<8x32xf32>
    %551 = tpu.matmul %550, %486, %cst_258 {dimension_numbers = #tpu.dot_dimension_numbers<[1], [0], [0], [1], [0, 0, 1, 1], [], []>} : vector<8x32xbf16>, vector<32x32xbf16>, vector<8x32xf32> -> vector<8x32xf32>
    %552 = vector.broadcast %492 : vector<1x32xf32> to vector<8x32xf32>
    %553 = arith.addf %551, %552 : vector<8x32xf32>
    %cst_259 = arith.constant dense<0.000000e+00> : vector<8x32xf32>
    %554 = tpu.matmul %550, %488, %cst_259 {dimension_numbers = #tpu.dot_dimension_numbers<[1], [0], [0], [1], [0, 0, 1, 1], [], []>} : vector<8x32xbf16>, vector<32x32xbf16>, vector<8x32xf32> -> vector<8x32xf32>
    %555 = vector.broadcast %494 : vector<1x32xf32> to vector<8x32xf32>
    %556 = arith.addf %554, %555 : vector<8x32xf32>
    %cst_260 = arith.constant dense<0.000000e+00> : vector<8x32xf32>
    %557 = tpu.matmul %550, %490, %cst_260 {dimension_numbers = #tpu.dot_dimension_numbers<[1], [0], [0], [1], [0, 0, 1, 1], [], []>} : vector<8x32xbf16>, vector<32x32xbf16>, vector<8x32xf32> -> vector<8x32xf32>
    %558 = vector.broadcast %496 : vector<1x32xf32> to vector<8x32xf32>
    %559 = arith.addf %557, %558 : vector<8x32xf32>
    %560 = arith.addf %543, %553 : vector<8x32xf32>
    %561 = arith.negf %560 : vector<8x32xf32>
    %562 = math.exp %561 : vector<8x32xf32>
    %cst_261 = arith.constant 1.000000e+00 : f32
    %563 = vector.broadcast %cst_261 : f32 to vector<8x32xf32>
    %564 = arith.addf %563, %562 : vector<8x32xf32>
    %565 = arith.divf %563, %564 : vector<8x32xf32>
    %566 = arith.addf %546, %556 : vector<8x32xf32>
    %567 = arith.negf %566 : vector<8x32xf32>
    %568 = math.exp %567 : vector<8x32xf32>
    %cst_262 = arith.constant 1.000000e+00 : f32
    %569 = vector.broadcast %cst_262 : f32 to vector<8x32xf32>
    %570 = arith.addf %569, %568 : vector<8x32xf32>
    %571 = arith.divf %569, %570 : vector<8x32xf32>
    %572 = arith.mulf %565, %559 : vector<8x32xf32>
    %573 = arith.addf %549, %572 : vector<8x32xf32>
    %574 = math.tanh %573 : vector<8x32xf32>
    %cst_263 = arith.constant 1.000000e+00 : f32
    %575 = vector.broadcast %cst_263 : f32 to vector<8x32xf32>
    %576 = arith.subf %575, %571 : vector<8x32xf32>
    %577 = arith.mulf %576, %574 : vector<8x32xf32>
    %578 = arith.mulf %571, %535 : vector<8x32xf32>
    %579 = arith.addf %577, %578 : vector<8x32xf32>
    %580 = arith.truncf %579 : vector<8x32xf32> to vector<8x32xbf16>
    %581 = arith.index_cast %c1_i32_251 : i32 to index
    %c0_264 = arith.constant 0 : index
    %c0_265 = arith.constant 0 : index
    %582 = vector.load %arg23[%581, %c0_264, %c0_265] : memref<8x8x32xbf16, #tpu.memory_space<vmem>>, vector<1x8x32xbf16>
    %583 = vector.shape_cast %582 : vector<1x8x32xbf16> to vector<8x32xbf16>
    %584 = vector.shape_cast %580 : vector<8x32xbf16> to vector<1x8x32xbf16>
    tpu.vector_store %arg23[%581, %c0_264, %c0_265], %584 {strides = array<i32>} : memref<8x8x32xbf16, #tpu.memory_space<vmem>>, vector<1x8x32xbf16>,
    %c2_i32_266 = arith.constant 2 : i32
    %585 = arith.index_cast %c2_i32_266 : i32 to index
    %c0_267 = arith.constant 0 : index
    %c0_268 = arith.constant 0 : index
    %586 = vector.load %arg20[%585, %c0_267, %c0_268] : memref<8x8x32xf32, #tpu.memory_space<vmem>>, vector<1x8x32xf32>
    %587 = vector.shape_cast %586 : vector<1x8x32xf32> to vector<8x32xf32>
    %588 = arith.index_cast %c2_i32_266 : i32 to index
    %c0_269 = arith.constant 0 : index
    %c0_270 = arith.constant 0 : index
    %589 = vector.load %arg21[%588, %c0_269, %c0_270] : memref<8x8x32xf32, #tpu.memory_space<vmem>>, vector<1x8x32xf32>
    %590 = vector.shape_cast %589 : vector<1x8x32xf32> to vector<8x32xf32>
    %591 = arith.index_cast %c2_i32_266 : i32 to index
    %c0_271 = arith.constant 0 : index
    %c0_272 = arith.constant 0 : index
    %592 = vector.load %arg22[%591, %c0_271, %c0_272] : memref<8x8x32xf32, #tpu.memory_space<vmem>>, vector<1x8x32xf32>
    %593 = vector.shape_cast %592 : vector<1x8x32xf32> to vector<8x32xf32>
    %594 = arith.truncf %579 : vector<8x32xf32> to vector<8x32xbf16>
    %cst_273 = arith.constant dense<0.000000e+00> : vector<8x32xf32>
    %595 = tpu.matmul %594, %486, %cst_273 {dimension_numbers = #tpu.dot_dimension_numbers<[1], [0], [0], [1], [0, 0, 1, 1], [], []>} : vector<8x32xbf16>, vector<32x32xbf16>, vector<8x32xf32> -> vector<8x32xf32>
    %596 = vector.broadcast %492 : vector<1x32xf32> to vector<8x32xf32>
    %597 = arith.addf %595, %596 : vector<8x32xf32>
    %cst_274 = arith.constant dense<0.000000e+00> : vector<8x32xf32>
    %598 = tpu.matmul %594, %488, %cst_274 {dimension_numbers = #tpu.dot_dimension_numbers<[1], [0], [0], [1], [0, 0, 1, 1], [], []>} : vector<8x32xbf16>, vector<32x32xbf16>, vector<8x32xf32> -> vector<8x32xf32>
    %599 = vector.broadcast %494 : vector<1x32xf32> to vector<8x32xf32>
    %600 = arith.addf %598, %599 : vector<8x32xf32>
    %cst_275 = arith.constant dense<0.000000e+00> : vector<8x32xf32>
    %601 = tpu.matmul %594, %490, %cst_275 {dimension_numbers = #tpu.dot_dimension_numbers<[1], [0], [0], [1], [0, 0, 1, 1], [], []>} : vector<8x32xbf16>, vector<32x32xbf16>, vector<8x32xf32> -> vector<8x32xf32>
    %602 = vector.broadcast %496 : vector<1x32xf32> to vector<8x32xf32>
    %603 = arith.addf %601, %602 : vector<8x32xf32>
    %604 = arith.addf %587, %597 : vector<8x32xf32>
    %605 = arith.negf %604 : vector<8x32xf32>
    %606 = math.exp %605 : vector<8x32xf32>
    %cst_276 = arith.constant 1.000000e+00 : f32
    %607 = vector.broadcast %cst_276 : f32 to vector<8x32xf32>
    %608 = arith.addf %607, %606 : vector<8x32xf32>
    %609 = arith.divf %607, %608 : vector<8x32xf32>
    %610 = arith.addf %590, %600 : vector<8x32xf32>
    %611 = arith.negf %610 : vector<8x32xf32>
    %612 = math.exp %611 : vector<8x32xf32>
    %cst_277 = arith.constant 1.000000e+00 : f32
    %613 = vector.broadcast %cst_277 : f32 to vector<8x32xf32>
    %614 = arith.addf %613, %612 : vector<8x32xf32>
    %615 = arith.divf %613, %614 : vector<8x32xf32>
    %616 = arith.mulf %609, %603 : vector<8x32xf32>
    %617 = arith.addf %593, %616 : vector<8x32xf32>
    %618 = math.tanh %617 : vector<8x32xf32>
    %cst_278 = arith.constant 1.000000e+00 : f32
    %619 = vector.broadcast %cst_278 : f32 to vector<8x32xf32>
    %620 = arith.subf %619, %615 : vector<8x32xf32>
    %621 = arith.mulf %620, %618 : vector<8x32xf32>
    %622 = arith.mulf %615, %579 : vector<8x32xf32>
    %623 = arith.addf %621, %622 : vector<8x32xf32>
    %624 = arith.truncf %623 : vector<8x32xf32> to vector<8x32xbf16>
    %625 = arith.index_cast %c2_i32_266 : i32 to index
    %c0_279 = arith.constant 0 : index
    %c0_280 = arith.constant 0 : index
    %626 = vector.load %arg23[%625, %c0_279, %c0_280] : memref<8x8x32xbf16, #tpu.memory_space<vmem>>, vector<1x8x32xbf16>
    %627 = vector.shape_cast %626 : vector<1x8x32xbf16> to vector<8x32xbf16>
    %628 = vector.shape_cast %624 : vector<8x32xbf16> to vector<1x8x32xbf16>
    tpu.vector_store %arg23[%625, %c0_279, %c0_280], %628 {strides = array<i32>} : memref<8x8x32xbf16, #tpu.memory_space<vmem>>, vector<1x8x32xbf16>,
    %c3_i32_281 = arith.constant 3 : i32
    %629 = arith.index_cast %c3_i32_281 : i32 to index
    %c0_282 = arith.constant 0 : index
    %c0_283 = arith.constant 0 : index
    %630 = vector.load %arg20[%629, %c0_282, %c0_283] : memref<8x8x32xf32, #tpu.memory_space<vmem>>, vector<1x8x32xf32>
    %631 = vector.shape_cast %630 : vector<1x8x32xf32> to vector<8x32xf32>
    %632 = arith.index_cast %c3_i32_281 : i32 to index
    %c0_284 = arith.constant 0 : index
    %c0_285 = arith.constant 0 : index
    %633 = vector.load %arg21[%632, %c0_284, %c0_285] : memref<8x8x32xf32, #tpu.memory_space<vmem>>, vector<1x8x32xf32>
    %634 = vector.shape_cast %633 : vector<1x8x32xf32> to vector<8x32xf32>
    %635 = arith.index_cast %c3_i32_281 : i32 to index
    %c0_286 = arith.constant 0 : index
    %c0_287 = arith.constant 0 : index
    %636 = vector.load %arg22[%635, %c0_286, %c0_287] : memref<8x8x32xf32, #tpu.memory_space<vmem>>, vector<1x8x32xf32>
    %637 = vector.shape_cast %636 : vector<1x8x32xf32> to vector<8x32xf32>
    %638 = arith.truncf %623 : vector<8x32xf32> to vector<8x32xbf16>
    %cst_288 = arith.constant dense<0.000000e+00> : vector<8x32xf32>
    %639 = tpu.matmul %638, %486, %cst_288 {dimension_numbers = #tpu.dot_dimension_numbers<[1], [0], [0], [1], [0, 0, 1, 1], [], []>} : vector<8x32xbf16>, vector<32x32xbf16>, vector<8x32xf32> -> vector<8x32xf32>
    %640 = vector.broadcast %492 : vector<1x32xf32> to vector<8x32xf32>
    %641 = arith.addf %639, %640 : vector<8x32xf32>
    %cst_289 = arith.constant dense<0.000000e+00> : vector<8x32xf32>
    %642 = tpu.matmul %638, %488, %cst_289 {dimension_numbers = #tpu.dot_dimension_numbers<[1], [0], [0], [1], [0, 0, 1, 1], [], []>} : vector<8x32xbf16>, vector<32x32xbf16>, vector<8x32xf32> -> vector<8x32xf32>
    %643 = vector.broadcast %494 : vector<1x32xf32> to vector<8x32xf32>
    %644 = arith.addf %642, %643 : vector<8x32xf32>
    %cst_290 = arith.constant dense<0.000000e+00> : vector<8x32xf32>
    %645 = tpu.matmul %638, %490, %cst_290 {dimension_numbers = #tpu.dot_dimension_numbers<[1], [0], [0], [1], [0, 0, 1, 1], [], []>} : vector<8x32xbf16>, vector<32x32xbf16>, vector<8x32xf32> -> vector<8x32xf32>
    %646 = vector.broadcast %496 : vector<1x32xf32> to vector<8x32xf32>
    %647 = arith.addf %645, %646 : vector<8x32xf32>
    %648 = arith.addf %631, %641 : vector<8x32xf32>
    %649 = arith.negf %648 : vector<8x32xf32>
    %650 = math.exp %649 : vector<8x32xf32>
    %cst_291 = arith.constant 1.000000e+00 : f32
    %651 = vector.broadcast %cst_291 : f32 to vector<8x32xf32>
    %652 = arith.addf %651, %650 : vector<8x32xf32>
    %653 = arith.divf %651, %652 : vector<8x32xf32>
    %654 = arith.addf %634, %644 : vector<8x32xf32>
    %655 = arith.negf %654 : vector<8x32xf32>
    %656 = math.exp %655 : vector<8x32xf32>
    %cst_292 = arith.constant 1.000000e+00 : f32
    %657 = vector.broadcast %cst_292 : f32 to vector<8x32xf32>
    %658 = arith.addf %657, %656 : vector<8x32xf32>
    %659 = arith.divf %657, %658 : vector<8x32xf32>
    %660 = arith.mulf %653, %647 : vector<8x32xf32>
    %661 = arith.addf %637, %660 : vector<8x32xf32>
    %662 = math.tanh %661 : vector<8x32xf32>
    %cst_293 = arith.constant 1.000000e+00 : f32
    %663 = vector.broadcast %cst_293 : f32 to vector<8x32xf32>
    %664 = arith.subf %663, %659 : vector<8x32xf32>
    %665 = arith.mulf %664, %662 : vector<8x32xf32>
    %666 = arith.mulf %659, %623 : vector<8x32xf32>
    %667 = arith.addf %665, %666 : vector<8x32xf32>
    %668 = arith.truncf %667 : vector<8x32xf32> to vector<8x32xbf16>
    %669 = arith.index_cast %c3_i32_281 : i32 to index
    %c0_294 = arith.constant 0 : index
    %c0_295 = arith.constant 0 : index
    %670 = vector.load %arg23[%669, %c0_294, %c0_295] : memref<8x8x32xbf16, #tpu.memory_space<vmem>>, vector<1x8x32xbf16>
    %671 = vector.shape_cast %670 : vector<1x8x32xbf16> to vector<8x32xbf16>
    %672 = vector.shape_cast %668 : vector<8x32xbf16> to vector<1x8x32xbf16>
    tpu.vector_store %arg23[%669, %c0_294, %c0_295], %672 {strides = array<i32>} : memref<8x8x32xbf16, #tpu.memory_space<vmem>>, vector<1x8x32xbf16>,
    %c4_i32_296 = arith.constant 4 : i32
    %673 = arith.index_cast %c4_i32_296 : i32 to index
    %c0_297 = arith.constant 0 : index
    %c0_298 = arith.constant 0 : index
    %674 = vector.load %arg20[%673, %c0_297, %c0_298] : memref<8x8x32xf32, #tpu.memory_space<vmem>>, vector<1x8x32xf32>
    %675 = vector.shape_cast %674 : vector<1x8x32xf32> to vector<8x32xf32>
    %676 = arith.index_cast %c4_i32_296 : i32 to index
    %c0_299 = arith.constant 0 : index
    %c0_300 = arith.constant 0 : index
    %677 = vector.load %arg21[%676, %c0_299, %c0_300] : memref<8x8x32xf32, #tpu.memory_space<vmem>>, vector<1x8x32xf32>
    %678 = vector.shape_cast %677 : vector<1x8x32xf32> to vector<8x32xf32>
    %679 = arith.index_cast %c4_i32_296 : i32 to index
    %c0_301 = arith.constant 0 : index
    %c0_302 = arith.constant 0 : index
    %680 = vector.load %arg22[%679, %c0_301, %c0_302] : memref<8x8x32xf32, #tpu.memory_space<vmem>>, vector<1x8x32xf32>
    %681 = vector.shape_cast %680 : vector<1x8x32xf32> to vector<8x32xf32>
    %682 = arith.truncf %667 : vector<8x32xf32> to vector<8x32xbf16>
    %cst_303 = arith.constant dense<0.000000e+00> : vector<8x32xf32>
    %683 = tpu.matmul %682, %486, %cst_303 {dimension_numbers = #tpu.dot_dimension_numbers<[1], [0], [0], [1], [0, 0, 1, 1], [], []>} : vector<8x32xbf16>, vector<32x32xbf16>, vector<8x32xf32> -> vector<8x32xf32>
    %684 = vector.broadcast %492 : vector<1x32xf32> to vector<8x32xf32>
    %685 = arith.addf %683, %684 : vector<8x32xf32>
    %cst_304 = arith.constant dense<0.000000e+00> : vector<8x32xf32>
    %686 = tpu.matmul %682, %488, %cst_304 {dimension_numbers = #tpu.dot_dimension_numbers<[1], [0], [0], [1], [0, 0, 1, 1], [], []>} : vector<8x32xbf16>, vector<32x32xbf16>, vector<8x32xf32> -> vector<8x32xf32>
    %687 = vector.broadcast %494 : vector<1x32xf32> to vector<8x32xf32>
    %688 = arith.addf %686, %687 : vector<8x32xf32>
    %cst_305 = arith.constant dense<0.000000e+00> : vector<8x32xf32>
    %689 = tpu.matmul %682, %490, %cst_305 {dimension_numbers = #tpu.dot_dimension_numbers<[1], [0], [0], [1], [0, 0, 1, 1], [], []>} : vector<8x32xbf16>, vector<32x32xbf16>, vector<8x32xf32> -> vector<8x32xf32>
    %690 = vector.broadcast %496 : vector<1x32xf32> to vector<8x32xf32>
    %691 = arith.addf %689, %690 : vector<8x32xf32>
    %692 = arith.addf %675, %685 : vector<8x32xf32>
    %693 = arith.negf %692 : vector<8x32xf32>
    %694 = math.exp %693 : vector<8x32xf32>
    %cst_306 = arith.constant 1.000000e+00 : f32
    %695 = vector.broadcast %cst_306 : f32 to vector<8x32xf32>
    %696 = arith.addf %695, %694 : vector<8x32xf32>
    %697 = arith.divf %695, %696 : vector<8x32xf32>
    %698 = arith.addf %678, %688 : vector<8x32xf32>
    %699 = arith.negf %698 : vector<8x32xf32>
    %700 = math.exp %699 : vector<8x32xf32>
    %cst_307 = arith.constant 1.000000e+00 : f32
    %701 = vector.broadcast %cst_307 : f32 to vector<8x32xf32>
    %702 = arith.addf %701, %700 : vector<8x32xf32>
    %703 = arith.divf %701, %702 : vector<8x32xf32>
    %704 = arith.mulf %697, %691 : vector<8x32xf32>
    %705 = arith.addf %681, %704 : vector<8x32xf32>
    %706 = math.tanh %705 : vector<8x32xf32>
    %cst_308 = arith.constant 1.000000e+00 : f32
    %707 = vector.broadcast %cst_308 : f32 to vector<8x32xf32>
    %708 = arith.subf %707, %703 : vector<8x32xf32>
    %709 = arith.mulf %708, %706 : vector<8x32xf32>
    %710 = arith.mulf %703, %667 : vector<8x32xf32>
    %711 = arith.addf %709, %710 : vector<8x32xf32>
    %712 = arith.truncf %711 : vector<8x32xf32> to vector<8x32xbf16>
    %713 = arith.index_cast %c4_i32_296 : i32 to index
    %c0_309 = arith.constant 0 : index
    %c0_310 = arith.constant 0 : index
    %714 = vector.load %arg23[%713, %c0_309, %c0_310] : memref<8x8x32xbf16, #tpu.memory_space<vmem>>, vector<1x8x32xbf16>
    %715 = vector.shape_cast %714 : vector<1x8x32xbf16> to vector<8x32xbf16>
    %716 = vector.shape_cast %712 : vector<8x32xbf16> to vector<1x8x32xbf16>
    tpu.vector_store %arg23[%713, %c0_309, %c0_310], %716 {strides = array<i32>} : memref<8x8x32xbf16, #tpu.memory_space<vmem>>, vector<1x8x32xbf16>,
    %c5_i32_311 = arith.constant 5 : i32
    %717 = arith.index_cast %c5_i32_311 : i32 to index
    %c0_312 = arith.constant 0 : index
    %c0_313 = arith.constant 0 : index
    %718 = vector.load %arg20[%717, %c0_312, %c0_313] : memref<8x8x32xf32, #tpu.memory_space<vmem>>, vector<1x8x32xf32>
    %719 = vector.shape_cast %718 : vector<1x8x32xf32> to vector<8x32xf32>
    %720 = arith.index_cast %c5_i32_311 : i32 to index
    %c0_314 = arith.constant 0 : index
    %c0_315 = arith.constant 0 : index
    %721 = vector.load %arg21[%720, %c0_314, %c0_315] : memref<8x8x32xf32, #tpu.memory_space<vmem>>, vector<1x8x32xf32>
    %722 = vector.shape_cast %721 : vector<1x8x32xf32> to vector<8x32xf32>
    %723 = arith.index_cast %c5_i32_311 : i32 to index
    %c0_316 = arith.constant 0 : index
    %c0_317 = arith.constant 0 : index
    %724 = vector.load %arg22[%723, %c0_316, %c0_317] : memref<8x8x32xf32, #tpu.memory_space<vmem>>, vector<1x8x32xf32>
    %725 = vector.shape_cast %724 : vector<1x8x32xf32> to vector<8x32xf32>
    %726 = arith.truncf %711 : vector<8x32xf32> to vector<8x32xbf16>
    %cst_318 = arith.constant dense<0.000000e+00> : vector<8x32xf32>
    %727 = tpu.matmul %726, %486, %cst_318 {dimension_numbers = #tpu.dot_dimension_numbers<[1], [0], [0], [1], [0, 0, 1, 1], [], []>} : vector<8x32xbf16>, vector<32x32xbf16>, vector<8x32xf32> -> vector<8x32xf32>
    %728 = vector.broadcast %492 : vector<1x32xf32> to vector<8x32xf32>
    %729 = arith.addf %727, %728 : vector<8x32xf32>
    %cst_319 = arith.constant dense<0.000000e+00> : vector<8x32xf32>
    %730 = tpu.matmul %726, %488, %cst_319 {dimension_numbers = #tpu.dot_dimension_numbers<[1], [0], [0], [1], [0, 0, 1, 1], [], []>} : vector<8x32xbf16>, vector<32x32xbf16>, vector<8x32xf32> -> vector<8x32xf32>
    %731 = vector.broadcast %494 : vector<1x32xf32> to vector<8x32xf32>
    %732 = arith.addf %730, %731 : vector<8x32xf32>
    %cst_320 = arith.constant dense<0.000000e+00> : vector<8x32xf32>
    %733 = tpu.matmul %726, %490, %cst_320 {dimension_numbers = #tpu.dot_dimension_numbers<[1], [0], [0], [1], [0, 0, 1, 1], [], []>} : vector<8x32xbf16>, vector<32x32xbf16>, vector<8x32xf32> -> vector<8x32xf32>
    %734 = vector.broadcast %496 : vector<1x32xf32> to vector<8x32xf32>
    %735 = arith.addf %733, %734 : vector<8x32xf32>
    %736 = arith.addf %719, %729 : vector<8x32xf32>
    %737 = arith.negf %736 : vector<8x32xf32>
    %738 = math.exp %737 : vector<8x32xf32>
    %cst_321 = arith.constant 1.000000e+00 : f32
    %739 = vector.broadcast %cst_321 : f32 to vector<8x32xf32>
    %740 = arith.addf %739, %738 : vector<8x32xf32>
    %741 = arith.divf %739, %740 : vector<8x32xf32>
    %742 = arith.addf %722, %732 : vector<8x32xf32>
    %743 = arith.negf %742 : vector<8x32xf32>
    %744 = math.exp %743 : vector<8x32xf32>
    %cst_322 = arith.constant 1.000000e+00 : f32
    %745 = vector.broadcast %cst_322 : f32 to vector<8x32xf32>
    %746 = arith.addf %745, %744 : vector<8x32xf32>
    %747 = arith.divf %745, %746 : vector<8x32xf32>
    %748 = arith.mulf %741, %735 : vector<8x32xf32>
    %749 = arith.addf %725, %748 : vector<8x32xf32>
    %750 = math.tanh %749 : vector<8x32xf32>
    %cst_323 = arith.constant 1.000000e+00 : f32
    %751 = vector.broadcast %cst_323 : f32 to vector<8x32xf32>
    %752 = arith.subf %751, %747 : vector<8x32xf32>
    %753 = arith.mulf %752, %750 : vector<8x32xf32>
    %754 = arith.mulf %747, %711 : vector<8x32xf32>
    %755 = arith.addf %753, %754 : vector<8x32xf32>
    %756 = arith.truncf %755 : vector<8x32xf32> to vector<8x32xbf16>
    %757 = arith.index_cast %c5_i32_311 : i32 to index
    %c0_324 = arith.constant 0 : index
    %c0_325 = arith.constant 0 : index
    %758 = vector.load %arg23[%757, %c0_324, %c0_325] : memref<8x8x32xbf16, #tpu.memory_space<vmem>>, vector<1x8x32xbf16>
    %759 = vector.shape_cast %758 : vector<1x8x32xbf16> to vector<8x32xbf16>
    %760 = vector.shape_cast %756 : vector<8x32xbf16> to vector<1x8x32xbf16>
    tpu.vector_store %arg23[%757, %c0_324, %c0_325], %760 {strides = array<i32>} : memref<8x8x32xbf16, #tpu.memory_space<vmem>>, vector<1x8x32xbf16>,
    %c6_i32_326 = arith.constant 6 : i32
    %761 = arith.index_cast %c6_i32_326 : i32 to index
    %c0_327 = arith.constant 0 : index
    %c0_328 = arith.constant 0 : index
    %762 = vector.load %arg20[%761, %c0_327, %c0_328] : memref<8x8x32xf32, #tpu.memory_space<vmem>>, vector<1x8x32xf32>
    %763 = vector.shape_cast %762 : vector<1x8x32xf32> to vector<8x32xf32>
    %764 = arith.index_cast %c6_i32_326 : i32 to index
    %c0_329 = arith.constant 0 : index
    %c0_330 = arith.constant 0 : index
    %765 = vector.load %arg21[%764, %c0_329, %c0_330] : memref<8x8x32xf32, #tpu.memory_space<vmem>>, vector<1x8x32xf32>
    %766 = vector.shape_cast %765 : vector<1x8x32xf32> to vector<8x32xf32>
    %767 = arith.index_cast %c6_i32_326 : i32 to index
    %c0_331 = arith.constant 0 : index
    %c0_332 = arith.constant 0 : index
    %768 = vector.load %arg22[%767, %c0_331, %c0_332] : memref<8x8x32xf32, #tpu.memory_space<vmem>>, vector<1x8x32xf32>
    %769 = vector.shape_cast %768 : vector<1x8x32xf32> to vector<8x32xf32>
    %770 = arith.truncf %755 : vector<8x32xf32> to vector<8x32xbf16>
    %cst_333 = arith.constant dense<0.000000e+00> : vector<8x32xf32>
    %771 = tpu.matmul %770, %486, %cst_333 {dimension_numbers = #tpu.dot_dimension_numbers<[1], [0], [0], [1], [0, 0, 1, 1], [], []>} : vector<8x32xbf16>, vector<32x32xbf16>, vector<8x32xf32> -> vector<8x32xf32>
    %772 = vector.broadcast %492 : vector<1x32xf32> to vector<8x32xf32>
    %773 = arith.addf %771, %772 : vector<8x32xf32>
    %cst_334 = arith.constant dense<0.000000e+00> : vector<8x32xf32>
    %774 = tpu.matmul %770, %488, %cst_334 {dimension_numbers = #tpu.dot_dimension_numbers<[1], [0], [0], [1], [0, 0, 1, 1], [], []>} : vector<8x32xbf16>, vector<32x32xbf16>, vector<8x32xf32> -> vector<8x32xf32>
    %775 = vector.broadcast %494 : vector<1x32xf32> to vector<8x32xf32>
    %776 = arith.addf %774, %775 : vector<8x32xf32>
    %cst_335 = arith.constant dense<0.000000e+00> : vector<8x32xf32>
    %777 = tpu.matmul %770, %490, %cst_335 {dimension_numbers = #tpu.dot_dimension_numbers<[1], [0], [0], [1], [0, 0, 1, 1], [], []>} : vector<8x32xbf16>, vector<32x32xbf16>, vector<8x32xf32> -> vector<8x32xf32>
    %778 = vector.broadcast %496 : vector<1x32xf32> to vector<8x32xf32>
    %779 = arith.addf %777, %778 : vector<8x32xf32>
    %780 = arith.addf %763, %773 : vector<8x32xf32>
    %781 = arith.negf %780 : vector<8x32xf32>
    %782 = math.exp %781 : vector<8x32xf32>
    %cst_336 = arith.constant 1.000000e+00 : f32
    %783 = vector.broadcast %cst_336 : f32 to vector<8x32xf32>
    %784 = arith.addf %783, %782 : vector<8x32xf32>
    %785 = arith.divf %783, %784 : vector<8x32xf32>
    %786 = arith.addf %766, %776 : vector<8x32xf32>
    %787 = arith.negf %786 : vector<8x32xf32>
    %788 = math.exp %787 : vector<8x32xf32>
    %cst_337 = arith.constant 1.000000e+00 : f32
    %789 = vector.broadcast %cst_337 : f32 to vector<8x32xf32>
    %790 = arith.addf %789, %788 : vector<8x32xf32>
    %791 = arith.divf %789, %790 : vector<8x32xf32>
    %792 = arith.mulf %785, %779 : vector<8x32xf32>
    %793 = arith.addf %769, %792 : vector<8x32xf32>
    %794 = math.tanh %793 : vector<8x32xf32>
    %cst_338 = arith.constant 1.000000e+00 : f32
    %795 = vector.broadcast %cst_338 : f32 to vector<8x32xf32>
    %796 = arith.subf %795, %791 : vector<8x32xf32>
    %797 = arith.mulf %796, %794 : vector<8x32xf32>
    %798 = arith.mulf %791, %755 : vector<8x32xf32>
    %799 = arith.addf %797, %798 : vector<8x32xf32>
    %800 = arith.truncf %799 : vector<8x32xf32> to vector<8x32xbf16>
    %801 = arith.index_cast %c6_i32_326 : i32 to index
    %c0_339 = arith.constant 0 : index
    %c0_340 = arith.constant 0 : index
    %802 = vector.load %arg23[%801, %c0_339, %c0_340] : memref<8x8x32xbf16, #tpu.memory_space<vmem>>, vector<1x8x32xbf16>
    %803 = vector.shape_cast %802 : vector<1x8x32xbf16> to vector<8x32xbf16>
    %804 = vector.shape_cast %800 : vector<8x32xbf16> to vector<1x8x32xbf16>
    tpu.vector_store %arg23[%801, %c0_339, %c0_340], %804 {strides = array<i32>} : memref<8x8x32xbf16, #tpu.memory_space<vmem>>, vector<1x8x32xbf16>,
    %c7_i32_341 = arith.constant 7 : i32
    %805 = arith.index_cast %c7_i32_341 : i32 to index
    %c0_342 = arith.constant 0 : index
    %c0_343 = arith.constant 0 : index
    %806 = vector.load %arg20[%805, %c0_342, %c0_343] : memref<8x8x32xf32, #tpu.memory_space<vmem>>, vector<1x8x32xf32>
    %807 = vector.shape_cast %806 : vector<1x8x32xf32> to vector<8x32xf32>
    %808 = arith.index_cast %c7_i32_341 : i32 to index
    %c0_344 = arith.constant 0 : index
    %c0_345 = arith.constant 0 : index
    %809 = vector.load %arg21[%808, %c0_344, %c0_345] : memref<8x8x32xf32, #tpu.memory_space<vmem>>, vector<1x8x32xf32>
    %810 = vector.shape_cast %809 : vector<1x8x32xf32> to vector<8x32xf32>
    %811 = arith.index_cast %c7_i32_341 : i32 to index
    %c0_346 = arith.constant 0 : index
    %c0_347 = arith.constant 0 : index
    %812 = vector.load %arg22[%811, %c0_346, %c0_347] : memref<8x8x32xf32, #tpu.memory_space<vmem>>, vector<1x8x32xf32>
    %813 = vector.shape_cast %812 : vector<1x8x32xf32> to vector<8x32xf32>
    %814 = arith.truncf %799 : vector<8x32xf32> to vector<8x32xbf16>
    %cst_348 = arith.constant dense<0.000000e+00> : vector<8x32xf32>
    %815 = tpu.matmul %814, %486, %cst_348 {dimension_numbers = #tpu.dot_dimension_numbers<[1], [0], [0], [1], [0, 0, 1, 1], [], []>} : vector<8x32xbf16>, vector<32x32xbf16>, vector<8x32xf32> -> vector<8x32xf32>
    %816 = vector.broadcast %492 : vector<1x32xf32> to vector<8x32xf32>
    %817 = arith.addf %815, %816 : vector<8x32xf32>
    %cst_349 = arith.constant dense<0.000000e+00> : vector<8x32xf32>
    %818 = tpu.matmul %814, %488, %cst_349 {dimension_numbers = #tpu.dot_dimension_numbers<[1], [0], [0], [1], [0, 0, 1, 1], [], []>} : vector<8x32xbf16>, vector<32x32xbf16>, vector<8x32xf32> -> vector<8x32xf32>
    %819 = vector.broadcast %494 : vector<1x32xf32> to vector<8x32xf32>
    %820 = arith.addf %818, %819 : vector<8x32xf32>
    %cst_350 = arith.constant dense<0.000000e+00> : vector<8x32xf32>
    %821 = tpu.matmul %814, %490, %cst_350 {dimension_numbers = #tpu.dot_dimension_numbers<[1], [0], [0], [1], [0, 0, 1, 1], [], []>} : vector<8x32xbf16>, vector<32x32xbf16>, vector<8x32xf32> -> vector<8x32xf32>
    %822 = vector.broadcast %496 : vector<1x32xf32> to vector<8x32xf32>
    %823 = arith.addf %821, %822 : vector<8x32xf32>
    %824 = arith.addf %807, %817 : vector<8x32xf32>
    %825 = arith.negf %824 : vector<8x32xf32>
    %826 = math.exp %825 : vector<8x32xf32>
    %cst_351 = arith.constant 1.000000e+00 : f32
    %827 = vector.broadcast %cst_351 : f32 to vector<8x32xf32>
    %828 = arith.addf %827, %826 : vector<8x32xf32>
    %829 = arith.divf %827, %828 : vector<8x32xf32>
    %830 = arith.addf %810, %820 : vector<8x32xf32>
    %831 = arith.negf %830 : vector<8x32xf32>
    %832 = math.exp %831 : vector<8x32xf32>
    %cst_352 = arith.constant 1.000000e+00 : f32
    %833 = vector.broadcast %cst_352 : f32 to vector<8x32xf32>
    %834 = arith.addf %833, %832 : vector<8x32xf32>
    %835 = arith.divf %833, %834 : vector<8x32xf32>
    %836 = arith.mulf %829, %823 : vector<8x32xf32>
    %837 = arith.addf %813, %836 : vector<8x32xf32>
    %838 = math.tanh %837 : vector<8x32xf32>
    %cst_353 = arith.constant 1.000000e+00 : f32
    %839 = vector.broadcast %cst_353 : f32 to vector<8x32xf32>
    %840 = arith.subf %839, %835 : vector<8x32xf32>
    %841 = arith.mulf %840, %838 : vector<8x32xf32>
    %842 = arith.mulf %835, %799 : vector<8x32xf32>
    %843 = arith.addf %841, %842 : vector<8x32xf32>
    %844 = arith.truncf %843 : vector<8x32xf32> to vector<8x32xbf16>
    %845 = arith.index_cast %c7_i32_341 : i32 to index
    %c0_354 = arith.constant 0 : index
    %c0_355 = arith.constant 0 : index
    %846 = vector.load %arg23[%845, %c0_354, %c0_355] : memref<8x8x32xbf16, #tpu.memory_space<vmem>>, vector<1x8x32xbf16>
    %847 = vector.shape_cast %846 : vector<1x8x32xbf16> to vector<8x32xbf16>
    %848 = vector.shape_cast %844 : vector<8x32xbf16> to vector<1x8x32xbf16>
    tpu.vector_store %arg23[%845, %c0_354, %c0_355], %848 {strides = array<i32>} : memref<8x8x32xbf16, #tpu.memory_space<vmem>>, vector<1x8x32xbf16>,
    %c8_i32_356 = arith.constant 8 : i32
    %c0_357 = arith.constant 0 : index
    %c0_358 = arith.constant 0 : index
    %c0_359 = arith.constant 0 : index
    %849 = vector.load %arg23[%c0_357, %c0_358, %c0_359] : memref<8x8x32xbf16, #tpu.memory_space<vmem>>, vector<8x8x32xbf16>
    %850 = vector.shape_cast %849 : vector<8x8x32xbf16> to vector<64x32xbf16>
    %c0_360 = arith.constant 0 : index
    %c0_361 = arith.constant 0 : index
    %851 = vector.load %arg12[%c0_360, %c0_361] : memref<16x128xbf16, #tpu.memory_space<vmem>>, vector<16x128xbf16>
    %cst_362 = arith.constant dense<0.000000e+00> : vector<64x128xf32>
    %852 = tpu.matmul %460, %851, %cst_362 {dimension_numbers = #tpu.dot_dimension_numbers<[1], [0], [0], [1], [0, 0, 1, 1], [], []>} : vector<64x16xbf16>, vector<16x128xbf16>, vector<64x128xf32> -> vector<64x128xf32>
    %c0_363 = arith.constant 0 : index
    %c0_364 = arith.constant 0 : index
    %853 = vector.load %arg13[%c0_363, %c0_364] : memref<32x128xbf16, #tpu.memory_space<vmem>>, vector<32x128xbf16>
    %cst_365 = arith.constant dense<0.000000e+00> : vector<64x128xf32>
    %854 = tpu.matmul %850, %853, %cst_365 {dimension_numbers = #tpu.dot_dimension_numbers<[1], [0], [0], [1], [0, 0, 1, 1], [], []>} : vector<64x32xbf16>, vector<32x128xbf16>, vector<64x128xf32> -> vector<64x128xf32>
    %855 = arith.addf %852, %854 : vector<64x128xf32>
    %856 = vector.shape_cast %855 : vector<64x128xf32> to vector<8x8x128xf32>
    %857 = vector.shape_cast %458 : vector<8x128xf32> to vector<1x8x128xf32>
    %858 = vector.broadcast %857 : vector<1x8x128xf32> to vector<8x8x128xf32>
    %859 = arith.addf %856, %858 : vector<8x8x128xf32>
    %c0_366 = arith.constant 0 : index
    %c0_367 = arith.constant 0 : index
    %c0_368 = arith.constant 0 : index
    %860 = vector.load %arg16[%c0_366, %c0_367, %c0_368] : memref<8x8x128xf32, #tpu.memory_space<vmem>>, vector<8x8x128xf32>
    tpu.vector_store %arg16[%c0_366, %c0_367, %c0_368], %859 {strides = array<i32>} : memref<8x8x128xf32, #tpu.memory_space<vmem>>, vector<8x8x128xf32>,
    return
  }
  func.func @transform_0(%arg0: i32) -> (i32, i32, i32) {
    %c0_i32 = arith.constant 0 : i32
    %c0_i32_0 = arith.constant 0 : i32
    %c0_i32_1 = arith.constant 0 : i32
    %c0_i32_2 = arith.constant 0 : i32
    return %c0_i32, %c0_i32_0, %c0_i32_1 : i32, i32, i32
  }
  func.func @transform_1(%arg0: i32) -> (i32, i32, i32) {
    %c0_i32 = arith.constant 0 : i32
    %c0_i32_0 = arith.constant 0 : i32
    %c0_i32_1 = arith.constant 0 : i32
    %c0_i32_2 = arith.constant 0 : i32
    return %c0_i32, %c0_i32_0, %c0_i32_1 : i32, i32, i32
  }
  func.func @transform_2(%arg0: i32) -> (i32, i32, i32) {
    %c0_i32 = arith.constant 0 : i32
    %c0_i32_0 = arith.constant 0 : i32
    %c0_i32_1 = arith.constant 0 : i32
    %c0_i32_2 = arith.constant 0 : i32
    return %c0_i32, %c0_i32_0, %c0_i32_1 : i32, i32, i32
  }
  func.func @transform_3(%arg0: i32) -> (i32, i32, i32) {
    %c0_i32 = arith.constant 0 : i32
    %c0_i32_0 = arith.constant 0 : i32
    %c0_i32_1 = arith.constant 0 : i32
    %c0_i32_2 = arith.constant 0 : i32
    return %c0_i32, %c0_i32_0, %c0_i32_1 : i32, i32, i32
  }
  func.func @transform_4(%arg0: i32) -> (i32, i32, i32) {
    %c0_i32 = arith.constant 0 : i32
    %c0_i32_0 = arith.constant 0 : i32
    %c0_i32_1 = arith.constant 0 : i32
    %c0_i32_2 = arith.constant 0 : i32
    return %c0_i32, %c0_i32_0, %c0_i32_1 : i32, i32, i32
  }
  func.func @transform_5(%arg0: i32) -> (i32, i32, i32) {
    %c0_i32 = arith.constant 0 : i32
    %c0_i32_0 = arith.constant 0 : i32
    %c0_i32_1 = arith.constant 0 : i32
    %c0_i32_2 = arith.constant 0 : i32
    return %c0_i32, %c0_i32_0, %c0_i32_1 : i32, i32, i32
  }
  func.func @transform_6(%arg0: i32) -> (i32, i32, i32) {
    %c0_i32 = arith.constant 0 : i32
    %c0_i32_0 = arith.constant 0 : i32
    %c0_i32_1 = arith.constant 0 : i32
    %c0_i32_2 = arith.constant 0 : i32
    return %c0_i32, %c0_i32_0, %c0_i32_1 : i32, i32, i32
  }
  func.func @transform_7(%arg0: i32) -> (i32, i32, i32) {
    %c0_i32 = arith.constant 0 : i32
    %c0_i32_0 = arith.constant 0 : i32
    %c0_i32_1 = arith.constant 0 : i32
    %c0_i32_2 = arith.constant 0 : i32
    return %c0_i32, %c0_i32_0, %c0_i32_1 : i32, i32, i32
  }
  func.func @transform_8(%arg0: i32) -> (i32, i32, i32) {
    %c0_i32 = arith.constant 0 : i32
    %c0_i32_0 = arith.constant 0 : i32
    %c0_i32_1 = arith.constant 0 : i32
    %c0_i32_2 = arith.constant 0 : i32
    return %c0_i32, %c0_i32_0, %c0_i32_1 : i32, i32, i32
  }
  func.func @transform_9(%arg0: i32) -> (i32, i32, i32) {
    %c0_i32 = arith.constant 0 : i32
    %c0_i32_0 = arith.constant 0 : i32
    %c0_i32_1 = arith.constant 0 : i32
    %c0_i32_2 = arith.constant 0 : i32
    return %c0_i32, %c0_i32_0, %c0_i32_1 : i32, i32, i32
  }
  func.func @transform_10(%arg0: i32) -> (i32, i32, i32) {
    %c0_i32 = arith.constant 0 : i32
    %c0_i32_0 = arith.constant 0 : i32
    %c0_i32_1 = arith.constant 0 : i32
    %c0_i32_2 = arith.constant 0 : i32
    return %c0_i32, %c0_i32_0, %c0_i32_1 : i32, i32, i32
  }
  func.func @transform_11(%arg0: i32) -> (i32, i32) {
    %c0_i32 = arith.constant 0 : i32
    %c0_i32_0 = arith.constant 0 : i32
    %c0_i32_1 = arith.constant 0 : i32
    return %c0_i32, %c0_i32_0 : i32, i32
  }
  func.func @transform_12(%arg0: i32) -> (i32, i32) {
    %c0_i32 = arith.constant 0 : i32
    %c0_i32_0 = arith.constant 0 : i32
    %c0_i32_1 = arith.constant 0 : i32
    return %c0_i32, %c0_i32_0 : i32, i32
  }
  func.func @transform_13(%arg0: i32) -> (i32, i32) {
    %c0_i32 = arith.constant 0 : i32
    %c0_i32_0 = arith.constant 0 : i32
    %c0_i32_1 = arith.constant 0 : i32
    return %c0_i32, %c0_i32_0 : i32, i32
  }
  func.func @transform_14(%arg0: i32) -> (i32, i32) {
    %c0_i32 = arith.constant 0 : i32
    %c0_i32_0 = arith.constant 0 : i32
    %c0_i32_1 = arith.constant 0 : i32
    return %c0_i32, %c0_i32_0 : i32, i32
  }
  func.func @transform_15(%arg0: i32) -> (i32, i32, i32) {
    %c0_i32 = arith.constant 0 : i32
    %c0_i32_0 = arith.constant 0 : i32
    %c0_i32_1 = arith.constant 0 : i32
    %c0_i32_2 = arith.constant 0 : i32
    return %c0_i32, %c0_i32_0, %c0_i32_1 : i32, i32, i32
  }
}

</mosaic_0001>

<bundles_post_ra>
// kernel: tpu_custom_call.1
= control target key start
LH: loop header
LB: loop body
LE: loop exit
PB: predicated region body
PF: predicated region fallthrough
CT: control target
= control target key end

     0   :  { %20 = vsyncpa [#allocation10], 0  ;;  %s6770_s0 = inlined_call_operand.hbm [shape: bf16[10,8,16], index: 0, kind: input, shape index: {}]   ;;  %s6771_s1 = inlined_call_operand.hbm [shape: bf16[8,8,16], index: 1, kind: input, shape index: {}]   ;;  %s6772_s2 = inlined_call_operand.hbm [shape: bf16[3,16,32], index: 2, kind: input, shape index: {}]   ;;  %s6773_s3 = inlined_call_operand.hbm [shape: bf16[3,32,32], index: 3, kind: input, shape index: {}]   ;;  %s6774_s4 = inlined_call_operand.hbm [shape: f32[3,1,32], index: 4, kind: input, shape index: {}]   ;;  %s6775_s5 = inlined_call_operand.hbm [shape: f32[3,1,32], index: 5, kind: input, shape index: {}]   ;;  %s6776_s6 = inlined_call_operand.hbm [shape: bf16[3,16,32], index: 6, kind: input, shape index: {}]   ;;  %s6777_s7 = inlined_call_operand.hbm [shape: bf16[3,32,32], index: 7, kind: input, shape index: {}]   ;;  %s6778_s8 = inlined_call_operand.hbm [shape: bf16[3,32,32], index: 8, kind: input, shape index: {}]   ;;  %s6779_s9 = inlined_call_operand.hbm [shape: f32[3,1,32], index: 9, kind: input, shape index: {}]   ;;  %s6780_s10 = inlined_call_operand.hbm [shape: f32[3,1,32], index: 10, kind: input, shape index: {}]   ;;  %s6781_s11 = inlined_call_operand.vmem [shape: bf16[16,128], index: 11, kind: input, shape index: {}]   ;;  %s6782_s12 = inlined_call_operand.vmem [shape: bf16[32,128], index: 12, kind: input, shape index: {}]   ;;  %s6783_s13 = inlined_call_operand.vmem [shape: bf16[32,128], index: 13, kind: input, shape index: {}]   ;;  %s6784_s14 = inlined_call_operand.vmem [shape: f32[1,128], index: 14, kind: input, shape index: {}]   ;;  %s6785_s15 = inlined_call_operand.hbm [shape: f32[8,8,128], index: 15, kind: output, shape index: {}]  }
   0x1   :  { %21 = vsyncpa [#allocation13], 0 }
   0x2   :  { %22 = vsyncpa [#allocation16], 0 }
   0x3   :  { %23 = vsyncpa [#allocation19], 0 }
   0x4   :  { %24 = vsyncpa [#allocation22], 0 }
   0x5   :  { %25 = vsyncpa [#allocation25], 0 }
   0x6   :  { %26 = vsyncpa [#allocation11], 0  ;;  %s5749_s18 = smov [#allocation12]   ;;  %s5750_s20 = smov [#allocation15]  }
   0x7   :  { %s44_s19 = sshll.u32 %s5749_s18, 4  ;;  %s68_s21 = sshll.u32 %s5750_s20, 4  ;;  %s45_s19 = int_to_ptr.vmem [resolvable:$true] %s44_s19  ;;  %s5850_s21 = int_to_ptr.vmem [resolvable:$true] %s68_s21 }
   0x8   :  { %s5471_s24 = scalar_lea.hbm %s6771_s1, 512 }
   0x9   :  { %p5472_p0 = scmp.ne.s32.totalorder %s6771_s1, %s5471_s24  ;;  %p5475_p1 = scmp.lt.u32.totalorder %s5471_s24, %s6771_s1 }
   0xb   :  { %p5477_p2 = pnand %p5475_p1, %p5472_p0 }
   0xd   :  { %5480 = shalt.err (!%p5477_p2)
}
   0xe   :  { %s5481_s29 = scalar_lea.vmem %s45_s19, 512  ;;  %p5486_p4 = scmp.lt.s32.totalorder %s45_s19, %s45_s19 }
   0xf   :  { %p5482_p3 = scmp.ne.s32.totalorder %s45_s19, %s5481_s29  ;;  %p5487_p5 = scmp.lt.s32.totalorder %s5481_s29, %s5481_s29 }
  0x11   :  { %p5488_p6 = por %p5487_p5, %p5486_p4 }
  0x13   :  { %p5489_p7 = pnand %p5488_p6, %p5482_p3 }
  0x15   :  { %5492 = shalt.err (!%p5489_p7)
}
  0x16   :  { %s5751_s30 = smov 64   ;;  %s5752_s16 = smov 4  }
  0x17   :  { %50 = dma.hbm_to_vmem [thread:$0]  %s6771_s1, 512, %s45_s19, [#allocation13], %s5751_s30, %s5751_s30, %s5752_s16  }
  0x18   :  { %s5493_s23 = scalar_lea.hbm %s6773_s3, 768 }
  0x19   :  { %p5494_p8 = scmp.ne.s32.totalorder %s6773_s3, %s5493_s23  ;;  %p5497_p9 = scmp.lt.u32.totalorder %s5493_s23, %s6773_s3 }
  0x1b   :  { %p5499_p10 = pnand %p5497_p9, %p5494_p8 }
  0x1d   :  { %5502 = shalt.err (!%p5499_p10)
}
  0x1e   :  { %s5503_s28 = scalar_lea.vmem %s5850_s21, 768  ;;  %p5508_p12 = scmp.lt.s32.totalorder %s5850_s21, %s5850_s21 }
  0x1f   :  { %p5504_p11 = scmp.ne.s32.totalorder %s5850_s21, %s5503_s28  ;;  %p5509_p13 = scmp.lt.s32.totalorder %s5503_s28, %s5503_s28 }
  0x21   :  { %p5510_p0 = por %p5509_p13, %p5508_p12 }
  0x23   :  { %p5511_p1 = pnand %p5510_p0, %p5504_p11 }
  0x25   :  { %5514 = shalt.err (!%p5511_p1)
}
  0x26   :  { %74 = dma.hbm_to_vmem [thread:$0]  %s6773_s3, 768, %s5850_s21, [#allocation16], %s5751_s30, %s5751_s30, %s5752_s16  }
  0x27   :  { %s5753_s29 = smov [#allocation18]   ;;  %s5754_s18 = smov [#allocation21]  }
  0x28   :  { %s92_s17 = sshll.u32 %s5753_s29, 4  ;;  %s116_s20 = sshll.u32 %s5754_s18, 4  ;;  %s93_s17 = int_to_ptr.vmem [resolvable:$true] %s92_s17  ;;  %s5887_s20 = int_to_ptr.vmem [resolvable:$true] %s116_s20 }
  0x29   :  { %s5515_s24 = scalar_lea.hbm %s6775_s5, 48 }
  0x2a   :  { %p5516_p2 = scmp.ne.s32.totalorder %s6775_s5, %s5515_s24  ;;  %p5519_p3 = scmp.lt.u32.totalorder %s5515_s24, %s6775_s5 }
  0x2c   :  { %p5521_p4 = pnand %p5519_p3, %p5516_p2 }
  0x2e   :  { %5524 = shalt.err (!%p5521_p4)
}
  0x2f   :  { %s5525_s3 = scalar_lea.vmem %s93_s17, 48  ;;  %s5529_s21 = scalar_lea.vmem %s93_s17, 64 }
  0x30   :  { %p5526_p5 = scmp.ne.s32.totalorder %s93_s17, %s5525_s3  ;;  %p5530_p6 = scmp.lt.s32.totalorder %s93_s17, %s93_s17 }
  0x31   :  { %p5531_p7 = scmp.lt.s32.totalorder %s5529_s21, %s5525_s3 }
  0x33   :  { %p5532_p8 = por %p5531_p7, %p5530_p6 }
  0x35   :  { %p5533_p9 = pnand %p5532_p8, %p5526_p5 }
  0x37   :  { %5536 = shalt.err (!%p5533_p9)
}
  0x38   :  { %s5755_s1 = smov 16   ;;  %s5756_s19 = smov 1  }
  0x39   :  { %98 = dma.hbm_to_vmem [thread:$0]  %s6775_s5, 48, %s93_s17, [#allocation19], %s5755_s1, %s5755_s1, %s5756_s19  }
  0x3a   :  { %s5537_s24 = scalar_lea.hbm %s6777_s7, 768 }
  0x3b   :  { %p5538_p10 = scmp.ne.s32.totalorder %s6777_s7, %s5537_s24  ;;  %p5541_p11 = scmp.lt.u32.totalorder %s5537_s24, %s6777_s7 }
  0x3d   :  { %p5543_p12 = pnand %p5541_p11, %p5538_p10 }
  0x3f   :  { %5546 = shalt.err (!%p5543_p12)
}
  0x40   :  { %s5547_s3 = scalar_lea.vmem %s5887_s20, 768  ;;  %p5552_p0 = scmp.lt.s32.totalorder %s5887_s20, %s5887_s20 }
  0x41   :  { %p5548_p13 = scmp.ne.s32.totalorder %s5887_s20, %s5547_s3  ;;  %p5553_p1 = scmp.lt.s32.totalorder %s5547_s3, %s5547_s3 }
  0x43   :  { %p5554_p2 = por %p5553_p1, %p5552_p0 }
  0x45   :  { %p5555_p3 = pnand %p5554_p2, %p5548_p13 }
  0x47   :  { %5558 = shalt.err (!%p5555_p3)
}
  0x48   :  { %122 = dma.hbm_to_vmem [thread:$0]  %s6777_s7, 768, %s5887_s20, [#allocation22], %s5751_s30, %s5751_s30, %s5752_s16  }
  0x49   :  { %s5757_s21 = smov [#allocation24]   ;;  %s5758_s18 = smov [#allocation9]  }
  0x4a   :  { %s140_s29 = sshll.u32 %s5757_s21, 4  ;;  %s32_s22 = sshll.u32 %s5758_s18, 4  ;;  %s141_s29 = int_to_ptr.vmem [resolvable:$true] %s140_s29  ;;  %s5924_s22 = int_to_ptr.vmem [resolvable:$true] %s32_s22 }
  0x4b   :  { %s5559_s25 = scalar_lea.hbm %s6779_s9, 48 }
  0x4c   :  { %p5560_p4 = scmp.ne.s32.totalorder %s6779_s9, %s5559_s25  ;;  %p5563_p5 = scmp.lt.u32.totalorder %s5559_s25, %s6779_s9 }
  0x4e   :  { %p5565_p6 = pnand %p5563_p5, %p5560_p4 }
  0x50   :  { %5568 = shalt.err (!%p5565_p6)
}
  0x51   :  { %s5569_s7 = scalar_lea.vmem %s141_s29, 48  ;;  %s5573_s20 = scalar_lea.vmem %s141_s29, 64 }
  0x52   :  { %p5570_p7 = scmp.ne.s32.totalorder %s141_s29, %s5569_s7  ;;  %p5574_p8 = scmp.lt.s32.totalorder %s141_s29, %s141_s29 }
  0x53   :  { %p5575_p9 = scmp.lt.s32.totalorder %s5573_s20, %s5569_s7 }
  0x55   :  { %p5576_p10 = por %p5575_p9, %p5574_p8 }
  0x57   :  { %p5577_p11 = pnand %p5576_p10, %p5570_p7 }
  0x59   :  { %5580 = shalt.err (!%p5577_p11)
}
  0x5a   :  { %146 = dma.hbm_to_vmem [thread:$0]  %s6779_s9, 48, %s141_s29, [#allocation25], %s5755_s1, %s5755_s1, %s5756_s19  }
  0x5b   :  { %s5581_s23 = scalar_lea.hbm %s6770_s0, 640 }
  0x5c   :  { %p5582_p12 = scmp.ne.s32.totalorder %s6770_s0, %s5581_s23  ;;  %p5585_p13 = scmp.lt.u32.totalorder %s5581_s23, %s6770_s0 }
  0x5e   :  { %p5587_p0 = pnand %p5585_p13, %p5582_p12 }
  0x60   :  { %5590 = shalt.err (!%p5587_p0)
}
  0x61   :  { %s5591_s28 = scalar_lea.vmem %s5924_s22, 640  ;;  %p5596_p2 = scmp.lt.s32.totalorder %s5924_s22, %s5924_s22 }
  0x62   :  { %p5592_p1 = scmp.ne.s32.totalorder %s5924_s22, %s5591_s28  ;;  %p5597_p3 = scmp.lt.s32.totalorder %s5591_s28, %s5591_s28 }
  0x64   :  { %p5598_p4 = por %p5597_p3, %p5596_p2 }
  0x66   :  { %p5599_p5 = pnand %p5598_p4, %p5592_p1 }
  0x68   :  { %5602 = shalt.err (!%p5599_p5)
}
  0x69   :  { %38 = dma.hbm_to_vmem [thread:$0]  %s6770_s0, 640, %s5924_s22, [#allocation10], %s5751_s30, %s5751_s30, %s5752_s16  }
  0x6a   :  { %s5759_s3 = smov [#allocation14]   ;;  %s5760_s20 = smov [#allocation17]  }
  0x6b   :  { %s56_s7 = sshll.u32 %s5759_s3, 4  ;;  %s80_s5 = sshll.u32 %s5760_s20, 4  ;;  %s57_s7 = int_to_ptr.vmem [resolvable:$true] %s56_s7  ;;  %s5961_s5 = int_to_ptr.vmem [resolvable:$true] %s80_s5 }
  0x6c   :  { %s5603_s18 = scalar_lea.hbm %s6772_s2, 384 }
  0x6d   :  { %p5604_p6 = scmp.ne.s32.totalorder %s6772_s2, %s5603_s18  ;;  %p5607_p7 = scmp.lt.u32.totalorder %s5603_s18, %s6772_s2 }
  0x6f   :  { %p5609_p8 = pnand %p5607_p7, %p5604_p6 }
  0x71   :  { %5612 = shalt.err (!%p5609_p8)
}
  0x72   :  { %s5613_s0 = scalar_lea.vmem %s57_s7, 384  ;;  %p5618_p10 = scmp.lt.s32.totalorder %s57_s7, %s57_s7 }
  0x73   :  { %p5614_p9 = scmp.ne.s32.totalorder %s57_s7, %s5613_s0  ;;  %p5619_p11 = scmp.lt.s32.totalorder %s5613_s0, %s5613_s0 }
  0x75   :  { %p5620_p12 = por %p5619_p11, %p5618_p10 }
  0x77   :  { %p5621_p13 = pnand %p5620_p12, %p5614_p9 }
  0x79   :  { %5624 = shalt.err (!%p5621_p13)
}
  0x7a   :  { %62 = dma.hbm_to_vmem [thread:$0]  %s6772_s2, 384, %s57_s7, [#allocation13], %s5751_s30, %s5751_s30, %s5752_s16  }
  0x7b   :  { %s5625_s29 = scalar_lea.hbm %s6774_s4, 48 }
  0x7c   :  { %p5626_p0 = scmp.ne.s32.totalorder %s6774_s4, %s5625_s29  ;;  %p5629_p1 = scmp.lt.u32.totalorder %s5625_s29, %s6774_s4 }
  0x7e   :  { %p5631_p2 = pnand %p5629_p1, %p5626_p0 }
  0x80   :  { %5634 = shalt.err (!%p5631_p2)
}
  0x81   :  { %s5635_s18 = scalar_lea.vmem %s5961_s5, 48  ;;  %s5639_s2 = scalar_lea.vmem %s5961_s5, 64 }
  0x82   :  { %p5636_p3 = scmp.ne.s32.totalorder %s5961_s5, %s5635_s18  ;;  %p5640_p4 = scmp.lt.s32.totalorder %s5961_s5, %s5961_s5 }
  0x83   :  { %p5641_p5 = scmp.lt.s32.totalorder %s5639_s2, %s5635_s18 }
  0x85   :  { %p5642_p6 = por %p5641_p5, %p5640_p4 }
  0x87   :  { %p5643_p7 = pnand %p5642_p6, %p5636_p3 }
  0x89   :  { %5646 = shalt.err (!%p5643_p7)
}
  0x8a   :  { %86 = dma.hbm_to_vmem [thread:$0]  %s6774_s4, 48, %s5961_s5, [#allocation16], %s5755_s1, %s5755_s1, %s5756_s19  }
  0x8b   :  { %s5761_s24 = smov [#allocation20]   ;;  %s5762_s26 = smov [#allocation23]  }
  0x8c   :  { %s104_s25 = sshll.u32 %s5761_s24, 4  ;;  %s128_s0 = sshll.u32 %s5762_s26, 4  ;;  %s105_s25 = int_to_ptr.vmem [resolvable:$true] %s104_s25  ;;  %s5999_s0 = int_to_ptr.vmem [resolvable:$true] %s128_s0 }
  0x8d   :  { %s5647_s28 = scalar_lea.hbm %s6776_s6, 384 }
  0x8e   :  { %p5648_p8 = scmp.ne.s32.totalorder %s6776_s6, %s5647_s28  ;;  %p5651_p9 = scmp.lt.u32.totalorder %s5647_s28, %s6776_s6 }
  0x90   :  { %p5653_p10 = pnand %p5651_p9, %p5648_p8 }
  0x92   :  { %5656 = shalt.err (!%p5653_p10)
}
  0x93   :  { %s5657_s4 = scalar_lea.vmem %s105_s25, 384  ;;  %p5662_p12 = scmp.lt.s32.totalorder %s105_s25, %s105_s25 }
  0x94   :  { %p5658_p11 = scmp.ne.s32.totalorder %s105_s25, %s5657_s4  ;;  %p5663_p13 = scmp.lt.s32.totalorder %s5657_s4, %s5657_s4 }
  0x96   :  { %p5664_p0 = por %p5663_p13, %p5662_p12 }
  0x98   :  { %p5665_p1 = pnand %p5664_p0, %p5658_p11 }
  0x9a   :  { %5668 = shalt.err (!%p5665_p1)
}
  0x9b   :  { %110 = dma.hbm_to_vmem [thread:$0]  %s6776_s6, 384, %s105_s25, [#allocation19], %s5751_s30, %s5751_s30, %s5752_s16  }
  0x9c   :  { %s5669_s2 = scalar_lea.hbm %s6778_s8, 768 }
  0x9d   :  { %p5670_p2 = scmp.ne.s32.totalorder %s6778_s8, %s5669_s2  ;;  %p5673_p3 = scmp.lt.u32.totalorder %s5669_s2, %s6778_s8 }
  0x9f   :  { %p5675_p4 = pnand %p5673_p3, %p5670_p2 }
  0xa1   :  { %5678 = shalt.err (!%p5675_p4)
}
  0xa2   :  { %s5679_s22 = scalar_lea.vmem %s5999_s0, 768  ;;  %p5684_p6 = scmp.lt.s32.totalorder %s5999_s0, %s5999_s0 }
  0xa3   :  { %p5680_p5 = scmp.ne.s32.totalorder %s5999_s0, %s5679_s22  ;;  %p5685_p7 = scmp.lt.s32.totalorder %s5679_s22, %s5679_s22 }
  0xa5   :  { %p5686_p8 = por %p5685_p7, %p5684_p6 }
  0xa7   :  { %p5687_p9 = pnand %p5686_p8, %p5680_p5 }
  0xa9   :  { %5690 = shalt.err (!%p5687_p9)
}
  0xaa   :  { %134 = dma.hbm_to_vmem [thread:$0]  %s6778_s8, 768, %s5999_s0, [#allocation22], %s5751_s30, %s5751_s30, %s5752_s16  }
  0xab   :  { %s5763_s27 = smov [#allocation26]   ;;  %s5691_s3 = scalar_lea.hbm %s6780_s10, 48 }
  0xac   :  { %s152_s28 = sshll.u32 %s5763_s27, 4  ;;  %p5692_p10 = scmp.ne.s32.totalorder %s6780_s10, %s5691_s3  ;;  %s153_s28 = int_to_ptr.vmem [resolvable:$true] %s152_s28 }
  0xad   :  { %p5695_p11 = scmp.lt.u32.totalorder %s5691_s3, %s6780_s10 }
  0xaf   :  { %p5697_p12 = pnand %p5695_p11, %p5692_p10 }
  0xb1   :  { %5700 = shalt.err (!%p5697_p12)
}
  0xb2   :  { %s5701_s21 = scalar_lea.vmem %s153_s28, 48  ;;  %s5705_s8 = scalar_lea.vmem %s153_s28, 64 }
  0xb3   :  { %p5702_p13 = scmp.ne.s32.totalorder %s153_s28, %s5701_s21  ;;  %p5706_p0 = scmp.lt.s32.totalorder %s153_s28, %s153_s28 }
  0xb4   :  { %p5707_p1 = scmp.lt.s32.totalorder %s5705_s8, %s5701_s21 }
  0xb6   :  { %p5708_p2 = por %p5707_p1, %p5706_p0 }
  0xb8   :  { %p5709_p3 = pnand %p5708_p2, %p5702_p13 }
  0xba   :  { %5712 = shalt.err (!%p5709_p3)
}
  0xbb   :  { %158 = dma.hbm_to_vmem [thread:$0]  %s6780_s10, 48, %s153_s28, [#allocation25], %s5755_s1, %s5755_s1, %s5756_s19  }
  0xbc   :  { %5735 = dma.done.wait [#allocation10], 640  }
  0xbd   :  { %5736 = vsyncadd [#allocation10], 4294966656 }
  0xbe   :  { %5737 = dma.done.wait [#allocation13], 896  }
  0xbf   :  { %5738 = vsyncadd [#allocation13], 4294966400 }
  0xc0   :  { %5739 = dma.done.wait [#allocation16], 816  }
  0xc1   :  { %5740 = vsyncadd [#allocation16], 4294966480 }
  0xc2   :  { %5741 = dma.done.wait [#allocation19], 432  }
  0xc3   :  { %5742 = vsyncadd [#allocation19], 4294966864 }
  0xc4   :  { %5743 = dma.done.wait [#allocation22], 1536  }
  0xc5   :  { %5744 = vsyncadd [#allocation22], 4294965760 }
  0xc6   :  { %5745 = dma.done.wait [#allocation25], 96  }
  0xc7   :  { %5746 = vsyncadd [#allocation25], 4294967200  ;;  %v5764_v0 = vmov 0.0   ;;  %vm5765_vm0 = vmmov 0   ;;  %v5234_v1 = vld [vmem:[#allocation14] sm:$0xff]   ;;  %v5235_v2 = vld [vmem:[#allocation14 + $0x8] sm:$0xff]  }
  0xc8   :  { %4621 = vmatprep.subr.bf16.mxu0 %v5764_v0  ;;  %5203 = vmatprep.subr.bf16.mxu1 %v5764_v0  ;;  %v5236_v3 = vld [vmem:[#allocation9] sm:$0xff]   ;;  %vm251_vm1 = vcmask 130048   ;;  %v6058_v4 = vld [vmem:[#allocation9 + $0x8] sm:$0xff]   ;;  %v5239_v7 = vld [vmem:[#allocation9 + $0x10] sm:$0xff]   ;;  %v5766_v11 = vmov 0   ;;  %vm340_vm2 = vcmask 261120  }
  0xc9   :  { %4623 = vmatprep.mubr.msk.bf16.mxu0 %vm5765_vm0, %v5764_v0  ;;  %4649 = vmatprep.mubr.msk.bf16.mxu1 %vm5765_vm0, %v5764_v0  ;;  %v6061_v5 = vld [vmem:[#allocation15] sm:$0xff]   ;;  %v6069_v6 = vld [vmem:[#allocation15 + $0x8] sm:$0xff]   ;;  %v5240_v8 = vld [vmem:[#allocation9 + $0x18] sm:$0xff]   ;;  %vm2917_vm3 = vcmask 257024   ;;  %s5767_s26 = smov [#allocation27]  }
  0xca   :  { %4622 = vmatpush3.bf16.msra.mxu0 %v5234_v1  ;;  %5204 = vmatpush3.bf16.msra.mxu1 %v5235_v2  ;;  %v5242_v9 = vld [vmem:[#allocation9 + $0x20] sm:$0xff]   ;;  %v6096_v10 = vld [vmem:[#allocation15 + $0x10] sm:$0xff]   ;;  %v6102_v12 = vld [vmem:[#allocation15 + $0x18] sm:$0xff]   ;;  %s4205_s22 = sshll.u32 %s5767_s26, 4  ;;  %s4206_s22 = int_to_ptr.vmem [resolvable:$true] %s4205_s22 }
  0xcb   :  { %4643 = vmatprep.subr.bf16.mxu0 %v5764_v0  ;;  %4687 = vmatprep.subr.bf16.mxu1 %v5764_v0  ;;  %v5245_v13 = vld [vmem:[#allocation14 + $0x10] sm:$0xff]   ;;  %v6108_v14 = vld [vmem:[#allocation15 + $0x20] sm:$0xff]   ;;  %v6115_v15 = vld [vmem:[#allocation15 + $0x28] sm:$0xff]   ;;  %p5718_p5 = scmp.lt.s32.totalorder %s4206_s22, %s4206_s22 }
  0xcc   :  { %v6149_v16 = vld [vmem:[#allocation17] ss:$0 sm:$0xff]  ;;  %v6151_v17 = vld [vmem:[#allocation17 + $0x1] ss:$0 sm:$0xff] }
  0xcd   :  { %4624 = vmatmul.mubr.msk.bf16.vlgmr.msra.gmra.mrb[0].mxu0 %vm251_vm1, %v5236_v3  ;;  %4650 = vmatmul.mubr.msk.bf16.vlgmr.msra.gmra.mrb[0].mxu1 %vm251_vm1, %v6058_v4 }
  0xce   :  { %4644 = vmatpush3.bf16.msra.mxu0 %v5235_v2  ;;  %4688 = vmatpush3.bf16.msra.mxu1 %v6061_v5 }
  0xcf   :  { %4627 = vmatprep.mubr.msk.bf16.mxu0 %vm5765_vm0, %v5764_v0  ;;  %4653 = vmatprep.mubr.msk.bf16.mxu1 %vm5765_vm0, %v5764_v0 }
  0xd0   :  { %4689 = vmatprep.subr.bf16.mxu1 %v5764_v0  ;;  %4665 = vmatprep.subr.bf16.mxu0 %v5764_v0 }
  0xd2   :  { %4690 = vmatpush3.bf16.msra.mxu1 %v6069_v6 }
  0xd3   :  { %4695 = vmatprep.subr.bf16.mxu1 %v5764_v0 }
  0xd5   :  { %4628 = vmatmul.mubr.msk.bf16.gmra.mrb[4].mxu0 %vm251_vm1, %v6058_v4  ;;  %4654 = vmatmul.mubr.msk.bf16.gmra.mrb[4].mxu1 %vm251_vm1, %v5239_v7 }
  0xd6   :  { %4631 = vmatprep.mubr.msk.bf16.mxu0 %vm5765_vm0, %v5764_v0  ;;  %4657 = vmatprep.mubr.msk.bf16.mxu1 %vm5765_vm0, %v5764_v0 }
  0xdd   :  { %4632 = vmatmul.mubr.msk.bf16.gmra.mrb[8].mxu0 %vm251_vm1, %v5239_v7  ;;  %4658 = vmatmul.mubr.msk.bf16.gmra.mrb[8].mxu1 %vm251_vm1, %v5240_v8 }
  0xde   :  { %4635 = vmatprep.mubr.msk.bf16.mxu0 %vm5765_vm0, %v5764_v0  ;;  %4661 = vmatprep.mubr.msk.bf16.mxu1 %vm5765_vm0, %v5764_v0 }
  0xe5   :  { %4636 = vmatmul.mubr.msk.bf16.gmra.mrb[12].mxu0 %vm251_vm1, %v5240_v8  ;;  %4662 = vmatmul.mubr.msk.bf16.gmra.mrb[12].mxu1 %vm251_vm1, %v5242_v9 }
  0xe6   :  { %4639 = vmatprep.mubr.msk.bf16.mxu0 %vm5765_vm0, %v5764_v0  ;;  %4691 = vmatprep.mubr.msk.bf16.mxu1 %vm5765_vm0, %v5764_v0 }
  0xed   :  { %4640 = vmatmul.mubr.msk.bf16.gmra.mrb[16].mxu0 %vm251_vm1, %v5242_v9  ;;  %4692 = vmatmul.mubr.bf16.vlgmr.msra.gmra.mrb[16].mxu1 %v5766_v11 }
  0xee   :  { %4645 = vmatprep.mubr.msk.bf16.mxu0 %vm5765_vm0, %v5764_v0  ;;  %4696 = vmatpush3.bf16.msra.mxu1 %v6096_v10 }
  0xef   :  { %4699 = vmatprep.mubr.msk.bf16.mxu1 %vm5765_vm0, %v5764_v0  ;;  %4697 = vmatprep.subr.bf16.mxu1 %v5764_v0 }
  0xf2   :  { %4698 = vmatpush3.bf16.msra.mxu1 %v6102_v12 }
  0xf3   :  { %4703 = vmatprep.subr.bf16.mxu1 %v5764_v0 }
  0xf5   :  { %4646 = vmatmul.mubr.msk.bf16.vlgmr.msra.gmra.mrb[20].mxu0 %vm251_vm1, %v5236_v3  ;;  %4700 = vmatmul.mubr.bf16.vlgmr.msra.gmra.mrb[20].mxu1 %v5766_v11 }
  0xf6   :  { %4666 = vmatpush3.bf16.msra.mxu0 %v5245_v13  ;;  %4667 = vmatprep.mubr.msk.bf16.mxu0 %vm5765_vm0, %v5764_v0 }
  0xf7   :  { %4704 = vmatpush3.bf16.msra.mxu1 %v6108_v14  ;;  %4707 = vmatprep.mubr.msk.bf16.mxu1 %vm5765_vm0, %v5764_v0 }
  0xf8   :  { %4705 = vmatprep.subr.bf16.mxu1 %v5764_v0  ;;  %4727 = vmatprep.subr.bf16.mxu0 %v5764_v0 }
  0xfb   :  { %4706 = vmatpush3.bf16.msra.mxu1 %v6115_v15 }
  0xfc   :  { %4711 = vmatprep.subr.bf16.mxu1 %v5764_v0 }
  0xfd   :  { %4668 = vmatmul.mubr.msk.bf16.vlgmr.msra.gmra.mrb[24].mxu0 %vm251_vm1, %v5236_v3  ;;  %v6185_v3 = vld [vmem:[#allocation18] ss:$0 sm:$0xff] }
  0xfe   :  { %4708 = vmatmul.mubr.bf16.vlgmr.msra.gmra.mrb[24].mxu1 %v5766_v11  ;;  %4671 = vmatprep.mubr.msk.bf16.mxu0 %vm5765_vm0, %v5764_v0 }
  0xff   :  { %4728 = vmatpush3.bf16.msra.mxu0 %v6108_v14  ;;  %4712 = vmatpush3.bf16.msra.mxu1 %v6061_v5 }
 0x100   :  { %4713 = vmatprep.subr.bf16.mxu1 %v5764_v0  ;;  %4729 = vmatprep.subr.bf16.mxu0 %v5764_v0 }
 0x101   :  { %4715 = vmatprep.mubr.msk.bf16.mxu1 %vm5765_vm0, %v5764_v0 }
 0x103   :  { %4714 = vmatpush3.bf16.msra.mxu1 %v6069_v6  ;;  %4730 = vmatpush3.bf16.msra.mxu0 %v6115_v15 }
 0x104   :  { %4719 = vmatprep.subr.bf16.mxu1 %v5764_v0  ;;  %4743 = vmatprep.subr.bf16.mxu0 %v5764_v0 }
 0x105   :  { %4672 = vmatmul.mubr.msk.bf16.gmra.mrb[28].mxu0 %vm251_vm1, %v6058_v4 }
 0x106   :  { %4675 = vmatprep.mubr.msk.bf16.mxu0 %vm5765_vm0, %v5764_v0 }
 0x10d   :  { %4676 = vmatmul.mubr.msk.bf16.gmra.mrb[32].mxu0 %vm251_vm1, %v5239_v7 }
 0x10e   :  { %4679 = vmatprep.mubr.msk.bf16.mxu0 %vm5765_vm0, %v5764_v0 }
 0x115   :  { %4680 = vmatmul.mubr.msk.bf16.gmra.mrb[36].mxu0 %vm251_vm1, %v5240_v8 }
 0x116   :  { %4683 = vmatprep.mubr.msk.bf16.mxu0 %vm5765_vm0, %v5764_v0 }
 0x11d   :  { %4684 = vmatmul.mubr.msk.bf16.gmra.mrb[40].mxu0 %vm251_vm1, %v5242_v9 }
 0x11e   :  { %4731 = vmatprep.mubr.msk.bf16.mxu0 %vm5765_vm0, %v5764_v0 }
 0x1a0   :  { %v301_v18 = vpop.f32.mrb[0].mxu0  ;;  %v410_v21 = vpop.f32.mrb[0].mxu1 }
 0x1a1   :  { %v302_v19 = vadd.f32 %v6149_v16, %v301_v18  ;;  %v4625_v20 = vpop.f32.mrb[1].mxu0  ;;  %v411_v22 = vadd.f32 %v6151_v17, %v410_v21  ;;  %v4651_v24 = vpop.f32.mrb[1].mxu1 }
 0x1a2   :  { %v304_v23 = vpop.f32.mrb[2].mxu0  ;;  %v413_v27 = vpop.f32.mrb[2].mxu1 }
 0x1a3   :  { %341 = vst.msk [vmem:[#allocation2] sm:$0xff] %vm340_vm2, %v302_v19  ;;  %v305_v25 = vadd.f32 %v6149_v16, %v304_v23  ;;  %v4626_v26 = vpop.f32.mrb[3].mxu0  ;;  %443 = vst.msk [vmem:[#allocation3 + $0x10] sm:$0xff] %vm340_vm2, %v411_v22  ;;  %v414_v28 = vadd.f32 %v6151_v17, %v413_v27  ;;  %v4652_v29 = vpop.f32.mrb[3].mxu1 }
 0x1a5   :  { %342 = vst.msk [vmem:[#allocation2 + $0x8] sm:$0xff] %vm340_vm2, %v305_v25  ;;  %444 = vst.msk [vmem:[#allocation3 + $0x18] sm:$0xff] %vm340_vm2, %v414_v28 }
 0x1a8   :  { %v309_v30 = vpop.f32.mrb[4].mxu0  ;;  %v418_v33 = vpop.f32.mrb[4].mxu1 }
 0x1a9   :  { %v310_v31 = vadd.f32 %v6149_v16, %v309_v30  ;;  %v4629_v32 = vpop.f32.mrb[5].mxu0  ;;  %v419_v34 = vadd.f32 %v6151_v17, %v418_v33  ;;  %v4655_v36 = vpop.f32.mrb[5].mxu1 }
 0x1aa   :  { %v312_v35 = vpop.f32.mrb[6].mxu0  ;;  %v421_v39 = vpop.f32.mrb[6].mxu1  ;;  %v570_v19 = vld [vmem:[#allocation2] sm:$0xff] }
 0x1ab   :  { %343 = vst.msk [vmem:[#allocation2 + $0x10] sm:$0xff] %vm340_vm2, %v310_v31  ;;  %v313_v37 = vadd.f32 %v6149_v16, %v312_v35  ;;  %v4630_v38 = vpop.f32.mrb[7].mxu0  ;;  %445 = vst.msk [vmem:[#allocation3 + $0x20] sm:$0xff] %vm340_vm2, %v419_v34  ;;  %v422_v40 = vadd.f32 %v6151_v17, %v421_v39  ;;  %v4656_v41 = vpop.f32.mrb[7].mxu1  ;;  %v6195_v34 = vld [vmem:[#allocation18 + $0x1] ss:$0 sm:$0xff] }
 0x1ac   :  { %v6198_v36 = vld [vmem:[#allocation17 + $0x2] ss:$0 sm:$0xff] }
 0x1ad   :  { %344 = vst.msk [vmem:[#allocation2 + $0x18] sm:$0xff] %vm340_vm2, %v313_v37  ;;  %446 = vst.msk [vmem:[#allocation3 + $0x28] sm:$0xff] %vm340_vm2, %v422_v40 }
 0x1b0   :  { %v317_v42 = vpop.f32.mrb[8].mxu0  ;;  %v426_v45 = vpop.f32.mrb[8].mxu1 }
 0x1b1   :  { %v318_v43 = vadd.f32 %v6149_v16, %v317_v42  ;;  %v4633_v44 = vpop.f32.mrb[9].mxu0  ;;  %v427_v46 = vadd.f32 %v6151_v17, %v426_v45  ;;  %v4659_v48 = vpop.f32.mrb[9].mxu1 }
 0x1b2   :  { %v320_v47 = vpop.f32.mrb[10].mxu0  ;;  %v429_v51 = vpop.f32.mrb[10].mxu1 }
 0x1b3   :  { %345 = vst.msk [vmem:[#allocation2 + $0x20] sm:$0xff] %vm340_vm2, %v318_v43  ;;  %v321_v49 = vadd.f32 %v6149_v16, %v320_v47  ;;  %v4634_v50 = vpop.f32.mrb[11].mxu0  ;;  %447 = vst.msk [vmem:[#allocation3 + $0x30] sm:$0xff] %vm340_vm2, %v427_v46  ;;  %v430_v52 = vadd.f32 %v6151_v17, %v429_v51  ;;  %v4660_v53 = vpop.f32.mrb[11].mxu1 }
 0x1b4   :  { %v6205_v53 = vld [vmem:[#allocation18 + $0x2] ss:$0 sm:$0xff] }
 0x1b5   :  { %346 = vst.msk [vmem:[#allocation2 + $0x28] sm:$0xff] %vm340_vm2, %v321_v49  ;;  %448 = vst.msk [vmem:[#allocation3 + $0x38] sm:$0xff] %vm340_vm2, %v430_v52 }
 0x1b8   :  { %v325_v54 = vpop.f32.mrb[12].mxu0  ;;  %v434_v57 = vpop.f32.mrb[12].mxu1 }
 0x1b9   :  { %v326_v55 = vadd.f32 %v6149_v16, %v325_v54  ;;  %v4637_v56 = vpop.f32.mrb[13].mxu0  ;;  %v435_v58 = vadd.f32 %v6151_v17, %v434_v57  ;;  %v4663_v60 = vpop.f32.mrb[13].mxu1 }
 0x1ba   :  { %v328_v59 = vpop.f32.mrb[14].mxu0  ;;  %v437_v63 = vpop.f32.mrb[14].mxu1 }
 0x1bb   :  { %347 = vst.msk [vmem:[#allocation2 + $0x30] sm:$0xff] %vm340_vm2, %v326_v55  ;;  %v329_v61 = vadd.f32 %v6149_v16, %v328_v59  ;;  %v4638_v62 = vpop.f32.mrb[15].mxu0  ;;  %449 = vst.msk [vmem:[#allocation3 + $0x40] sm:$0xff] %vm340_vm2, %v435_v58  ;;  %v438_v1 = vadd.f32 %v6151_v17, %v437_v63  ;;  %v4664_v2 = vpop.f32.mrb[15].mxu1 }
 0x1bd   :  { %348 = vst.msk [vmem:[#allocation2 + $0x38] sm:$0xff] %vm340_vm2, %v329_v61  ;;  %450 = vst.msk [vmem:[#allocation3 + $0x48] sm:$0xff] %vm340_vm2, %v438_v1 }
 0x1c0   :  { %v333_v4 = vpop.f32.mrb[16].mxu0  ;;  %v628_v8 = vpop.f32.mrb[16].mxu1 }
 0x1c1   :  { %v334_v7 = vadd.f32 %v6149_v16, %v333_v4  ;;  %v4641_v9 = vpop.f32.mrb[17].mxu0  ;;  %v629_v11 = vadd.f32 %v6185_v3, %v628_v8  ;;  %v4693_v18 = vpop.f32.mrb[17].mxu1 }
 0x1c2   :  { %v336_v13 = vpop.f32.mrb[18].mxu0  ;;  %v631_v22 = vpop.f32.mrb[18].mxu1 }
 0x1c3   :  { %349 = vst.msk [vmem:[#allocation2 + $0x40] sm:$0xff] %vm340_vm2, %v334_v7  ;;  %v337_v20 = vadd.f32 %v6149_v16, %v336_v13  ;;  %v4642_v21 = vpop.f32.mrb[19].mxu0  ;;  %v750_v23 = vadd.f32 %v629_v11, %v570_v19  ;;  %v4694_v24 = vpop.f32.mrb[19].mxu1 }
 0x1c5   :  { %350 = vst.msk [vmem:[#allocation2 + $0x48] sm:$0xff] %vm340_vm2, %v337_v20  ;;  %v4257_v25 = vmul.f32 -1.442695, %v750_v23 }
 0x1c7   :  { %5276 = vpow2.f32 %v4257_v25 }
 0x1c8   :  { %v402_v26 = vpop.f32.mrb[20].mxu0  ;;  %v686_v29 = vpop.f32.mrb[20].mxu1 }
 0x1c9   :  { %v403_v27 = vadd.f32 %v6151_v17, %v402_v26  ;;  %v4647_v28 = vpop.f32.mrb[21].mxu0  ;;  %v4701_v31 = vpop.f32.mrb[21].mxu1  ;;  %v687_v37 = vadd.f32 %v6195_v34, %v686_v29 }
 0x1ca   :  { %v405_v30 = vpop.f32.mrb[22].mxu0  ;;  %v689_v33 = vpop.f32.mrb[22].mxu1 }
 0x1cb   :  { %441 = vst.msk [vmem:[#allocation3] sm:$0xff] %vm340_vm2, %v403_v27  ;;  %v406_v32 = vadd.f32 %v6151_v17, %v405_v30  ;;  %v4648_v16 = vpop.f32.mrb[23].mxu0  ;;  %v4702_v35 = vpop.f32.mrb[23].mxu1 }
 0x1cd   :  { %442 = vst.msk [vmem:[#allocation3 + $0x8] sm:$0xff] %vm340_vm2, %v406_v32 }
 0x1d0   :  { %v502_v38 = vpop.f32.mrb[24].mxu0 }
 0x1d1   :  { %v503_v39 = vadd.f32 %v6198_v36, %v502_v38  ;;  %v4669_v40 = vpop.f32.mrb[25].mxu0  ;;  %v744_v41 = vpop.f32.mrb[24].mxu1 }
 0x1d2   :  { %v5277_v42 = vpop.eup %5276  ;;  %v571_v43 = vld [vmem:[#allocation3] sm:$0xff]  ;;  %v505_v44 = vpop.f32.mrb[26].mxu0  ;;  %v745_v59 = vadd.f32 %v6205_v53, %v744_v41 }
 0x1d3   :  { %v4709_v17 = vpop.f32.mrb[25].mxu1  ;;  %v754_v45 = vadd.f32 1.0, %v5277_v42  ;;  %v757_v46 = vadd.f32 %v687_v37, %v571_v43  ;;  %541 = vst.msk [vmem:[#allocation4] sm:$0xff] %vm340_vm2, %v503_v39  ;;  %v506_v47 = vadd.f32 %v6198_v36, %v505_v44  ;;  %v4670_v48 = vpop.f32.mrb[27].mxu0  ;;  %v772_v42 = vld [vmem:[#allocation2 + $0x8] sm:$0xff] }
 0x1d4   :  { %v747_v49 = vpop.f32.mrb[26].mxu1 }
 0x1d5   :  { %v4710_v50 = vpop.f32.mrb[27].mxu1  ;;  %5278 = vrcp.f32 %v754_v45  ;;  %v4258_v51 = vmul.f32 -1.442695, %v757_v46  ;;  %542 = vst.msk [vmem:[#allocation4 + $0x8] sm:$0xff] %vm340_vm2, %v506_v47 }
 0x1d7   :  { %5280 = vpow2.f32 %v4258_v51  ;;  %v774_v51 = vld [vmem:[#allocation3 + $0x8] sm:$0xff] }
 0x1d8   :  { %v510_v52 = vpop.f32.mrb[28].mxu0 }
 0x1d9   :  { %v511_v54 = vadd.f32 %v6198_v36, %v510_v52  ;;  %v4673_v55 = vpop.f32.mrb[29].mxu0 }
 0x1da   :  { %v513_v56 = vpop.f32.mrb[30].mxu0  ;;  %v572_v61 = vld [vmem:[#allocation4] sm:$0xff] }
 0x1db   :  { %543 = vst.msk [vmem:[#allocation4 + $0x10] sm:$0xff] %vm340_vm2, %v511_v54  ;;  %v514_v57 = vadd.f32 %v6198_v36, %v513_v56  ;;  %v4674_v58 = vpop.f32.mrb[31].mxu0 }
 0x1dd   :  { %544 = vst.msk [vmem:[#allocation4 + $0x18] sm:$0xff] %vm340_vm2, %v514_v57 }
 0x1df   :  { %v5279_v60 = vpop.eup %5278 }
 0x1e0   :  { %v764_v62 = vmul.f32 %v5279_v60, %v745_v59  ;;  %v518_v63 = vpop.f32.mrb[32].mxu0 }
 0x1e1   :  { %v5281_v1 = vpop.eup %5280  ;;  %v519_v2 = vadd.f32 %v6198_v36, %v518_v63  ;;  %v4677_v4 = vpop.f32.mrb[33].mxu0 }
 0x1e2   :  { %v761_v7 = vadd.f32 1.0, %v5281_v1  ;;  %v765_v8 = vadd.f32 %v764_v62, %v572_v61  ;;  %v521_v9 = vpop.f32.mrb[34].mxu0  ;;  %v776_v1 = vld [vmem:[#allocation4 + $0x8] sm:$0xff] }
 0x1e3   :  { %545 = vst.msk [vmem:[#allocation4 + $0x20] sm:$0xff] %vm340_vm2, %v519_v2  ;;  %v522_v11 = vadd.f32 %v6198_v36, %v521_v9  ;;  %v4678_v13 = vpop.f32.mrb[35].mxu0 }
 0x1e4   :  { %5282 = vrcp.f32 %v761_v7 }
 0x1e5   :  { %546 = vst.msk [vmem:[#allocation4 + $0x28] sm:$0xff] %vm340_vm2, %v522_v11  ;;  %5284 = vtanh.f32 %v765_v8 }
 0x1e8   :  { %v526_v18 = vpop.f32.mrb[36].mxu0 }
 0x1e9   :  { %v527_v19 = vadd.f32 %v6198_v36, %v526_v18  ;;  %v4681_v20 = vpop.f32.mrb[37].mxu0 }
 0x1ea   :  { %v529_v21 = vpop.f32.mrb[38].mxu0 }
 0x1eb   :  { %547 = vst.msk [vmem:[#allocation4 + $0x30] sm:$0xff] %vm340_vm2, %v527_v19  ;;  %v530_v22 = vadd.f32 %v6198_v36, %v529_v21  ;;  %v4682_v23 = vpop.f32.mrb[39].mxu0 }
 0x1ed   :  { %548 = vst.msk [vmem:[#allocation4 + $0x38] sm:$0xff] %vm340_vm2, %v530_v22 }
 0x1ee   :  { %v5283_v24 = vpop.eup %5282 }
 0x1ef   :  { %v767_v25 = vsub.f32 1.0, %v5283_v24  ;;  %v5285_v26 = vpop.eup %5284  ;;  %v769_v29 = vmul.f32 0.0, %v5283_v24  ;;  %v923_v24 = vld [vmem:[#allocation2 + $0x10] sm:$0xff] }
 0x1f0   :  { %v534_v27 = vpop.f32.mrb[40].mxu0 }
 0x1f1   :  { %v768_v28 = vmul.f32 %v5285_v26, %v767_v25  ;;  %v535_v30 = vadd.f32 %v6198_v36, %v534_v27  ;;  %v4685_v31 = vpop.f32.mrb[41].mxu0 }
 0x1f2   :  { %v537_v32 = vpop.f32.mrb[42].mxu0 }
 0x1f3   :  { %v770_v16 = vadd.f32 %v769_v29, %v768_v28  ;;  %549 = vst.msk [vmem:[#allocation4 + $0x40] sm:$0xff] %vm340_vm2, %v535_v30  ;;  %v538_v33 = vadd.f32 %v6198_v36, %v537_v32  ;;  %v4686_v35 = vpop.f32.mrb[43].mxu0  ;;  %v925_v32 = vld [vmem:[#allocation3 + $0x10] sm:$0xff] }
 0x1f5   :  { %v777_v37 = vpack.c.bf16 %v770_v16, %v770_v16  ;;  %550 = vst.msk [vmem:[#allocation4 + $0x48] sm:$0xff] %vm340_vm2, %v538_v33 }
 0x1f7   :  { %4716 = vmatmul.mubr.msk.bf16.vlgmr.msra.gmra.mrb[28].mxu1 %vm340_vm2, %v777_v37  ;;  %4732 = vmatmul.mubr.msk.bf16.vlgmr.msra.gmra.mrb[44].mxu0 %vm340_vm2, %v777_v37 }
 0x1f8   :  { %4720 = vmatpush3.bf16.msra.mxu1 %v6096_v10  ;;  %4723 = vmatprep.mubr.msk.bf16.mxu1 %vm5765_vm0, %v5764_v0 }
 0x1f9   :  { %4721 = vmatprep.subr.bf16.mxu1 %v5764_v0  ;;  %4744 = vmatpush3.bf16.msra.mxu0 %v6096_v10 }
 0x1fa   :  { %4745 = vmatprep.subr.bf16.mxu0 %v5764_v0  ;;  %4747 = vmatprep.mubr.msk.bf16.mxu0 %vm5765_vm0, %v5764_v0 }
 0x1fc   :  { %4722 = vmatpush3.bf16.msra.mxu1 %v6102_v12 }
 0x1fd   :  { %4735 = vmatprep.subr.bf16.mxu1 %v5764_v0  ;;  %4746 = vmatpush3.bf16.msra.mxu0 %v6102_v12 }
 0x1fe   :  { %4759 = vmatprep.subr.bf16.mxu0 %v5764_v0 }
 0x1ff   :  { %4724 = vmatmul.mubr.msk.bf16.vlgmr.msra.gmra.mrb[32].mxu1 %vm340_vm2, %v777_v37 }
 0x200   :  { %4736 = vmatpush3.bf16.msra.mxu1 %v6061_v5  ;;  %4739 = vmatprep.mubr.msk.bf16.mxu1 %vm5765_vm0, %v5764_v0 }
 0x201   :  { %4737 = vmatprep.subr.bf16.mxu1 %v5764_v0 }
 0x204   :  { %4738 = vmatpush3.bf16.msra.mxu1 %v6069_v6 }
 0x205   :  { %4751 = vmatprep.subr.bf16.mxu1 %v5764_v0 }
 0x2ca   :  { %v815_v36 = vpop.f32.mrb[28].mxu1  ;;  %v895_v38 = vpop.f32.mrb[44].mxu0 }
 0x2cb   :  { %v816_v39 = vadd.f32 %v6185_v3, %v815_v36  ;;  %v4717_v40 = vpop.f32.mrb[29].mxu1  ;;  %v4733_v41 = vpop.f32.mrb[45].mxu0  ;;  %v896_v61 = vadd.f32 %v6205_v53, %v895_v38 }
 0x2cc   :  { %v818_v43 = vpop.f32.mrb[30].mxu1  ;;  %v898_v44 = vpop.f32.mrb[46].mxu0 }
 0x2cd   :  { %v901_v17 = vadd.f32 %v816_v39, %v772_v42  ;;  %v4718_v45 = vpop.f32.mrb[31].mxu1  ;;  %v4734_v46 = vpop.f32.mrb[47].mxu0 }
 0x2ce   :  { %v927_v45 = vld [vmem:[#allocation4 + $0x10] sm:$0xff] }
 0x2cf   :  { %v4262_v47 = vmul.f32 -1.442695, %v901_v17 }
 0x2d1   :  { %5286 = vpow2.f32 %v4262_v47 }
 0x2d2   :  { %v855_v48 = vpop.f32.mrb[32].mxu1 }
 0x2d3   :  { %v856_v49 = vadd.f32 %v6195_v34, %v855_v48  ;;  %v4725_v50 = vpop.f32.mrb[33].mxu1 }
 0x2d4   :  { %v858_v52 = vpop.f32.mrb[34].mxu1 }
 0x2d5   :  { %v908_v54 = vadd.f32 %v856_v49, %v774_v51  ;;  %v4726_v55 = vpop.f32.mrb[35].mxu1 }
 0x2d7   :  { %v4263_v56 = vmul.f32 -1.442695, %v908_v54 }
 0x2d9   :  { %5288 = vpow2.f32 %v4263_v56 }
 0x2db   :  { %v5287_v57 = vpop.eup %5286 }
 0x2dc   :  { %v905_v58 = vadd.f32 1.0, %v5287_v57 }
 0x2de   :  { %5290 = vrcp.f32 %v905_v58 }
 0x2e3   :  { %v5289_v59 = vpop.eup %5288 }
 0x2e4   :  { %v912_v60 = vadd.f32 1.0, %v5289_v59 }
 0x2e6   :  { %5292 = vrcp.f32 %v912_v60  ;;  %v1074_v60 = vld [vmem:[#allocation2 + $0x18] sm:$0xff] }
 0x2e8   :  { %v5291_v62 = vpop.eup %5290 }
 0x2e9   :  { %v915_v63 = vmul.f32 %v5291_v62, %v896_v61 }
 0x2eb   :  { %v916_v2 = vadd.f32 %v915_v63, %v776_v1 }
 0x2ed   :  { %5294 = vtanh.f32 %v916_v2 }
 0x2f0   :  { %v5293_v4 = vpop.eup %5292 }
 0x2f1   :  { %v918_v7 = vsub.f32 1.0, %v5293_v4  ;;  %v920_v11 = vmul.f32 %v5293_v4, %v770_v16 }
 0x2f7   :  { %v5295_v8 = vpop.eup %5294 }
 0x2f8   :  { %v919_v9 = vmul.f32 %v5295_v8, %v918_v7  ;;  %v1076_v8 = vld [vmem:[#allocation3 + $0x18] sm:$0xff] }
 0x2fa   :  { %v921_v13 = vadd.f32 %v920_v11, %v919_v9 }
 0x2fc   :  { %v928_v18 = vpack.c.bf16 %v921_v13, %v921_v13 }
 0x2fe   :  { %4740 = vmatmul.mubr.msk.bf16.vlgmr.msra.gmra.mrb[36].mxu1 %vm340_vm2, %v928_v18  ;;  %4748 = vmatmul.mubr.msk.bf16.vlgmr.msra.gmra.mrb[48].mxu0 %vm340_vm2, %v928_v18 }
 0x2ff   :  { %4752 = vmatpush3.bf16.msra.mxu1 %v6108_v14  ;;  %4755 = vmatprep.mubr.msk.bf16.mxu1 %vm5765_vm0, %v5764_v0 }
 0x300   :  { %4753 = vmatprep.subr.bf16.mxu1 %v5764_v0  ;;  %4760 = vmatpush3.bf16.msra.mxu0 %v6061_v5 }
 0x301   :  { %4761 = vmatprep.subr.bf16.mxu0 %v5764_v0  ;;  %4763 = vmatprep.mubr.msk.bf16.mxu0 %vm5765_vm0, %v5764_v0 }
 0x303   :  { %4754 = vmatpush3.bf16.msra.mxu1 %v6115_v15 }
 0x304   :  { %4767 = vmatprep.subr.bf16.mxu1 %v5764_v0  ;;  %4762 = vmatpush3.bf16.msra.mxu0 %v6069_v6 }
 0x305   :  { %4775 = vmatprep.subr.bf16.mxu0 %v5764_v0 }
 0x306   :  { %4756 = vmatmul.mubr.msk.bf16.vlgmr.msra.gmra.mrb[40].mxu1 %vm340_vm2, %v928_v18 }
 0x307   :  { %4768 = vmatpush3.bf16.msra.mxu1 %v6096_v10  ;;  %4771 = vmatprep.mubr.msk.bf16.mxu1 %vm5765_vm0, %v5764_v0 }
 0x308   :  { %4769 = vmatprep.subr.bf16.mxu1 %v5764_v0 }
 0x30b   :  { %4770 = vmatpush3.bf16.msra.mxu1 %v6102_v12 }
 0x30c   :  { %4783 = vmatprep.subr.bf16.mxu1 %v5764_v0 }
 0x3d1   :  { %v966_v19 = vpop.f32.mrb[36].mxu1  ;;  %v1006_v20 = vpop.f32.mrb[48].mxu0 }
 0x3d2   :  { %v967_v21 = vadd.f32 %v6185_v3, %v966_v19  ;;  %v4741_v22 = vpop.f32.mrb[37].mxu1  ;;  %v4749_v23 = vpop.f32.mrb[49].mxu0  ;;  %v1007_v25 = vadd.f32 %v6195_v34, %v1006_v20 }
 0x3d3   :  { %v969_v26 = vpop.f32.mrb[38].mxu1  ;;  %v1009_v27 = vpop.f32.mrb[50].mxu0 }
 0x3d4   :  { %v1052_v28 = vadd.f32 %v967_v21, %v923_v24  ;;  %v4742_v29 = vpop.f32.mrb[39].mxu1  ;;  %v4750_v30 = vpop.f32.mrb[51].mxu0  ;;  %v1059_v16 = vadd.f32 %v1007_v25, %v925_v32 }
 0x3d6   :  { %v4267_v31 = vmul.f32 -1.442695, %v1052_v28  ;;  %v4268_v37 = vmul.f32 -1.442695, %v1059_v16  ;;  %v1078_v28 = vld [vmem:[#allocation4 + $0x18] sm:$0xff] }
 0x3d8   :  { %5296 = vpow2.f32 %v4267_v31 }
 0x3d9   :  { %v1046_v33 = vpop.f32.mrb[40].mxu1  ;;  %5298 = vpow2.f32 %v4268_v37 }
 0x3da   :  { %v4757_v35 = vpop.f32.mrb[41].mxu1  ;;  %v1047_v43 = vadd.f32 %v6205_v53, %v1046_v33 }
 0x3db   :  { %v1049_v36 = vpop.f32.mrb[42].mxu1 }
 0x3dc   :  { %v4758_v38 = vpop.f32.mrb[43].mxu1 }
 0x3e2   :  { %v5297_v39 = vpop.eup %5296 }
 0x3e3   :  { %v1056_v40 = vadd.f32 1.0, %v5297_v39  ;;  %v5299_v41 = vpop.eup %5298 }
 0x3e4   :  { %v1063_v42 = vadd.f32 1.0, %v5299_v41 }
 0x3e5   :  { %5300 = vrcp.f32 %v1056_v40  ;;  %v1225_v40 = vld [vmem:[#allocation2 + $0x20] sm:$0xff] }
 0x3e6   :  { %5302 = vrcp.f32 %v1063_v42 }
 0x3ef   :  { %v5301_v44 = vpop.eup %5300 }
 0x3f0   :  { %v1066_v17 = vmul.f32 %v5301_v44, %v1047_v43  ;;  %v5303_v47 = vpop.eup %5302 }
 0x3f1   :  { %v1069_v48 = vsub.f32 1.0, %v5303_v47  ;;  %v1071_v51 = vmul.f32 %v5303_v47, %v921_v13  ;;  %v1227_v47 = vld [vmem:[#allocation3 + $0x20] sm:$0xff] }
 0x3f2   :  { %v1067_v46 = vadd.f32 %v1066_v17, %v927_v45 }
 0x3f4   :  { %5304 = vtanh.f32 %v1067_v46 }
 0x3fe   :  { %v5305_v49 = vpop.eup %5304 }
 0x3ff   :  { %v1070_v50 = vmul.f32 %v5305_v49, %v1069_v48 }
 0x401   :  { %v1072_v52 = vadd.f32 %v1071_v51, %v1070_v50 }
 0x403   :  { %v1079_v54 = vpack.c.bf16 %v1072_v52, %v1072_v52 }
 0x405   :  { %4764 = vmatmul.mubr.msk.bf16.vlgmr.msra.gmra.mrb[52].mxu0 %vm340_vm2, %v1079_v54  ;;  %4772 = vmatmul.mubr.msk.bf16.vlgmr.msra.gmra.mrb[44].mxu1 %vm340_vm2, %v1079_v54 }
 0x406   :  { %4776 = vmatpush3.bf16.msra.mxu0 %v6108_v14  ;;  %4779 = vmatprep.mubr.msk.bf16.mxu0 %vm5765_vm0, %v5764_v0 }
 0x407   :  { %4777 = vmatprep.subr.bf16.mxu0 %v5764_v0  ;;  %4784 = vmatpush3.bf16.msra.mxu1 %v6061_v5 }
 0x408   :  { %4785 = vmatprep.subr.bf16.mxu1 %v5764_v0  ;;  %4787 = vmatprep.mubr.msk.bf16.mxu1 %vm5765_vm0, %v5764_v0 }
 0x40a   :  { %4778 = vmatpush3.bf16.msra.mxu0 %v6115_v15 }
 0x40b   :  { %4791 = vmatprep.subr.bf16.mxu0 %v5764_v0  ;;  %4786 = vmatpush3.bf16.msra.mxu1 %v6069_v6 }
 0x40c   :  { %4799 = vmatprep.subr.bf16.mxu1 %v5764_v0 }
 0x40d   :  { %4780 = vmatmul.mubr.msk.bf16.vlgmr.msra.gmra.mrb[56].mxu0 %vm340_vm2, %v1079_v54 }
 0x40e   :  { %4792 = vmatpush3.bf16.msra.mxu0 %v6096_v10  ;;  %4795 = vmatprep.mubr.msk.bf16.mxu0 %vm5765_vm0, %v5764_v0 }
 0x40f   :  { %4793 = vmatprep.subr.bf16.mxu0 %v5764_v0 }
 0x412   :  { %4794 = vmatpush3.bf16.msra.mxu0 %v6102_v12 }
 0x413   :  { %4807 = vmatprep.subr.bf16.mxu0 %v5764_v0 }
 0x4d8   :  { %v1117_v55 = vpop.f32.mrb[52].mxu0  ;;  %v1157_v56 = vpop.f32.mrb[44].mxu1 }
 0x4d9   :  { %v1118_v57 = vadd.f32 %v6185_v3, %v1117_v55  ;;  %v4765_v58 = vpop.f32.mrb[53].mxu0  ;;  %v4773_v59 = vpop.f32.mrb[45].mxu1  ;;  %v1158_v61 = vadd.f32 %v6195_v34, %v1157_v56 }
 0x4da   :  { %v1120_v62 = vpop.f32.mrb[54].mxu0  ;;  %v1160_v63 = vpop.f32.mrb[46].mxu1 }
 0x4db   :  { %v1203_v1 = vadd.f32 %v1118_v57, %v1074_v60  ;;  %v4766_v2 = vpop.f32.mrb[55].mxu0  ;;  %v4774_v4 = vpop.f32.mrb[47].mxu1  ;;  %v1210_v9 = vadd.f32 %v1158_v61, %v1076_v8  ;;  %v1229_v62 = vld [vmem:[#allocation4 + $0x20] sm:$0xff] }
 0x4dd   :  { %v4272_v7 = vmul.f32 -1.442695, %v1203_v1  ;;  %v4273_v18 = vmul.f32 -1.442695, %v1210_v9 }
 0x4df   :  { %5306 = vpow2.f32 %v4272_v7 }
 0x4e0   :  { %v1197_v11 = vpop.f32.mrb[56].mxu0  ;;  %5308 = vpow2.f32 %v4273_v18  ;;  %v6334_v18 = vld [vmem:[#allocation15 + $0x8] sm:$0xff]  }
 0x4e1   :  { %v4781_v13 = vpop.f32.mrb[57].mxu0  ;;  %v1198_v25 = vadd.f32 %v6205_v53, %v1197_v11 }
 0x4e2   :  { %v1200_v19 = vpop.f32.mrb[58].mxu0  ;;  %v6326_v13 = vld [vmem:[#allocation15] sm:$0xff]  }
 0x4e3   :  { %v4782_v20 = vpop.f32.mrb[59].mxu0 }
 0x4e9   :  { %v5307_v21 = vpop.eup %5306 }
 0x4ea   :  { %v1207_v22 = vadd.f32 1.0, %v5307_v21  ;;  %v5309_v23 = vpop.eup %5308 }
 0x4eb   :  { %v1214_v24 = vadd.f32 1.0, %v5309_v23 }
 0x4ec   :  { %5310 = vrcp.f32 %v1207_v22 }
 0x4ed   :  { %5312 = vrcp.f32 %v1214_v24  ;;  %v1376_v24 = vld [vmem:[#allocation2 + $0x28] sm:$0xff] }
 0x4f6   :  { %v5311_v26 = vpop.eup %5310 }
 0x4f7   :  { %v1217_v27 = vmul.f32 %v5311_v26, %v1198_v25  ;;  %v5313_v30 = vpop.eup %5312 }
 0x4f8   :  { %v1220_v31 = vsub.f32 1.0, %v5313_v30  ;;  %v1222_v33 = vmul.f32 %v5313_v30, %v1072_v52 }
 0x4f9   :  { %v1218_v29 = vadd.f32 %v1217_v27, %v1078_v28 }
 0x4fb   :  { %5314 = vtanh.f32 %v1218_v29 }
 0x505   :  { %v5315_v32 = vpop.eup %5314 }
 0x506   :  { %v1221_v16 = vmul.f32 %v5315_v32, %v1220_v31  ;;  %v1378_v31 = vld [vmem:[#allocation3 + $0x28] sm:$0xff] }
 0x508   :  { %v1223_v35 = vadd.f32 %v1222_v33, %v1221_v16 }
 0x50a   :  { %v1230_v37 = vpack.c.bf16 %v1223_v35, %v1223_v35 }
 0x50c   :  { %4788 = vmatmul.mubr.msk.bf16.vlgmr.msra.gmra.mrb[48].mxu1 %vm340_vm2, %v1230_v37  ;;  %4796 = vmatmul.mubr.msk.bf16.vlgmr.msra.gmra.mrb[60].mxu0 %vm340_vm2, %v1230_v37 }
 0x50d   :  { %4800 = vmatpush3.bf16.msra.mxu1 %v6108_v14  ;;  %4803 = vmatprep.mubr.msk.bf16.mxu1 %vm5765_vm0, %v5764_v0 }
 0x50e   :  { %4801 = vmatprep.subr.bf16.mxu1 %v5764_v0  ;;  %4808 = vmatpush3.bf16.msra.mxu0 %v6061_v5 }
 0x50f   :  { %4809 = vmatprep.subr.bf16.mxu0 %v5764_v0  ;;  %4811 = vmatprep.mubr.msk.bf16.mxu0 %vm5765_vm0, %v5764_v0 }
 0x511   :  { %4802 = vmatpush3.bf16.msra.mxu1 %v6115_v15 }
 0x512   :  { %4815 = vmatprep.subr.bf16.mxu1 %v5764_v0  ;;  %4810 = vmatpush3.bf16.msra.mxu0 %v6069_v6 }
 0x513   :  { %4823 = vmatprep.subr.bf16.mxu0 %v5764_v0 }
 0x514   :  { %4804 = vmatmul.mubr.msk.bf16.vlgmr.msra.gmra.mrb[52].mxu1 %vm340_vm2, %v1230_v37 }
 0x515   :  { %4816 = vmatpush3.bf16.msra.mxu1 %v6096_v10  ;;  %4819 = vmatprep.mubr.msk.bf16.mxu1 %vm5765_vm0, %v5764_v0 }
 0x516   :  { %4817 = vmatprep.subr.bf16.mxu1 %v5764_v0 }
 0x519   :  { %4818 = vmatpush3.bf16.msra.mxu1 %v6102_v12 }
 0x51a   :  { %4831 = vmatprep.subr.bf16.mxu1 %v5764_v0 }
 0x5df   :  { %v1268_v5 = vpop.f32.mrb[48].mxu1  ;;  %v1308_v36 = vpop.f32.mrb[60].mxu0 }
 0x5e0   :  { %v1269_v38 = vadd.f32 %v6185_v3, %v1268_v5  ;;  %v4789_v6 = vpop.f32.mrb[49].mxu1  ;;  %v4797_v39 = vpop.f32.mrb[61].mxu0  ;;  %v1309_v41 = vadd.f32 %v6195_v34, %v1308_v36 }
 0x5e1   :  { %v1271_v42 = vpop.f32.mrb[50].mxu1  ;;  %v1311_v43 = vpop.f32.mrb[62].mxu0 }
 0x5e2   :  { %v1354_v44 = vadd.f32 %v1269_v38, %v1225_v40  ;;  %v4790_v17 = vpop.f32.mrb[51].mxu1  ;;  %v4798_v45 = vpop.f32.mrb[63].mxu0  ;;  %v1361_v48 = vadd.f32 %v1309_v41, %v1227_v47  ;;  %v1380_v42 = vld [vmem:[#allocation4 + $0x28] sm:$0xff] }
 0x5e4   :  { %v4277_v46 = vmul.f32 -1.442695, %v1354_v44  ;;  %v4278_v51 = vmul.f32 -1.442695, %v1361_v48 }
 0x5e6   :  { %5316 = vpow2.f32 %v4277_v46 }
 0x5e7   :  { %v1348_v49 = vpop.f32.mrb[52].mxu1  ;;  %5318 = vpow2.f32 %v4278_v51 }
 0x5e8   :  { %v4805_v50 = vpop.f32.mrb[53].mxu1  ;;  %v1349_v59 = vadd.f32 %v6205_v53, %v1348_v49 }
 0x5e9   :  { %v1351_v52 = vpop.f32.mrb[54].mxu1  ;;  %v6369_v50 = vld [vmem:[#allocation15 + $0x18] sm:$0xff]  }
 0x5ea   :  { %v4806_v54 = vpop.f32.mrb[55].mxu1 }
 0x5f0   :  { %v5317_v55 = vpop.eup %5316 }
 0x5f1   :  { %v1358_v56 = vadd.f32 1.0, %v5317_v55  ;;  %v5319_v57 = vpop.eup %5318 }
 0x5f2   :  { %v1365_v58 = vadd.f32 1.0, %v5319_v57 }
 0x5f3   :  { %5320 = vrcp.f32 %v1358_v56  ;;  %v1527_v56 = vld [vmem:[#allocation2 + $0x30] sm:$0xff] }
 0x5f4   :  { %5322 = vrcp.f32 %v1365_v58 }
 0x5fd   :  { %v5321_v60 = vpop.eup %5320 }
 0x5fe   :  { %v1368_v61 = vmul.f32 %v5321_v60, %v1349_v59  ;;  %v5323_v1 = vpop.eup %5322 }
 0x5ff   :  { %v1371_v2 = vsub.f32 1.0, %v5323_v1  ;;  %v1373_v8 = vmul.f32 %v5323_v1, %v1223_v35  ;;  %v1529_v1 = vld [vmem:[#allocation3 + $0x30] sm:$0xff] }
 0x600   :  { %v1369_v63 = vadd.f32 %v1368_v61, %v1229_v62 }
 0x602   :  { %5324 = vtanh.f32 %v1369_v63 }
 0x60c   :  { %v5325_v4 = vpop.eup %5324 }
 0x60d   :  { %v1372_v7 = vmul.f32 %v5325_v4, %v1371_v2 }
 0x60f   :  { %v1374_v9 = vadd.f32 %v1373_v8, %v1372_v7 }
 0x611   :  { %v1381_v11 = vpack.c.bf16 %v1374_v9, %v1374_v9 }
 0x613   :  { %4812 = vmatmul.mubr.msk.bf16.vlgmr.msra.gmra.mrb[64].mxu0 %vm340_vm2, %v1381_v11  ;;  %4820 = vmatmul.mubr.msk.bf16.vlgmr.msra.gmra.mrb[56].mxu1 %vm340_vm2, %v1381_v11 }
 0x614   :  { %4824 = vmatpush3.bf16.msra.mxu0 %v6108_v14  ;;  %4827 = vmatprep.mubr.msk.bf16.mxu0 %vm5765_vm0, %v5764_v0 }
 0x615   :  { %4825 = vmatprep.subr.bf16.mxu0 %v5764_v0  ;;  %4832 = vmatpush3.bf16.msra.mxu1 %v6326_v13 }
 0x616   :  { %4833 = vmatprep.subr.bf16.mxu1 %v5764_v0  ;;  %4835 = vmatprep.mubr.msk.bf16.mxu1 %vm5765_vm0, %v5764_v0 }
 0x618   :  { %4826 = vmatpush3.bf16.msra.mxu0 %v6115_v15 }
 0x619   :  { %4839 = vmatprep.subr.bf16.mxu0 %v5764_v0  ;;  %4834 = vmatpush3.bf16.msra.mxu1 %v6334_v18 }
 0x61a   :  { %4847 = vmatprep.subr.bf16.mxu1 %v5764_v0 }
 0x61b   :  { %4828 = vmatmul.mubr.msk.bf16.vlgmr.msra.gmra.mrb[68].mxu0 %vm340_vm2, %v1381_v11 }
 0x61c   :  { %4840 = vmatpush3.bf16.msra.mxu0 %v6096_v10  ;;  %4843 = vmatprep.mubr.msk.bf16.mxu0 %vm5765_vm0, %v5764_v0 }
 0x61d   :  { %4841 = vmatprep.subr.bf16.mxu0 %v5764_v0 }
 0x620   :  { %4842 = vmatpush3.bf16.msra.mxu0 %v6102_v12 }
 0x621   :  { %4855 = vmatprep.subr.bf16.mxu0 %v5764_v0 }
 0x6e6   :  { %v1419_v19 = vpop.f32.mrb[64].mxu0  ;;  %v1459_v20 = vpop.f32.mrb[56].mxu1 }
 0x6e7   :  { %v1420_v21 = vadd.f32 %v6185_v3, %v1419_v19  ;;  %v4813_v22 = vpop.f32.mrb[65].mxu0  ;;  %v4821_v23 = vpop.f32.mrb[57].mxu1  ;;  %v1460_v25 = vadd.f32 %v6195_v34, %v1459_v20 }
 0x6e8   :  { %v1422_v26 = vpop.f32.mrb[66].mxu0  ;;  %v1462_v10 = vpop.f32.mrb[58].mxu1 }
 0x6e9   :  { %v1505_v27 = vadd.f32 %v1420_v21, %v1376_v24  ;;  %v4814_v28 = vpop.f32.mrb[67].mxu0  ;;  %v4822_v29 = vpop.f32.mrb[59].mxu1  ;;  %v1512_v32 = vadd.f32 %v1460_v25, %v1378_v31  ;;  %v1531_v26 = vld [vmem:[#allocation4 + $0x30] sm:$0xff] }
 0x6eb   :  { %v4282_v30 = vmul.f32 -1.442695, %v1505_v27  ;;  %v4283_v33 = vmul.f32 -1.442695, %v1512_v32 }
 0x6ed   :  { %5326 = vpow2.f32 %v4282_v30 }
 0x6ee   :  { %v1499_v12 = vpop.f32.mrb[68].mxu0  ;;  %5328 = vpow2.f32 %v4283_v33  ;;  %v6388_v33 = vld [vmem:[#allocation15 + $0x28] sm:$0xff]  }
 0x6ef   :  { %v4829_v16 = vpop.f32.mrb[69].mxu0  ;;  %v1500_v39 = vadd.f32 %v6205_v53, %v1499_v12 }
 0x6f0   :  { %v1502_v35 = vpop.f32.mrb[70].mxu0  ;;  %v6378_v16 = vld [vmem:[#allocation15 + $0x20] sm:$0xff]  }
 0x6f1   :  { %v4830_v37 = vpop.f32.mrb[71].mxu0 }
 0x6f7   :  { %v5327_v5 = vpop.eup %5326 }
 0x6f8   :  { %v1509_v36 = vadd.f32 1.0, %v5327_v5  ;;  %v5329_v38 = vpop.eup %5328 }
 0x6f9   :  { %v1516_v6 = vadd.f32 1.0, %v5329_v38 }
 0x6fa   :  { %5330 = vrcp.f32 %v1509_v36 }
 0x6fb   :  { %5332 = vrcp.f32 %v1516_v6  ;;  %v1678_v6 = vld [vmem:[#allocation2 + $0x38] sm:$0xff] }
 0x704   :  { %v5331_v40 = vpop.eup %5330 }
 0x705   :  { %v1519_v41 = vmul.f32 %v5331_v40, %v1500_v39  ;;  %v5333_v44 = vpop.eup %5332 }
 0x706   :  { %v1522_v17 = vsub.f32 1.0, %v5333_v44  ;;  %v1524_v47 = vmul.f32 %v5333_v44, %v1374_v9 }
 0x707   :  { %v1520_v43 = vadd.f32 %v1519_v41, %v1380_v42 }
 0x709   :  { %5334 = vtanh.f32 %v1520_v43 }
 0x713   :  { %v5335_v45 = vpop.eup %5334 }
 0x714   :  { %v1523_v46 = vmul.f32 %v5335_v45, %v1522_v17  ;;  %v1680_v45 = vld [vmem:[#allocation3 + $0x38] sm:$0xff] }
 0x716   :  { %v1525_v48 = vadd.f32 %v1524_v47, %v1523_v46 }
 0x718   :  { %v1532_v49 = vpack.c.bf16 %v1525_v48, %v1525_v48 }
 0x71a   :  { %4836 = vmatmul.mubr.msk.bf16.vlgmr.msra.gmra.mrb[60].mxu1 %vm340_vm2, %v1532_v49  ;;  %4844 = vmatmul.mubr.msk.bf16.vlgmr.msra.gmra.mrb[72].mxu0 %vm340_vm2, %v1532_v49 }
 0x71b   :  { %4848 = vmatpush3.bf16.msra.mxu1 %v6108_v14  ;;  %4851 = vmatprep.mubr.msk.bf16.mxu1 %vm5765_vm0, %v5764_v0  ;;  %v6363_v14 = vld [vmem:[#allocation15 + $0x10] sm:$0xff]  }
 0x71c   :  { %4849 = vmatprep.subr.bf16.mxu1 %v5764_v0  ;;  %4856 = vmatpush3.bf16.msra.mxu0 %v6326_v13 }
 0x71d   :  { %4857 = vmatprep.subr.bf16.mxu0 %v5764_v0  ;;  %4859 = vmatprep.mubr.msk.bf16.mxu0 %vm5765_vm0, %v5764_v0 }
 0x71f   :  { %4850 = vmatpush3.bf16.msra.mxu1 %v6115_v15 }
 0x720   :  { %4863 = vmatprep.subr.bf16.mxu1 %v5764_v0  ;;  %4858 = vmatpush3.bf16.msra.mxu0 %v6334_v18 }
 0x721   :  { %4871 = vmatprep.subr.bf16.mxu0 %v5764_v0 }
 0x722   :  { %4852 = vmatmul.mubr.msk.bf16.vlgmr.msra.gmra.mrb[64].mxu1 %vm340_vm2, %v1532_v49 }
 0x723   :  { %4864 = vmatpush3.bf16.msra.mxu1 %v6363_v14  ;;  %4867 = vmatprep.mubr.msk.bf16.mxu1 %vm5765_vm0, %v5764_v0 }
 0x724   :  { %4865 = vmatprep.subr.bf16.mxu1 %v5764_v0 }
 0x727   :  { %4866 = vmatpush3.bf16.msra.mxu1 %v6369_v50 }
 0x728   :  { %4879 = vmatprep.subr.bf16.mxu1 %v5764_v0 }
 0x7ed   :  { %v1570_v15 = vpop.f32.mrb[60].mxu1  ;;  %v1610_v51 = vpop.f32.mrb[72].mxu0 }
 0x7ee   :  { %v1571_v52 = vadd.f32 %v6185_v3, %v1570_v15  ;;  %v4837_v54 = vpop.f32.mrb[61].mxu1  ;;  %v4845_v55 = vpop.f32.mrb[73].mxu0  ;;  %v1611_v57 = vadd.f32 %v6195_v34, %v1610_v51 }
 0x7ef   :  { %v1573_v58 = vpop.f32.mrb[62].mxu1  ;;  %v1613_v59 = vpop.f32.mrb[74].mxu0 }
 0x7f0   :  { %v1656_v60 = vadd.f32 %v1571_v52, %v1527_v56  ;;  %v4838_v61 = vpop.f32.mrb[63].mxu1  ;;  %v4846_v62 = vpop.f32.mrb[75].mxu0  ;;  %v1663_v2 = vadd.f32 %v1611_v57, %v1529_v1  ;;  %v1682_v59 = vld [vmem:[#allocation4 + $0x38] sm:$0xff] }
 0x7f2   :  { %v4287_v63 = vmul.f32 -1.442695, %v1656_v60  ;;  %v4288_v8 = vmul.f32 -1.442695, %v1663_v2 }
 0x7f4   :  { %5336 = vpow2.f32 %v4287_v63 }
 0x7f5   :  { %v1650_v4 = vpop.f32.mrb[64].mxu1  ;;  %5338 = vpow2.f32 %v4288_v8 }
 0x7f6   :  { %v4853_v7 = vpop.f32.mrb[65].mxu1  ;;  %v1651_v23 = vadd.f32 %v6205_v53, %v1650_v4 }
 0x7f7   :  { %v1653_v9 = vpop.f32.mrb[66].mxu1 }
 0x7f8   :  { %v4854_v11 = vpop.f32.mrb[67].mxu1  ;;  %v6425_v9 = vld [vmem:[#allocation18] ss:$0 sm:$0xff] }
 0x7fe   :  { %v5337_v19 = vpop.eup %5336 }
 0x7ff   :  { %v1660_v20 = vadd.f32 1.0, %v5337_v19  ;;  %v5339_v21 = vpop.eup %5338 }
 0x800   :  { %v1667_v22 = vadd.f32 1.0, %v5339_v21 }
 0x801   :  { %5340 = vrcp.f32 %v1660_v20  ;;  %v1829_v20 = vld [vmem:[#allocation2 + $0x40] sm:$0xff] }
 0x802   :  { %5342 = vrcp.f32 %v1667_v22 }
 0x80b   :  { %v5341_v24 = vpop.eup %5340 }
 0x80c   :  { %v1670_v25 = vmul.f32 %v5341_v24, %v1651_v23  ;;  %v5343_v27 = vpop.eup %5342 }
 0x80d   :  { %v1673_v28 = vsub.f32 1.0, %v5343_v27  ;;  %v1675_v31 = vmul.f32 %v5343_v27, %v1525_v48 }
 0x80e   :  { %v1671_v10 = vadd.f32 %v1670_v25, %v1531_v26 }
 0x810   :  { %5344 = vtanh.f32 %v1671_v10 }
 0x81a   :  { %v5345_v29 = vpop.eup %5344 }
 0x81b   :  { %v1674_v30 = vmul.f32 %v5345_v29, %v1673_v28 }
 0x81d   :  { %v1676_v32 = vadd.f32 %v1675_v31, %v1674_v30 }
 0x81f   :  { %v1683_v12 = vpack.c.bf16 %v1676_v32, %v1676_v32 }
 0x821   :  { %4860 = vmatmul.mubr.msk.bf16.vlgmr.msra.gmra.mrb[76].mxu0 %vm340_vm2, %v1683_v12  ;;  %4868 = vmatmul.mubr.msk.bf16.vlgmr.msra.gmra.mrb[68].mxu1 %vm340_vm2, %v1683_v12 }
 0x822   :  { %4872 = vmatpush3.bf16.msra.mxu0 %v6378_v16  ;;  %4875 = vmatprep.mubr.msk.bf16.mxu0 %vm5765_vm0, %v5764_v0 }
 0x823   :  { %4873 = vmatprep.subr.bf16.mxu0 %v5764_v0  ;;  %4880 = vmatpush3.bf16.msra.mxu1 %v6326_v13 }
 0x824   :  { %4881 = vmatprep.subr.bf16.mxu1 %v5764_v0  ;;  %4883 = vmatprep.mubr.msk.bf16.mxu1 %vm5765_vm0, %v5764_v0 }
 0x826   :  { %4874 = vmatpush3.bf16.msra.mxu0 %v6388_v33 }
 0x827   :  { %4887 = vmatprep.subr.bf16.mxu0 %v5764_v0  ;;  %4882 = vmatpush3.bf16.msra.mxu1 %v6334_v18 }
 0x828   :  { %4895 = vmatprep.subr.bf16.mxu1 %v5764_v0 }
 0x829   :  { %4876 = vmatmul.mubr.msk.bf16.vlgmr.msra.gmra.mrb[80].mxu0 %vm340_vm2, %v1683_v12 }
 0x82a   :  { %4888 = vmatpush3.bf16.msra.mxu0 %v6363_v14  ;;  %4891 = vmatprep.mubr.msk.bf16.mxu0 %vm5765_vm0, %v5764_v0 }
 0x82b   :  { %4889 = vmatprep.subr.bf16.mxu0 %v5764_v0 }
 0x82e   :  { %4890 = vmatpush3.bf16.msra.mxu0 %v6369_v50 }
 0x82f   :  { %4903 = vmatprep.subr.bf16.mxu0 %v5764_v0 }
 0x8f4   :  { %v1721_v35 = vpop.f32.mrb[76].mxu0  ;;  %v1761_v37 = vpop.f32.mrb[68].mxu1 }
 0x8f5   :  { %v1722_v5 = vadd.f32 %v6185_v3, %v1721_v35  ;;  %v4861_v36 = vpop.f32.mrb[77].mxu0  ;;  %v4869_v38 = vpop.f32.mrb[69].mxu1  ;;  %v1762_v39 = vadd.f32 %v6195_v34, %v1761_v37 }
 0x8f6   :  { %v1724_v40 = vpop.f32.mrb[78].mxu0  ;;  %v1764_v41 = vpop.f32.mrb[70].mxu1  ;;  %v1833_v38 = vld [vmem:[#allocation4 + $0x40] sm:$0xff] }
 0x8f7   :  { %v1807_v42 = vadd.f32 %v1722_v5, %v1678_v6  ;;  %v4862_v43 = vpop.f32.mrb[79].mxu0  ;;  %v4870_v44 = vpop.f32.mrb[71].mxu1  ;;  %v1814_v46 = vadd.f32 %v1762_v39, %v1680_v45  ;;  %v5249_v45 = vld [vmem:[#allocation21 + $0x10] sm:$0xff]  }
 0x8f9   :  { %v4292_v17 = vmul.f32 -1.442695, %v1807_v42  ;;  %v4293_v49 = vmul.f32 -1.442695, %v1814_v46  ;;  %v5251_v46 = vld [vmem:[#allocation21 + $0x18] sm:$0xff]  }
 0x8fb   :  { %5346 = vpow2.f32 %v4292_v17 }
 0x8fc   :  { %v1801_v47 = vpop.f32.mrb[80].mxu0  ;;  %5348 = vpow2.f32 %v4293_v49 }
 0x8fd   :  { %v4877_v48 = vpop.f32.mrb[81].mxu0  ;;  %v1802_v56 = vadd.f32 %v6205_v53, %v1801_v47 }
 0x8fe   :  { %v1804_v15 = vpop.f32.mrb[82].mxu0 }
 0x8ff   :  { %v4878_v51 = vpop.f32.mrb[83].mxu0 }
 0x900   :  { %v1980_v51 = vld [vmem:[#allocation2 + $0x48] sm:$0xff] }
 0x905   :  { %v5347_v3 = vpop.eup %5346 }
 0x906   :  { %v1811_v52 = vadd.f32 1.0, %v5347_v3  ;;  %v5349_v54 = vpop.eup %5348  ;;  %v5463_v3 = vld [vmem:[#allocation18 + $0x1] ss:$0 sm:$0xff] }
 0x907   :  { %v1818_v55 = vadd.f32 1.0, %v5349_v54 }
 0x908   :  { %5350 = vrcp.f32 %v1811_v52 }
 0x909   :  { %5352 = vrcp.f32 %v1818_v55 }
 0x912   :  { %v5351_v57 = vpop.eup %5350 }
 0x913   :  { %v1821_v58 = vmul.f32 %v5351_v57, %v1802_v56  ;;  %v5353_v61 = vpop.eup %5352 }
 0x914   :  { %v1824_v62 = vsub.f32 1.0, %v5353_v61  ;;  %v1826_v2 = vmul.f32 %v5353_v61, %v1676_v32 }
 0x915   :  { %v1822_v60 = vadd.f32 %v1821_v58, %v1682_v59 }
 0x917   :  { %5354 = vtanh.f32 %v1822_v60  ;;  %v1982_v60 = vld [vmem:[#allocation3 + $0x48] sm:$0xff] }
 0x921   :  { %v5355_v63 = vpop.eup %5354 }
 0x922   :  { %v1825_v1 = vmul.f32 %v5355_v63, %v1824_v62 }
 0x924   :  { %v1827_v4 = vadd.f32 %v1826_v2, %v1825_v1 }
 0x926   :  { %v1834_v7 = vpack.c.bf16 %v1827_v4, %v1827_v4 }
 0x928   :  { %4884 = vmatmul.mubr.msk.bf16.vlgmr.msra.gmra.mrb[72].mxu1 %vm340_vm2, %v1834_v7  ;;  %4892 = vmatmul.mubr.msk.bf16.vlgmr.msra.gmra.mrb[84].mxu0 %vm340_vm2, %v1834_v7 }
 0x929   :  { %4896 = vmatpush3.bf16.msra.mxu1 %v6378_v16  ;;  %4899 = vmatprep.mubr.msk.bf16.mxu1 %vm5765_vm0, %v5764_v0 }
 0x92a   :  { %4897 = vmatprep.subr.bf16.mxu1 %v5764_v0  ;;  %4904 = vmatpush3.bf16.msra.mxu0 %v6326_v13 }
 0x92b   :  { %4905 = vmatprep.subr.bf16.mxu0 %v5764_v0  ;;  %4907 = vmatprep.mubr.msk.bf16.mxu0 %vm5765_vm0, %v5764_v0 }
 0x92d   :  { %4898 = vmatpush3.bf16.msra.mxu1 %v6388_v33 }
 0x92e   :  { %4911 = vmatprep.subr.bf16.mxu1 %v5764_v0  ;;  %4906 = vmatpush3.bf16.msra.mxu0 %v6334_v18 }
 0x92f   :  { %4919 = vmatprep.subr.bf16.mxu0 %v5764_v0 }
 0x930   :  { %4900 = vmatmul.mubr.msk.bf16.vlgmr.msra.gmra.mrb[76].mxu1 %vm340_vm2, %v1834_v7 }
 0x931   :  { %4912 = vmatpush3.bf16.msra.mxu1 %v6363_v14  ;;  %4915 = vmatprep.mubr.msk.bf16.mxu1 %vm5765_vm0, %v5764_v0 }
 0x932   :  { %4913 = vmatprep.subr.bf16.mxu1 %v5764_v0 }
 0x935   :  { %4914 = vmatpush3.bf16.msra.mxu1 %v6369_v50  ;;  %v1831_v50 = vld [vmem:[#allocation3 + $0x40] sm:$0xff] }
 0x936   :  { %4927 = vmatprep.subr.bf16.mxu1 %v5764_v0 }
 0x9fb   :  { %v1872_v13 = vpop.f32.mrb[72].mxu1  ;;  %v1912_v8 = vpop.f32.mrb[84].mxu0 }
 0x9fc   :  { %v1873_v18 = vadd.f32 %v6425_v9, %v1872_v13  ;;  %v4885_v11 = vpop.f32.mrb[73].mxu1  ;;  %v4893_v19 = vpop.f32.mrb[85].mxu0  ;;  %v1913_v14 = vadd.f32 %v6195_v34, %v1912_v8 }
 0x9fd   :  { %v1875_v21 = vpop.f32.mrb[74].mxu1  ;;  %v1915_v22 = vpop.f32.mrb[86].mxu0 }
 0x9fe   :  { %v1958_v23 = vadd.f32 %v1873_v18, %v1829_v20  ;;  %v4886_v24 = vpop.f32.mrb[75].mxu1  ;;  %v4894_v25 = vpop.f32.mrb[87].mxu0  ;;  %v1965_v10 = vadd.f32 %v1913_v14, %v1831_v50  ;;  %v5464_v18 = vld [vmem:[#allocation18 + $0x2] ss:$0 sm:$0xff]  ;;  %v1984_v14 = vld [vmem:[#allocation4 + $0x48] sm:$0xff] }
 0xa00   :  { %v4297_v26 = vmul.f32 -1.442695, %v1958_v23  ;;  %v4298_v29 = vmul.f32 -1.442695, %v1965_v10  ;;  %v5252_v10 = vld [vmem:[#allocation21 + $0x20] sm:$0xff]  }
 0xa02   :  { %5356 = vpow2.f32 %v4297_v26 }
 0xa03   :  { %v1952_v27 = vpop.f32.mrb[76].mxu1  ;;  %5358 = vpow2.f32 %v4298_v29  ;;  %v5254_v29 = vld [vmem:[#allocation21 + $0x28] sm:$0xff]  }
 0xa04   :  { %v4901_v28 = vpop.f32.mrb[77].mxu1  ;;  %v1953_v37 = vadd.f32 %v6205_v53, %v1952_v27  ;;  %v5248_v53 = vld [vmem:[#allocation21] sm:$0xff]  }
 0xa05   :  { %v1955_v30 = vpop.f32.mrb[78].mxu1  ;;  %v5253_v27 = vld [vmem:[%s6783_s13] sm:$0xff]  }
 0xa06   :  { %v4902_v31 = vpop.f32.mrb[79].mxu1  ;;  %v5255_v30 = vld [vmem:[%s6783_s13 + $0x8] sm:$0xff]  }
 0xa07   :  { %v5256_v31 = vld [vmem:[#allocation20 + $0x8] sm:$0xff]  }
 0xa0c   :  { %v5357_v32 = vpop.eup %5356 }
 0xa0d   :  { %v1962_v12 = vadd.f32 1.0, %v5357_v32  ;;  %v5359_v35 = vpop.eup %5358  ;;  %v5257_v32 = vld [vmem:[#allocation20] sm:$0xff]  }
 0xa0e   :  { %v1969_v34 = vadd.f32 1.0, %v5359_v35  ;;  %v5264_v35 = vld [vmem:[#allocation20 + $0x10] sm:$0xff]  }
 0xa0f   :  { %5360 = vrcp.f32 %v1962_v12  ;;  %v5258_v12 = vld [vmem:[#allocation12] sm:$0xff]  }
 0xa10   :  { %5362 = vrcp.f32 %v1969_v34  ;;  %v5259_v34 = vld [vmem:[#allocation12 + $0x8] sm:$0xff]  }
 0xa19   :  { %v5361_v5 = vpop.eup %5360 }
 0xa1a   :  { %v1972_v36 = vmul.f32 %v5361_v5, %v1953_v37  ;;  %v5363_v39 = vpop.eup %5362  ;;  %v6482_v37 = vld [vmem:[#allocation23] sm:$0xff]   ;;  %v5261_v5 = vld [vmem:[#allocation12 + $0x10] sm:$0xff]  }
 0xa1b   :  { %v1975_v40 = vsub.f32 1.0, %v5363_v39  ;;  %v1977_v43 = vmul.f32 %v5363_v39, %v1827_v4  ;;  %v6502_v39 = vld [vmem:[#allocation23 + $0x20] sm:$0xff]  }
 0xa1c   :  { %v1973_v6 = vadd.f32 %v1972_v36, %v1833_v38  ;;  %v6488_v36 = vld [vmem:[#allocation23 + $0x8] sm:$0xff]   ;;  %v5262_v38 = vld [vmem:[#allocation12 + $0x18] sm:$0xff]  }
 0xa1e   :  { %5364 = vtanh.f32 %v1973_v6  ;;  %v6500_v6 = vld [vmem:[#allocation23 + $0x10] sm:$0xff]  }
 0xa28   :  { %v5365_v41 = vpop.eup %5364 }
 0xa29   :  { %v1976_v42 = vmul.f32 %v5365_v41, %v1975_v40  ;;  %v6508_v40 = vld [vmem:[#allocation23 + $0x18] sm:$0xff]   ;;  %v6515_v41 = vld [vmem:[#allocation23 + $0x28] sm:$0xff]  }
 0xa2b   :  { %v6430_v44 = vadd.f32 %v1977_v43, %v1976_v42 }
 0xa2d   :  { %v1985_v17 = vpack.c.bf16 %v6430_v44, %v6430_v44 }
 0xa2f   :  { %4908 = vmatmul.mubr.msk.bf16.vlgmr.msra.gmra.mrb[88].mxu0 %vm340_vm2, %v1985_v17  ;;  %4916 = vmatmul.mubr.msk.bf16.vlgmr.msra.gmra.mrb[80].mxu1 %vm340_vm2, %v1985_v17 }
 0xa30   :  { %4920 = vmatpush3.bf16.msra.mxu0 %v6378_v16  ;;  %4923 = vmatprep.mubr.msk.bf16.mxu0 %vm5765_vm0, %v5764_v0  ;;  %v5250_v16 = vld [vmem:[#allocation21 + $0x8] sm:$0xff]  }
 0xa31   :  { %4921 = vmatprep.subr.bf16.mxu0 %v5764_v0  ;;  %4931 = vmatprep.mubr.msk.bf16.mxu1 %vm5765_vm0, %v5764_v0 }
 0xa32   :  { %4928 = vmatpush3.bf16.msra.mxu1 %v5248_v53 }
 0xa33   :  { %4929 = vmatprep.subr.bf16.mxu1 %v5764_v0 }
 0xa34   :  { %4922 = vmatpush3.bf16.msra.mxu0 %v6388_v33 }
 0xa35   :  { %4935 = vmatprep.subr.bf16.mxu0 %v5764_v0 }
 0xa36   :  { %4930 = vmatpush3.bf16.msra.mxu1 %v5250_v16 }
 0xa37   :  { %4924 = vmatmul.mubr.msk.bf16.vlgmr.msra.gmra.mrb[92].mxu0 %vm340_vm2, %v1985_v17  ;;  %4943 = vmatprep.subr.bf16.mxu1 %v5764_v0 }
 0xa38   :  { %4939 = vmatprep.mubr.msk.bf16.mxu0 %vm5765_vm0, %v5764_v0  ;;  %4936 = vmatpush3.bf16.msra.mxu0 %v5249_v45 }
 0xa39   :  { %4937 = vmatprep.subr.bf16.mxu0 %v5764_v0 }
 0xa3c   :  { %4938 = vmatpush3.bf16.msra.mxu0 %v5251_v46 }
 0xa3d   :  { %4951 = vmatprep.subr.bf16.mxu0 %v5764_v0 }
 0xb02   :  { %v2023_v33 = vpop.f32.mrb[88].mxu0  ;;  %v2063_v47 = vpop.f32.mrb[80].mxu1 }
 0xb03   :  { %v2024_v48 = vadd.f32 %v6425_v9, %v2023_v33  ;;  %v4909_v49 = vpop.f32.mrb[89].mxu0  ;;  %v4917_v15 = vpop.f32.mrb[81].mxu1  ;;  %v2064_v52 = vadd.f32 %v5463_v3, %v2063_v47 }
 0xb04   :  { %v2026_v54 = vpop.f32.mrb[90].mxu0  ;;  %v2066_v55 = vpop.f32.mrb[82].mxu1 }
 0xb05   :  { %v2109_v56 = vadd.f32 %v2024_v48, %v1980_v51  ;;  %v4910_v57 = vpop.f32.mrb[91].mxu0  ;;  %v4918_v58 = vpop.f32.mrb[83].mxu1  ;;  %v2116_v61 = vadd.f32 %v2064_v52, %v1982_v60  ;;  %v4304_v54 = vld [vmem:[#allocation24] ss:$0 sm:$0xff]  ;;  %v4308_v55 = vld [vmem:[#allocation24 + $0x1] ss:$0 sm:$0xff] }
 0xb07   :  { %v4302_v59 = vmul.f32 -1.442695, %v2109_v56  ;;  %v4303_v1 = vmul.f32 -1.442695, %v2116_v61 }
 0xb09   :  { %5366 = vpow2.f32 %v4302_v59 }
 0xb0a   :  { %v2103_v62 = vpop.f32.mrb[92].mxu0  ;;  %5368 = vpow2.f32 %v4303_v1 }
 0xb0b   :  { %v4925_v63 = vpop.f32.mrb[93].mxu0  ;;  %v2104_v11 = vadd.f32 %v5464_v18, %v2103_v62 }
 0xb0c   :  { %v2106_v2 = vpop.f32.mrb[94].mxu0 }
 0xb0d   :  { %v4926_v4 = vpop.f32.mrb[95].mxu0 }
 0xb13   :  { %v5367_v7 = vpop.eup %5366 }
 0xb14   :  { %v2113_v13 = vadd.f32 1.0, %v5367_v7  ;;  %v5369_v8 = vpop.eup %5368 }
 0xb15   :  { %v2120_v9 = vadd.f32 1.0, %v5369_v8 }
 0xb16   :  { %5370 = vrcp.f32 %v2113_v13 }
 0xb17   :  { %5372 = vrcp.f32 %v2120_v9 }
 0xb20   :  { %v5371_v19 = vpop.eup %5370 }
 0xb21   :  { %v2123_v20 = vmul.f32 %v5371_v19, %v2104_v11  ;;  %v5373_v22 = vpop.eup %5372 }
 0xb22   :  { %v2126_v23 = vsub.f32 1.0, %v5373_v22  ;;  %v2128_v25 = vmul.f32 %v5373_v22, %v6430_v44 }
 0xb23   :  { %v2124_v21 = vadd.f32 %v2123_v20, %v1984_v14 }
 0xb25   :  { %5374 = vtanh.f32 %v2124_v21 }
 0xb2f   :  { %v5375_v24 = vpop.eup %5374 }
 0xb30   :  { %v2127_v26 = vmul.f32 %v5375_v24, %v2126_v23 }
 0xb32   :  { %v6453_v50 = vadd.f32 %v2128_v25, %v2127_v26 }
 0xb34   :  { %v6460_v28 = vpack.c.bf16 %v6453_v50, %v6453_v50 }
 0xb36   :  { %4932 = vmatmul.mubr.msk.bf16.vlgmr.msra.gmra.mrb[84].mxu1 %vm340_vm2, %v6460_v28  ;;  %4940 = vmatmul.mubr.msk.bf16.vlgmr.msra.gmra.mrb[96].mxu0 %vm340_vm2, %v6460_v28 }
 0xb37   :  { %4944 = vmatpush3.bf16.msra.mxu1 %v5252_v10  ;;  %4952 = vmatpush3.bf16.msra.mxu0 %v5253_v27 }
 0xb38   :  { %4945 = vmatprep.subr.bf16.mxu1 %v5764_v0  ;;  %4953 = vmatprep.subr.bf16.mxu0 %v5764_v0 }
 0xb39   :  { %4947 = vmatprep.mubr.msk.bf16.mxu1 %vm5765_vm0, %v5764_v0  ;;  %4955 = vmatprep.mubr.msk.bf16.mxu0 %vm5765_vm0, %v5764_v0 }
 0xb3b   :  { %4946 = vmatpush3.bf16.msra.mxu1 %v5254_v29  ;;  %4954 = vmatpush3.bf16.msra.mxu0 %v5255_v30 }
 0xb3c   :  { %4969 = vmatprep.subr.bf16.mxu0 %v5256_v31  ;;  %4959 = vmatprep.subr.bf16.mxu1 %v5257_v32 }
 0xb3e   :  { %4948 = vmatmul.mubr.msk.bf16.vlgmr.msra.gmra.mrb[88].mxu1 %vm340_vm2, %v6460_v28  ;;  %4956 = vmatmul.mubr.msk.bf16.vlgmr.msra.gmra.mrb[100].mxu0 %vm340_vm2, %v6460_v28 }
 0xb3f   :  { %4970 = vmatpush3.bf16.msra.mxu0 %v5256_v31  ;;  %4960 = vmatpush3.bf16.msra.mxu1 %v5257_v32  ;;  %v4312_v32 = vld [vmem:[#allocation24 + $0x2] ss:$0 sm:$0xff] }
 0xb40   :  { %4961 = vmatprep.mubr.msk.bf16.mxu1 %vm251_vm1, %v5258_v12  ;;  %4971 = vmatprep.mubr.msk.bf16.mxu0 %vm251_vm1, %v5258_v12 }
 0xb41   :  { %4989 = vmatprep.subr.bf16.mxu0 %v5764_v0  ;;  %4979 = vmatprep.subr.bf16.mxu1 %v5264_v35 }
 0xb46   :  { %4962 = vmatmul.mubr.msk.bf16.vlgmr.msra.gmra.mrb[92].mxu1 %vm251_vm1, %v5259_v34  ;;  %4972 = vmatmul.mubr.msk.bf16.vlgmr.msra.gmra.mrb[104].mxu0 %vm251_vm1, %v5259_v34 }
 0xb47   :  { %4990 = vmatpush3.bf16.msra.mxu0 %v6482_v37  ;;  %4965 = vmatprep.mubr.msk.bf16.mxu1 %vm251_vm1, %v5261_v5 }
 0xb48   :  { %4975 = vmatprep.mubr.msk.bf16.mxu0 %vm251_vm1, %v5261_v5  ;;  %4991 = vmatprep.subr.bf16.mxu0 %v5764_v0 }
 0xb49   :  { %4980 = vmatpush3.bf16.msra.mxu1 %v5264_v35 }
 0xb4a   :  { %5005 = vmatprep.subr.bf16.mxu1 %v5764_v0 }
 0xb4b   :  { %4992 = vmatpush3.bf16.msra.mxu0 %v6488_v36 }
 0xb4c   :  { %4997 = vmatprep.subr.bf16.mxu0 %v5764_v0 }
 0xb4e   :  { %4966 = vmatmul.mubr.msk.bf16.gmra.mrb[96].mxu1 %vm251_vm1, %v5262_v38  ;;  %4976 = vmatmul.mubr.msk.bf16.gmra.mrb[108].mxu0 %vm251_vm1, %v5262_v38 }
 0xb4f   :  { %4981 = vmatprep.mubr.msk.bf16.mxu1 %vm251_vm1, %v5258_v12  ;;  %4993 = vmatprep.mubr.msk.bf16.mxu0 %vm5765_vm0, %v5764_v0 }
 0xb56   :  { %4982 = vmatmul.mubr.msk.bf16.vlgmr.msra.gmra.mrb[100].mxu1 %vm251_vm1, %v5259_v34  ;;  %4994 = vmatmul.mubr.msk.bf16.vlgmr.msra.gmra.mrb[112].mxu0 %vm340_vm2, %v6460_v28  ;;  %v6559_v34 = vld [vmem:[#allocation26] ss:$0 sm:$0xff] }
 0xb57   :  { %4998 = vmatpush3.bf16.msra.mxu0 %v6500_v6  ;;  %4985 = vmatprep.mubr.msk.bf16.mxu1 %vm251_vm1, %v5261_v5 }
 0xb58   :  { %4999 = vmatprep.subr.bf16.mxu0 %v5764_v0  ;;  %5001 = vmatprep.mubr.msk.bf16.mxu0 %vm5765_vm0, %v5764_v0 }
 0xb59   :  { %5006 = vmatpush3.bf16.msra.mxu1 %v6502_v39 }
 0xb5a   :  { %5007 = vmatprep.subr.bf16.mxu1 %v5764_v0 }
 0xb5b   :  { %5000 = vmatpush3.bf16.msra.mxu0 %v6508_v40 }
 0xb5c   :  { %5013 = vmatprep.subr.bf16.mxu0 %v5764_v0 }
 0xb5d   :  { %5008 = vmatpush3.bf16.msra.mxu1 %v6515_v41 }
 0xb5e   :  { %4986 = vmatmul.mubr.msk.bf16.gmra.mrb[104].mxu1 %vm251_vm1, %v5262_v38  ;;  %5002 = vmatmul.mubr.msk.bf16.vlgmr.msra.gmra.mrb[116].mxu0 %vm340_vm2, %v6460_v28 }
 0xb5f   :  { %5009 = vmatprep.mubr.msk.bf16.mxu1 %vm5765_vm0, %v5764_v0  ;;  %5021 = vmatprep.subr.bf16.mxu1 %v5764_v0 }
 0xb60   :  { %5014 = vmatpush3.bf16.msra.mxu0 %v6482_v37  ;;  %5017 = vmatprep.mubr.msk.bf16.mxu0 %vm5765_vm0, %v5764_v0 }
 0xb61   :  { %5015 = vmatprep.subr.bf16.mxu0 %v5764_v0 }
 0xb64   :  { %5016 = vmatpush3.bf16.msra.mxu0 %v6488_v36 }
 0xb65   :  { %5029 = vmatprep.subr.bf16.mxu0 %v5764_v0 }
 0xb66   :  { %5010 = vmatmul.mubr.msk.bf16.vlgmr.msra.gmra.mrb[108].mxu1 %vm340_vm2, %v6460_v28 }
 0xb67   :  { %5022 = vmatpush3.bf16.msra.mxu1 %v6500_v6  ;;  %5025 = vmatprep.mubr.msk.bf16.mxu1 %vm5765_vm0, %v5764_v0 }
 0xb68   :  { %5023 = vmatprep.subr.bf16.mxu1 %v5764_v0 }
 0xb6b   :  { %5024 = vmatpush3.bf16.msra.mxu1 %v6508_v40 }
 0xb6c   :  { %5037 = vmatprep.subr.bf16.mxu1 %v5764_v0 }
 0xc09   :  { %v2191_v42 = vpop.f32.mrb[84].mxu1  ;;  %v2256_v43 = vpop.f32.mrb[96].mxu0 }
 0xc0a   :  { %v4933_v44 = vpop.f32.mrb[85].mxu1  ;;  %v4941_v17 = vpop.f32.mrb[97].mxu0  ;;  %v2192_v56 = vadd.f32 %v4304_v54, %v2191_v42  ;;  %v2257_v57 = vadd.f32 %v4308_v55, %v2256_v43  ;;  %v6566_v54 = vld [vmem:[#allocation26 + $0x1] ss:$0 sm:$0xff] }
 0xc0b   :  { %v2194_v53 = vpop.f32.mrb[86].mxu1  ;;  %v2259_v45 = vpop.f32.mrb[98].mxu0 }
 0xc0c   :  { %v4934_v16 = vpop.f32.mrb[87].mxu1  ;;  %v4942_v46 = vpop.f32.mrb[99].mxu0 }
 0xc11   :  { %v2321_v33 = vpop.f32.mrb[88].mxu1  ;;  %v6541_v47 = vpop.f32.mrb[100].mxu0 }
 0xc12   :  { %v4949_v48 = vpop.f32.mrb[89].mxu1  ;;  %v4957_v49 = vpop.f32.mrb[101].mxu0  ;;  %v2322_v5 = vadd.f32 %v4312_v32, %v2321_v33 }
 0xc13   :  { %v2324_v15 = vpop.f32.mrb[90].mxu1  ;;  %v2387_v51 = vpop.f32.mrb[102].mxu0 }
 0xc14   :  { %v4950_v3 = vpop.f32.mrb[91].mxu1  ;;  %v4958_v52 = vpop.f32.mrb[103].mxu0 }
 0xc19   :  { %v4963_v58 = vpop.f32.mrb[92].mxu1  ;;  %v4973_v59 = vpop.f32.mrb[104].mxu0 }
 0xc1a   :  { %v2505_v60 = vadd.f32 %v4963_v58, %v2192_v56  ;;  %v2595_v61 = vadd.f32 %v4973_v59, %v2257_v57  ;;  %v2472_v62 = vpop.f32.mrb[93].mxu1  ;;  %v2562_v63 = vpop.f32.mrb[105].mxu0 }
 0xc1b   :  { %v2503_v1 = vadd.f32 %v2472_v62, %v2192_v56  ;;  %v2593_v2 = vadd.f32 %v2562_v63, %v2257_v57  ;;  %v4964_v4 = vpop.f32.mrb[94].mxu1  ;;  %v4974_v7 = vpop.f32.mrb[106].mxu0 }
 0xc1c   :  { %2513 = vst.msk [vmem:[#allocation5 + $0x10] sm:$0xff] %vm340_vm2, %v2505_v60  ;;  %2603 = vst.msk [vmem:[#allocation6 + $0x10] sm:$0xff] %vm340_vm2, %v2595_v61  ;;  %v2506_v13 = vadd.f32 %v4964_v4, %v2192_v56  ;;  %v2596_v8 = vadd.f32 %v4974_v7, %v2257_v57  ;;  %v2475_v9 = vpop.f32.mrb[95].mxu1  ;;  %v2565_v18 = vpop.f32.mrb[107].mxu0 }
 0xc1d   :  { %2511 = vst.msk [vmem:[#allocation5] sm:$0xff] %vm340_vm2, %v2503_v1  ;;  %2601 = vst.msk [vmem:[#allocation6] sm:$0xff] %vm340_vm2, %v2593_v2  ;;  %v2504_v11 = vadd.f32 %v2475_v9, %v2192_v56  ;;  %v2594_v19 = vadd.f32 %v2565_v18, %v2257_v57 }
 0xc1e   :  { %2514 = vst.msk [vmem:[#allocation5 + $0x18] sm:$0xff] %vm340_vm2, %v2506_v13  ;;  %2604 = vst.msk [vmem:[#allocation6 + $0x18] sm:$0xff] %vm340_vm2, %v2596_v8 }
 0xc1f   :  { %2512 = vst.msk [vmem:[#allocation5 + $0x8] sm:$0xff] %vm340_vm2, %v2504_v11  ;;  %2602 = vst.msk [vmem:[#allocation6 + $0x8] sm:$0xff] %vm340_vm2, %v2594_v19 }
 0xc21   :  { %v4967_v20 = vpop.f32.mrb[96].mxu1  ;;  %v4977_v14 = vpop.f32.mrb[108].mxu0 }
 0xc22   :  { %v2509_v21 = vadd.f32 %v4967_v20, %v2192_v56  ;;  %v2599_v22 = vadd.f32 %v4977_v14, %v2257_v57  ;;  %v2488_v23 = vpop.f32.mrb[97].mxu1  ;;  %v2578_v24 = vpop.f32.mrb[109].mxu0 }
 0xc23   :  { %v2507_v25 = vadd.f32 %v2488_v23, %v2192_v56  ;;  %v2597_v26 = vadd.f32 %v2578_v24, %v2257_v57  ;;  %v4968_v10 = vpop.f32.mrb[98].mxu1  ;;  %v4978_v27 = vpop.f32.mrb[110].mxu0  ;;  %v6573_v23 = vld [vmem:[#allocation26 + $0x2] ss:$0 sm:$0xff] }
 0xc24   :  { %2517 = vst.msk [vmem:[#allocation5 + $0x30] sm:$0xff] %vm340_vm2, %v2509_v21  ;;  %2607 = vst.msk [vmem:[#allocation6 + $0x30] sm:$0xff] %vm340_vm2, %v2599_v22  ;;  %v2510_v28 = vadd.f32 %v4968_v10, %v2192_v56  ;;  %v2600_v29 = vadd.f32 %v4978_v27, %v2257_v57  ;;  %v2491_v30 = vpop.f32.mrb[99].mxu1  ;;  %v2581_v31 = vpop.f32.mrb[111].mxu0  ;;  %v2718_v45 = vld [vmem:[#allocation5] sm:$0xff] }
 0xc25   :  { %2515 = vst.msk [vmem:[#allocation5 + $0x20] sm:$0xff] %vm340_vm2, %v2507_v25  ;;  %2605 = vst.msk [vmem:[#allocation6 + $0x20] sm:$0xff] %vm340_vm2, %v2597_v26  ;;  %v2508_v12 = vadd.f32 %v2491_v30, %v2192_v56  ;;  %v2598_v35 = vadd.f32 %v2581_v31, %v2257_v57  ;;  %v2719_v61 = vld [vmem:[#allocation6] sm:$0xff] }
 0xc26   :  { %2518 = vst.msk [vmem:[#allocation5 + $0x38] sm:$0xff] %vm340_vm2, %v2510_v28  ;;  %2608 = vst.msk [vmem:[#allocation6 + $0x38] sm:$0xff] %vm340_vm2, %v2600_v29 }
 0xc27   :  { %2516 = vst.msk [vmem:[#allocation5 + $0x28] sm:$0xff] %vm340_vm2, %v2508_v12  ;;  %2606 = vst.msk [vmem:[#allocation6 + $0x28] sm:$0xff] %vm340_vm2, %v2598_v35 }
 0xc29   :  { %v4983_v38 = vpop.f32.mrb[100].mxu1  ;;  %v2773_v42 = vpop.f32.mrb[112].mxu0 }
 0xc2a   :  { %v2685_v43 = vadd.f32 %v4983_v38, %v2322_v5  ;;  %v2774_v44 = vadd.f32 %v6559_v34, %v2773_v42  ;;  %v2652_v17 = vpop.f32.mrb[101].mxu1  ;;  %v4995_v53 = vpop.f32.mrb[113].mxu0 }
 0xc2b   :  { %v2683_v16 = vadd.f32 %v2652_v17, %v2322_v5  ;;  %v4984_v46 = vpop.f32.mrb[102].mxu1  ;;  %v2776_v48 = vpop.f32.mrb[114].mxu0  ;;  %v2920_v17 = vld [vmem:[#allocation5 + $0x8] sm:$0xff] }
 0xc2c   :  { %2693 = vst.msk [vmem:[#allocation7 + $0x10] sm:$0xff] %vm340_vm2, %v2685_v43  ;;  %v2895_v49 = vadd.f32 %v2774_v44, %v2718_v45  ;;  %v2686_v15 = vadd.f32 %v4984_v46, %v2322_v5  ;;  %v2655_v51 = vpop.f32.mrb[103].mxu1  ;;  %v4996_v3 = vpop.f32.mrb[115].mxu0 }
 0xc2d   :  { %2691 = vst.msk [vmem:[#allocation7] sm:$0xff] %vm340_vm2, %v2683_v16  ;;  %v2684_v33 = vadd.f32 %v2655_v51, %v2322_v5  ;;  %v2922_v51 = vld [vmem:[#allocation6 + $0x8] sm:$0xff] }
 0xc2e   :  { %v4351_v52 = vmul.f32 -1.442695, %v2895_v49  ;;  %2694 = vst.msk [vmem:[#allocation7 + $0x18] sm:$0xff] %vm340_vm2, %v2686_v15 }
 0xc2f   :  { %2692 = vst.msk [vmem:[#allocation7 + $0x8] sm:$0xff] %vm340_vm2, %v2684_v33 }
 0xc30   :  { %5376 = vpow2.f32 %v4351_v52 }
 0xc31   :  { %v4987_v55 = vpop.f32.mrb[104].mxu1  ;;  %v2831_v56 = vpop.f32.mrb[116].mxu0 }
 0xc32   :  { %v2689_v57 = vadd.f32 %v4987_v55, %v2322_v5  ;;  %v2832_v58 = vadd.f32 %v6566_v54, %v2831_v56  ;;  %v2668_v59 = vpop.f32.mrb[105].mxu1  ;;  %v5003_v60 = vpop.f32.mrb[117].mxu0 }
 0xc33   :  { %v2687_v62 = vadd.f32 %v2668_v59, %v2322_v5  ;;  %v4988_v63 = vpop.f32.mrb[106].mxu1  ;;  %v2834_v1 = vpop.f32.mrb[118].mxu0 }
 0xc34   :  { %2697 = vst.msk [vmem:[#allocation7 + $0x30] sm:$0xff] %vm340_vm2, %v2689_v57  ;;  %v2902_v2 = vadd.f32 %v2832_v58, %v2719_v61  ;;  %v2690_v4 = vadd.f32 %v4988_v63, %v2322_v5  ;;  %v2671_v7 = vpop.f32.mrb[107].mxu1  ;;  %v5004_v13 = vpop.f32.mrb[119].mxu0  ;;  %v2720_v27 = vld [vmem:[#allocation7] sm:$0xff] }
 0xc35   :  { %2695 = vst.msk [vmem:[#allocation7 + $0x20] sm:$0xff] %vm340_vm2, %v2687_v62  ;;  %v2688_v8 = vadd.f32 %v2671_v7, %v2322_v5 }
 0xc36   :  { %v4352_v9 = vmul.f32 -1.442695, %v2902_v2  ;;  %2698 = vst.msk [vmem:[#allocation7 + $0x38] sm:$0xff] %vm340_vm2, %v2690_v4  ;;  %v2924_v2 = vld [vmem:[#allocation7 + $0x8] sm:$0xff] }
 0xc37   :  { %2696 = vst.msk [vmem:[#allocation7 + $0x28] sm:$0xff] %vm340_vm2, %v2688_v8 }
 0xc38   :  { %5378 = vpow2.f32 %v4352_v9 }
 0xc39   :  { %v2889_v18 = vpop.f32.mrb[108].mxu1 }
 0xc3a   :  { %v5377_v11 = vpop.eup %5376  ;;  %v5011_v19 = vpop.f32.mrb[109].mxu1  ;;  %v2890_v25 = vadd.f32 %v6573_v23, %v2889_v18 }
 0xc3b   :  { %v2899_v20 = vadd.f32 1.0, %v5377_v11  ;;  %v2892_v14 = vpop.f32.mrb[110].mxu1 }
 0xc3c   :  { %v5012_v21 = vpop.f32.mrb[111].mxu1 }
 0xc3d   :  { %5380 = vrcp.f32 %v2899_v20 }
 0xc42   :  { %v5379_v22 = vpop.eup %5378 }
 0xc43   :  { %v2906_v24 = vadd.f32 1.0, %v5379_v22 }
 0xc45   :  { %5382 = vrcp.f32 %v2906_v24 }
 0xc47   :  { %v5381_v26 = vpop.eup %5380 }
 0xc48   :  { %v2909_v10 = vmul.f32 %v5381_v26, %v2890_v25  ;;  %v3073_v25 = vld [vmem:[#allocation5 + $0x10] sm:$0xff] }
 0xc4a   :  { %v2910_v28 = vadd.f32 %v2909_v10, %v2720_v27 }
 0xc4c   :  { %5384 = vtanh.f32 %v2910_v28 }
 0xc4f   :  { %v5383_v29 = vpop.eup %5382 }
 0xc50   :  { %v2912_v30 = vsub.f32 1.0, %v5383_v29  ;;  %v2914_v12 = vmul.f32 %v5383_v29, %v6453_v50 }
 0xc56   :  { %v5385_v31 = vpop.eup %5384 }
 0xc57   :  { %v2913_v32 = vmul.f32 %v5385_v31, %v2912_v30 }
 0xc59   :  { %v2915_v35 = vadd.f32 %v2914_v12, %v2913_v32  ;;  %v3075_v32 = vld [vmem:[#allocation6 + $0x10] sm:$0xff] }
 0xc5b   :  { %v2916_v5 = vpack.c.bf16 %v2915_v35, %v2915_v35 }
 0xc5d   :  { %2918 = vst.msk [vmem:[#allocation8] sm:$0xf] %vm2917_vm3, %v2916_v5  ;;  %5018 = vmatmul.mubr.msk.bf16.vlgmr.msra.gmra.mrb[120].mxu0 %vm340_vm2, %v2916_v5  ;;  %5026 = vmatmul.mubr.msk.bf16.vlgmr.msra.gmra.mrb[112].mxu1 %vm340_vm2, %v2916_v5 }
 0xc5e   :  { %5030 = vmatpush3.bf16.msra.mxu0 %v6502_v39  ;;  %5033 = vmatprep.mubr.msk.bf16.mxu0 %vm5765_vm0, %v5764_v0 }
 0xc5f   :  { %5031 = vmatprep.subr.bf16.mxu0 %v5764_v0  ;;  %5038 = vmatpush3.bf16.msra.mxu1 %v6482_v37 }
 0xc60   :  { %5039 = vmatprep.subr.bf16.mxu1 %v5764_v0  ;;  %5041 = vmatprep.mubr.msk.bf16.mxu1 %vm5765_vm0, %v5764_v0 }
 0xc62   :  { %5032 = vmatpush3.bf16.msra.mxu0 %v6515_v41 }
 0xc63   :  { %5045 = vmatprep.subr.bf16.mxu0 %v5764_v0  ;;  %5040 = vmatpush3.bf16.msra.mxu1 %v6488_v36 }
 0xc64   :  { %5053 = vmatprep.subr.bf16.mxu1 %v5764_v0 }
 0xc65   :  { %5034 = vmatmul.mubr.msk.bf16.vlgmr.msra.gmra.mrb[124].mxu0 %vm340_vm2, %v2916_v5 }
 0xc66   :  { %5046 = vmatpush3.bf16.msra.mxu0 %v6500_v6  ;;  %5049 = vmatprep.mubr.msk.bf16.mxu0 %vm5765_vm0, %v5764_v0 }
 0xc67   :  { %5047 = vmatprep.subr.bf16.mxu0 %v5764_v0 }
 0xc6a   :  { %5048 = vmatpush3.bf16.msra.mxu0 %v6508_v40 }
 0xc6b   :  { %5061 = vmatprep.subr.bf16.mxu0 %v5764_v0 }
 0xd30   :  { %v2962_v50 = vpop.f32.mrb[120].mxu0  ;;  %v3002_v38 = vpop.f32.mrb[112].mxu1 }
 0xd31   :  { %v2963_v42 = vadd.f32 %v6559_v34, %v2962_v50  ;;  %v5019_v43 = vpop.f32.mrb[121].mxu0  ;;  %v5027_v44 = vpop.f32.mrb[113].mxu1  ;;  %v3003_v53 = vadd.f32 %v6566_v54, %v3002_v38 }
 0xd32   :  { %v2965_v45 = vpop.f32.mrb[122].mxu0  ;;  %v3005_v16 = vpop.f32.mrb[114].mxu1 }
 0xd33   :  { %v3048_v46 = vadd.f32 %v2963_v42, %v2920_v17  ;;  %v5020_v48 = vpop.f32.mrb[123].mxu0  ;;  %v5028_v49 = vpop.f32.mrb[115].mxu1  ;;  %v3055_v3 = vadd.f32 %v3003_v53, %v2922_v51 }
 0xd34   :  { %v3077_v48 = vld [vmem:[#allocation7 + $0x10] sm:$0xff] }
 0xd35   :  { %v4356_v15 = vmul.f32 -1.442695, %v3048_v46  ;;  %v4357_v55 = vmul.f32 -1.442695, %v3055_v3 }
 0xd37   :  { %5386 = vpow2.f32 %v4356_v15 }
 0xd38   :  { %v3042_v33 = vpop.f32.mrb[124].mxu0  ;;  %5388 = vpow2.f32 %v4357_v55 }
 0xd39   :  { %v5035_v52 = vpop.f32.mrb[125].mxu0  ;;  %v3043_v62 = vadd.f32 %v6573_v23, %v3042_v33 }
 0xd3a   :  { %v3045_v56 = vpop.f32.mrb[126].mxu0 }
 0xd3b   :  { %v5036_v57 = vpop.f32.mrb[127].mxu0 }
 0xd41   :  { %v5387_v58 = vpop.eup %5386 }
 0xd42   :  { %v3052_v59 = vadd.f32 1.0, %v5387_v58  ;;  %v5389_v60 = vpop.eup %5388 }
 0xd43   :  { %v3059_v61 = vadd.f32 1.0, %v5389_v60 }
 0xd44   :  { %5390 = vrcp.f32 %v3052_v59 }
 0xd45   :  { %5392 = vrcp.f32 %v3059_v61 }
 0xd4e   :  { %v5391_v63 = vpop.eup %5390 }
 0xd4f   :  { %v3062_v1 = vmul.f32 %v5391_v63, %v3043_v62  ;;  %v5393_v7 = vpop.eup %5392  ;;  %v3226_v62 = vld [vmem:[#allocation5 + $0x18] sm:$0xff] }
 0xd50   :  { %v3065_v13 = vsub.f32 1.0, %v5393_v7  ;;  %v3067_v18 = vmul.f32 %v5393_v7, %v2915_v35 }
 0xd51   :  { %v3063_v4 = vadd.f32 %v3062_v1, %v2924_v2 }
 0xd53   :  { %5394 = vtanh.f32 %v3063_v4 }
 0xd5d   :  { %v5395_v8 = vpop.eup %5394 }
 0xd5e   :  { %v3066_v9 = vmul.f32 %v5395_v8, %v3065_v13 }
 0xd60   :  { %v3068_v11 = vadd.f32 %v3067_v18, %v3066_v9  ;;  %v3228_v9 = vld [vmem:[#allocation6 + $0x18] sm:$0xff] }
 0xd62   :  { %v3069_v19 = vpack.c.bf16 %v3068_v11, %v3068_v11 }
 0xd64   :  { %3071 = vst.msk [vmem:[#allocation8 + $0x4] sm:$0xf] %vm2917_vm3, %v3069_v19  ;;  %5042 = vmatmul.mubr.msk.bf16.vlgmr.msra.gmra.mrb[116].mxu1 %vm340_vm2, %v3069_v19  ;;  %5050 = vmatmul.mubr.msk.bf16.vlgmr.msra.gmra.mrb[128].mxu0 %vm340_vm2, %v3069_v19 }
 0xd65   :  { %5054 = vmatpush3.bf16.msra.mxu1 %v6502_v39  ;;  %5057 = vmatprep.mubr.msk.bf16.mxu1 %vm5765_vm0, %v5764_v0 }
 0xd66   :  { %5055 = vmatprep.subr.bf16.mxu1 %v5764_v0  ;;  %5062 = vmatpush3.bf16.msra.mxu0 %v6482_v37 }
 0xd67   :  { %5063 = vmatprep.subr.bf16.mxu0 %v5764_v0  ;;  %5065 = vmatprep.mubr.msk.bf16.mxu0 %vm5765_vm0, %v5764_v0 }
 0xd69   :  { %5056 = vmatpush3.bf16.msra.mxu1 %v6515_v41 }
 0xd6a   :  { %5069 = vmatprep.subr.bf16.mxu1 %v5764_v0  ;;  %5064 = vmatpush3.bf16.msra.mxu0 %v6488_v36 }
 0xd6b   :  { %5077 = vmatprep.subr.bf16.mxu0 %v5764_v0 }
 0xd6c   :  { %5058 = vmatmul.mubr.msk.bf16.vlgmr.msra.gmra.mrb[120].mxu1 %vm340_vm2, %v3069_v19 }
 0xd6d   :  { %5070 = vmatpush3.bf16.msra.mxu1 %v6500_v6  ;;  %5073 = vmatprep.mubr.msk.bf16.mxu1 %vm5765_vm0, %v5764_v0 }
 0xd6e   :  { %5071 = vmatprep.subr.bf16.mxu1 %v5764_v0 }
 0xd71   :  { %5072 = vmatpush3.bf16.msra.mxu1 %v6508_v40 }
 0xd72   :  { %5085 = vmatprep.subr.bf16.mxu1 %v5764_v0 }
 0xe37   :  { %v3115_v20 = vpop.f32.mrb[116].mxu1  ;;  %v3155_v14 = vpop.f32.mrb[128].mxu0 }
 0xe38   :  { %v3116_v21 = vadd.f32 %v6559_v34, %v3115_v20  ;;  %v5043_v22 = vpop.f32.mrb[117].mxu1  ;;  %v5051_v24 = vpop.f32.mrb[129].mxu0  ;;  %v3156_v26 = vadd.f32 %v6566_v54, %v3155_v14 }
 0xe39   :  { %v3118_v10 = vpop.f32.mrb[118].mxu1  ;;  %v3158_v27 = vpop.f32.mrb[130].mxu0 }
 0xe3a   :  { %v3201_v28 = vadd.f32 %v3116_v21, %v3073_v25  ;;  %v5044_v29 = vpop.f32.mrb[119].mxu1  ;;  %v5052_v30 = vpop.f32.mrb[131].mxu0  ;;  %v3208_v12 = vadd.f32 %v3156_v26, %v3075_v32 }
 0xe3b   :  { %v3230_v29 = vld [vmem:[#allocation7 + $0x18] sm:$0xff] }
 0xe3c   :  { %v4361_v31 = vmul.f32 -1.442695, %v3201_v28  ;;  %v4362_v50 = vmul.f32 -1.442695, %v3208_v12 }
 0xe3e   :  { %5396 = vpow2.f32 %v4361_v31 }
 0xe3f   :  { %v3195_v35 = vpop.f32.mrb[120].mxu1  ;;  %5398 = vpow2.f32 %v4362_v50 }
 0xe40   :  { %v5059_v5 = vpop.f32.mrb[121].mxu1  ;;  %v3196_v45 = vadd.f32 %v6573_v23, %v3195_v35 }
 0xe41   :  { %v3198_v38 = vpop.f32.mrb[122].mxu1 }
 0xe42   :  { %v5060_v42 = vpop.f32.mrb[123].mxu1 }
 0xe48   :  { %v5397_v43 = vpop.eup %5396 }
 0xe49   :  { %v3205_v44 = vadd.f32 1.0, %v5397_v43  ;;  %v5399_v17 = vpop.eup %5398 }
 0xe4a   :  { %v3212_v53 = vadd.f32 1.0, %v5399_v17 }
 0xe4b   :  { %5400 = vrcp.f32 %v3205_v44 }
 0xe4c   :  { %5402 = vrcp.f32 %v3212_v53 }
 0xe55   :  { %v5401_v16 = vpop.eup %5400 }
 0xe56   :  { %v3215_v46 = vmul.f32 %v5401_v16, %v3196_v45  ;;  %v5403_v15 = vpop.eup %5402  ;;  %v3379_v45 = vld [vmem:[#allocation5 + $0x20] sm:$0xff] }
 0xe57   :  { %v3218_v51 = vsub.f32 1.0, %v5403_v15  ;;  %v3220_v52 = vmul.f32 %v5403_v15, %v3068_v11 }
 0xe58   :  { %v3216_v49 = vadd.f32 %v3215_v46, %v3077_v48 }
 0xe5a   :  { %5404 = vtanh.f32 %v3216_v49 }
 0xe64   :  { %v5405_v3 = vpop.eup %5404 }
 0xe65   :  { %v3219_v33 = vmul.f32 %v5405_v3, %v3218_v51 }
 0xe67   :  { %v3221_v55 = vadd.f32 %v3220_v52, %v3219_v33  ;;  %v3381_v33 = vld [vmem:[#allocation6 + $0x20] sm:$0xff] }
 0xe69   :  { %v3222_v56 = vpack.c.bf16 %v3221_v55, %v3221_v55 }
 0xe6b   :  { %3224 = vst.msk [vmem:[#allocation8 + $0x8] sm:$0xf] %vm2917_vm3, %v3222_v56  ;;  %5066 = vmatmul.mubr.msk.bf16.vlgmr.msra.gmra.mrb[132].mxu0 %vm340_vm2, %v3222_v56  ;;  %5074 = vmatmul.mubr.msk.bf16.vlgmr.msra.gmra.mrb[124].mxu1 %vm340_vm2, %v3222_v56 }
 0xe6c   :  { %5078 = vmatpush3.bf16.msra.mxu0 %v6502_v39  ;;  %5081 = vmatprep.mubr.msk.bf16.mxu0 %vm5765_vm0, %v5764_v0 }
 0xe6d   :  { %5079 = vmatprep.subr.bf16.mxu0 %v5764_v0  ;;  %5086 = vmatpush3.bf16.msra.mxu1 %v6482_v37 }
 0xe6e   :  { %5087 = vmatprep.subr.bf16.mxu1 %v5764_v0  ;;  %5089 = vmatprep.mubr.msk.bf16.mxu1 %vm5765_vm0, %v5764_v0 }
 0xe70   :  { %5080 = vmatpush3.bf16.msra.mxu0 %v6515_v41 }
 0xe71   :  { %5093 = vmatprep.subr.bf16.mxu0 %v5764_v0  ;;  %5088 = vmatpush3.bf16.msra.mxu1 %v6488_v36 }
 0xe72   :  { %5101 = vmatprep.subr.bf16.mxu1 %v5764_v0 }
 0xe73   :  { %5082 = vmatmul.mubr.msk.bf16.vlgmr.msra.gmra.mrb[136].mxu0 %vm340_vm2, %v3222_v56 }
 0xe74   :  { %5094 = vmatpush3.bf16.msra.mxu0 %v6500_v6  ;;  %5097 = vmatprep.mubr.msk.bf16.mxu0 %vm5765_vm0, %v5764_v0 }
 0xe75   :  { %5095 = vmatprep.subr.bf16.mxu0 %v5764_v0 }
 0xe78   :  { %5096 = vmatpush3.bf16.msra.mxu0 %v6508_v40 }
 0xe79   :  { %5109 = vmatprep.subr.bf16.mxu0 %v5764_v0 }
 0xf3e   :  { %v3268_v57 = vpop.f32.mrb[132].mxu0  ;;  %v3308_v58 = vpop.f32.mrb[124].mxu1 }
 0xf3f   :  { %v3269_v59 = vadd.f32 %v6559_v34, %v3268_v57  ;;  %v5067_v60 = vpop.f32.mrb[133].mxu0  ;;  %v5075_v61 = vpop.f32.mrb[125].mxu1  ;;  %v3309_v63 = vadd.f32 %v6566_v54, %v3308_v58 }
 0xf40   :  { %v3271_v1 = vpop.f32.mrb[134].mxu0  ;;  %v3311_v2 = vpop.f32.mrb[126].mxu1 }
 0xf41   :  { %v3354_v4 = vadd.f32 %v3269_v59, %v3226_v62  ;;  %v5068_v7 = vpop.f32.mrb[135].mxu0  ;;  %v5076_v13 = vpop.f32.mrb[127].mxu1  ;;  %v3361_v18 = vadd.f32 %v3309_v63, %v3228_v9 }
 0xf42   :  { %v3383_v7 = vld [vmem:[#allocation7 + $0x20] sm:$0xff] }
 0xf43   :  { %v4366_v8 = vmul.f32 -1.442695, %v3354_v4  ;;  %v4367_v20 = vmul.f32 -1.442695, %v3361_v18 }
 0xf45   :  { %5406 = vpow2.f32 %v4366_v8 }
 0xf46   :  { %v3348_v11 = vpop.f32.mrb[136].mxu0  ;;  %5408 = vpow2.f32 %v4367_v20 }
 0xf47   :  { %v5083_v19 = vpop.f32.mrb[137].mxu0  ;;  %v3349_v10 = vadd.f32 %v6573_v23, %v3348_v11 }
 0xf48   :  { %v3351_v14 = vpop.f32.mrb[138].mxu0 }
 0xf49   :  { %v5084_v21 = vpop.f32.mrb[139].mxu0 }
 0xf4f   :  { %v5407_v22 = vpop.eup %5406 }
 0xf50   :  { %v3358_v24 = vadd.f32 1.0, %v5407_v22  ;;  %v5409_v25 = vpop.eup %5408 }
 0xf51   :  { %v3365_v26 = vadd.f32 1.0, %v5409_v25 }
 0xf52   :  { %5410 = vrcp.f32 %v3358_v24 }
 0xf53   :  { %5412 = vrcp.f32 %v3365_v26 }
 0xf5c   :  { %v5411_v27 = vpop.eup %5410 }
 0xf5d   :  { %v3368_v28 = vmul.f32 %v5411_v27, %v3349_v10  ;;  %v5413_v31 = vpop.eup %5412  ;;  %v3532_v10 = vld [vmem:[#allocation5 + $0x28] sm:$0xff] }
 0xf5e   :  { %v3371_v32 = vsub.f32 1.0, %v5413_v31  ;;  %v3373_v5 = vmul.f32 %v5413_v31, %v3221_v55 }
 0xf5f   :  { %v3369_v30 = vadd.f32 %v3368_v28, %v3230_v29 }
 0xf61   :  { %5414 = vtanh.f32 %v3369_v30 }
 0xf6b   :  { %v5415_v12 = vpop.eup %5414 }
 0xf6c   :  { %v3372_v35 = vmul.f32 %v5415_v12, %v3371_v32 }
 0xf6e   :  { %v3374_v50 = vadd.f32 %v3373_v5, %v3372_v35  ;;  %v3534_v35 = vld [vmem:[#allocation6 + $0x28] sm:$0xff] }
 0xf70   :  { %v3375_v38 = vpack.c.bf16 %v3374_v50, %v3374_v50 }
 0xf72   :  { %3377 = vst.msk [vmem:[#allocation8 + $0xc] sm:$0xf] %vm2917_vm3, %v3375_v38  ;;  %5090 = vmatmul.mubr.msk.bf16.vlgmr.msra.gmra.mrb[128].mxu1 %vm340_vm2, %v3375_v38  ;;  %5098 = vmatmul.mubr.msk.bf16.vlgmr.msra.gmra.mrb[140].mxu0 %vm340_vm2, %v3375_v38 }
 0xf73   :  { %5102 = vmatpush3.bf16.msra.mxu1 %v6502_v39  ;;  %5105 = vmatprep.mubr.msk.bf16.mxu1 %vm5765_vm0, %v5764_v0 }
 0xf74   :  { %5103 = vmatprep.subr.bf16.mxu1 %v5764_v0  ;;  %5110 = vmatpush3.bf16.msra.mxu0 %v6482_v37 }
 0xf75   :  { %5111 = vmatprep.subr.bf16.mxu0 %v5764_v0  ;;  %5113 = vmatprep.mubr.msk.bf16.mxu0 %vm5765_vm0, %v5764_v0 }
 0xf77   :  { %5104 = vmatpush3.bf16.msra.mxu1 %v6515_v41 }
 0xf78   :  { %5117 = vmatprep.subr.bf16.mxu1 %v5764_v0  ;;  %5112 = vmatpush3.bf16.msra.mxu0 %v6488_v36 }
 0xf79   :  { %5125 = vmatprep.subr.bf16.mxu0 %v5764_v0 }
 0xf7a   :  { %5106 = vmatmul.mubr.msk.bf16.vlgmr.msra.gmra.mrb[132].mxu1 %vm340_vm2, %v3375_v38 }
 0xf7b   :  { %5118 = vmatpush3.bf16.msra.mxu1 %v6500_v6  ;;  %5121 = vmatprep.mubr.msk.bf16.mxu1 %vm5765_vm0, %v5764_v0 }
 0xf7c   :  { %5119 = vmatprep.subr.bf16.mxu1 %v5764_v0 }
 0xf7f   :  { %5120 = vmatpush3.bf16.msra.mxu1 %v6508_v40 }
 0xf80   :  { %5133 = vmatprep.subr.bf16.mxu1 %v5764_v0 }
0x1045   :  { %v3421_v42 = vpop.f32.mrb[128].mxu1  ;;  %v3461_v43 = vpop.f32.mrb[140].mxu0 }
0x1046   :  { %v3422_v44 = vadd.f32 %v6559_v34, %v3421_v42  ;;  %v5091_v17 = vpop.f32.mrb[129].mxu1  ;;  %v5099_v53 = vpop.f32.mrb[141].mxu0  ;;  %v3462_v16 = vadd.f32 %v6566_v54, %v3461_v43 }
0x1047   :  { %v3424_v46 = vpop.f32.mrb[130].mxu1  ;;  %v3464_v48 = vpop.f32.mrb[142].mxu0 }
0x1048   :  { %v3507_v49 = vadd.f32 %v3422_v44, %v3379_v45  ;;  %v5092_v15 = vpop.f32.mrb[131].mxu1  ;;  %v5100_v51 = vpop.f32.mrb[143].mxu0  ;;  %v3514_v52 = vadd.f32 %v3462_v16, %v3381_v33 }
0x1049   :  { %v3536_v15 = vld [vmem:[#allocation7 + $0x28] sm:$0xff] }
0x104a   :  { %v4371_v3 = vmul.f32 -1.442695, %v3507_v49  ;;  %v4372_v57 = vmul.f32 -1.442695, %v3514_v52 }
0x104c   :  { %5416 = vpow2.f32 %v4371_v3 }
0x104d   :  { %v3501_v55 = vpop.f32.mrb[132].mxu1  ;;  %5418 = vpow2.f32 %v4372_v57 }
0x104e   :  { %v5107_v56 = vpop.f32.mrb[133].mxu1  ;;  %v3502_v1 = vadd.f32 %v6573_v23, %v3501_v55 }
0x104f   :  { %v3504_v58 = vpop.f32.mrb[134].mxu1 }
0x1050   :  { %v5108_v59 = vpop.f32.mrb[135].mxu1 }
0x1056   :  { %v5417_v60 = vpop.eup %5416 }
0x1057   :  { %v3511_v61 = vadd.f32 1.0, %v5417_v60  ;;  %v5419_v62 = vpop.eup %5418 }
0x1058   :  { %v3518_v63 = vadd.f32 1.0, %v5419_v62 }
0x1059   :  { %5420 = vrcp.f32 %v3511_v61  ;;  %v3685_v61 = vld [vmem:[#allocation5 + $0x30] sm:$0xff] }
0x105a   :  { %5422 = vrcp.f32 %v3518_v63 }
0x1063   :  { %v5421_v2 = vpop.eup %5420 }
0x1064   :  { %v3521_v4 = vmul.f32 %v5421_v2, %v3502_v1  ;;  %v5423_v8 = vpop.eup %5422 }
0x1065   :  { %v3524_v9 = vsub.f32 1.0, %v5423_v8  ;;  %v3526_v19 = vmul.f32 %v5423_v8, %v3374_v50 }
0x1066   :  { %v3522_v13 = vadd.f32 %v3521_v4, %v3383_v7  ;;  %v3687_v7 = vld [vmem:[#allocation6 + $0x30] sm:$0xff] }
0x1068   :  { %5424 = vtanh.f32 %v3522_v13 }
0x1072   :  { %v5425_v18 = vpop.eup %5424 }
0x1073   :  { %v3525_v11 = vmul.f32 %v5425_v18, %v3524_v9 }
0x1075   :  { %v3527_v20 = vadd.f32 %v3526_v19, %v3525_v11 }
0x1077   :  { %v3528_v14 = vpack.c.bf16 %v3527_v20, %v3527_v20 }
0x1079   :  { %3530 = vst.msk [vmem:[#allocation8 + $0x10] sm:$0xf] %vm2917_vm3, %v3528_v14  ;;  %5114 = vmatmul.mubr.msk.bf16.vlgmr.msra.gmra.mrb[144].mxu0 %vm340_vm2, %v3528_v14  ;;  %5122 = vmatmul.mubr.msk.bf16.vlgmr.msra.gmra.mrb[136].mxu1 %vm340_vm2, %v3528_v14 }
0x107a   :  { %5126 = vmatpush3.bf16.msra.mxu0 %v6502_v39  ;;  %5129 = vmatprep.mubr.msk.bf16.mxu0 %vm5765_vm0, %v5764_v0 }
0x107b   :  { %5127 = vmatprep.subr.bf16.mxu0 %v5764_v0  ;;  %5134 = vmatpush3.bf16.msra.mxu1 %v6482_v37 }
0x107c   :  { %5135 = vmatprep.subr.bf16.mxu1 %v5764_v0  ;;  %5137 = vmatprep.mubr.msk.bf16.mxu1 %vm5765_vm0, %v5764_v0 }
0x107e   :  { %5128 = vmatpush3.bf16.msra.mxu0 %v6515_v41 }
0x107f   :  { %5141 = vmatprep.subr.bf16.mxu0 %v5764_v0  ;;  %5136 = vmatpush3.bf16.msra.mxu1 %v6488_v36 }
0x1080   :  { %5149 = vmatprep.subr.bf16.mxu1 %v5764_v0 }
0x1081   :  { %5130 = vmatmul.mubr.msk.bf16.vlgmr.msra.gmra.mrb[148].mxu0 %vm340_vm2, %v3528_v14 }
0x1082   :  { %5142 = vmatpush3.bf16.msra.mxu0 %v6500_v6  ;;  %5145 = vmatprep.mubr.msk.bf16.mxu0 %vm5765_vm0, %v5764_v0 }
0x1083   :  { %5143 = vmatprep.subr.bf16.mxu0 %v5764_v0 }
0x1086   :  { %5144 = vmatpush3.bf16.msra.mxu0 %v6508_v40 }
0x1087   :  { %5157 = vmatprep.subr.bf16.mxu0 %v5764_v0 }
0x114c   :  { %v3574_v21 = vpop.f32.mrb[144].mxu0  ;;  %v3614_v22 = vpop.f32.mrb[136].mxu1 }
0x114d   :  { %v3575_v24 = vadd.f32 %v6559_v34, %v3574_v21  ;;  %v5115_v25 = vpop.f32.mrb[145].mxu0  ;;  %v5123_v26 = vpop.f32.mrb[137].mxu1  ;;  %v3615_v27 = vadd.f32 %v6566_v54, %v3614_v22 }
0x114e   :  { %v3577_v28 = vpop.f32.mrb[146].mxu0  ;;  %v3617_v29 = vpop.f32.mrb[138].mxu1 }
0x114f   :  { %v3660_v30 = vadd.f32 %v3575_v24, %v3532_v10  ;;  %v5116_v31 = vpop.f32.mrb[147].mxu0  ;;  %v5124_v32 = vpop.f32.mrb[139].mxu1  ;;  %v3667_v5 = vadd.f32 %v3615_v27, %v3534_v35  ;;  %v3689_v10 = vld [vmem:[#allocation7 + $0x30] sm:$0xff] }
0x1151   :  { %v4376_v12 = vmul.f32 -1.442695, %v3660_v30  ;;  %v4377_v42 = vmul.f32 -1.442695, %v3667_v5  ;;  %v5271_v5 = vld [vmem:[%s6782_s12 + $0x8] sm:$0xff]  }
0x1153   :  { %5426 = vpow2.f32 %v4376_v12 }
0x1154   :  { %v3654_v50 = vpop.f32.mrb[148].mxu0  ;;  %5428 = vpow2.f32 %v4377_v42  ;;  %v5466_v42 = vld [vmem:[#allocation23 + $0x28] sm:$0xff]  }
0x1155   :  { %v5131_v38 = vpop.f32.mrb[149].mxu0  ;;  %v3655_v46 = vadd.f32 %v6573_v23, %v3654_v50  ;;  %v5270_v50 = vld [vmem:[#allocation8] sm:$0xff]  }
0x1156   :  { %v3657_v43 = vpop.f32.mrb[150].mxu0  ;;  %v5465_v38 = vld [vmem:[#allocation23 + $0x20] sm:$0xff]  }
0x1157   :  { %v5132_v44 = vpop.f32.mrb[151].mxu0  ;;  %v5272_v43 = vld [vmem:[#allocation8 + $0x8] sm:$0xff]  }
0x115d   :  { %v5427_v17 = vpop.eup %5426 }
0x115e   :  { %v3664_v53 = vadd.f32 1.0, %v5427_v17  ;;  %v5429_v45 = vpop.eup %5428  ;;  %v5274_v17 = vld [vmem:[%s6781_s11] sm:$0xff]  }
0x115f   :  { %v3671_v16 = vadd.f32 1.0, %v5429_v45 }
0x1160   :  { %5430 = vrcp.f32 %v3664_v53 }
0x1161   :  { %5432 = vrcp.f32 %v3671_v16 }
0x116a   :  { %v5431_v48 = vpop.eup %5430 }
0x116b   :  { %v3674_v49 = vmul.f32 %v5431_v48, %v3655_v46  ;;  %v5433_v3 = vpop.eup %5432  ;;  %v3838_v48 = vld [vmem:[#allocation5 + $0x38] sm:$0xff] }
0x116c   :  { %v3677_v33 = vsub.f32 1.0, %v5433_v3  ;;  %v3679_v56 = vmul.f32 %v5433_v3, %v3527_v20 }
0x116d   :  { %v3675_v51 = vadd.f32 %v3674_v49, %v3536_v15 }
0x116f   :  { %5434 = vtanh.f32 %v3675_v51 }
0x1179   :  { %v5435_v52 = vpop.eup %5434 }
0x117a   :  { %v3678_v55 = vmul.f32 %v5435_v52, %v3677_v33 }
0x117c   :  { %v3680_v57 = vadd.f32 %v3679_v56, %v3678_v55  ;;  %v3840_v56 = vld [vmem:[#allocation6 + $0x38] sm:$0xff] }
0x117e   :  { %v3681_v58 = vpack.c.bf16 %v3680_v57, %v3680_v57 }
0x1180   :  { %3683 = vst.msk [vmem:[#allocation8 + $0x14] sm:$0xf] %vm2917_vm3, %v3681_v58  ;;  %5138 = vmatmul.mubr.msk.bf16.vlgmr.msra.gmra.mrb[140].mxu1 %vm340_vm2, %v3681_v58  ;;  %5146 = vmatmul.mubr.msk.bf16.vlgmr.msra.gmra.mrb[152].mxu0 %vm340_vm2, %v3681_v58 }
0x1181   :  { %5150 = vmatpush3.bf16.msra.mxu1 %v6502_v39  ;;  %5153 = vmatprep.mubr.msk.bf16.mxu1 %vm5765_vm0, %v5764_v0 }
0x1182   :  { %5151 = vmatprep.subr.bf16.mxu1 %v5764_v0  ;;  %5158 = vmatpush3.bf16.msra.mxu0 %v6482_v37  ;;  %v5269_v37 = vld [vmem:[%s6782_s12] sm:$0xff]  }
0x1183   :  { %5159 = vmatprep.subr.bf16.mxu0 %v5764_v0  ;;  %5161 = vmatprep.mubr.msk.bf16.mxu0 %vm5765_vm0, %v5764_v0 }
0x1185   :  { %5152 = vmatpush3.bf16.msra.mxu1 %v6515_v41 }
0x1186   :  { %5165 = vmatprep.subr.bf16.mxu1 %v5764_v0  ;;  %5160 = vmatpush3.bf16.msra.mxu0 %v6488_v36 }
0x1187   :  { %5173 = vmatprep.subr.bf16.mxu0 %v5764_v0  ;;  %v5273_v44 = vld [vmem:[#allocation8 + $0x10] sm:$0xff]  }
0x1188   :  { %5154 = vmatmul.mubr.msk.bf16.vlgmr.msra.gmra.mrb[144].mxu1 %vm340_vm2, %v3681_v58 }
0x1189   :  { %5166 = vmatpush3.bf16.msra.mxu1 %v6500_v6  ;;  %5169 = vmatprep.mubr.msk.bf16.mxu1 %vm5765_vm0, %v5764_v0 }
0x118a   :  { %5167 = vmatprep.subr.bf16.mxu1 %v5764_v0 }
0x118d   :  { %5168 = vmatpush3.bf16.msra.mxu1 %v6508_v40 }
0x118e   :  { %5181 = vmatprep.subr.bf16.mxu1 %v5269_v37 }
0x1253   :  { %v3727_v39 = vpop.f32.mrb[140].mxu1  ;;  %v3767_v36 = vpop.f32.mrb[152].mxu0 }
0x1254   :  { %v3728_v41 = vadd.f32 %v6559_v34, %v3727_v39  ;;  %v5139_v59 = vpop.f32.mrb[141].mxu1  ;;  %v5147_v60 = vpop.f32.mrb[153].mxu0  ;;  %v3768_v6 = vadd.f32 %v6566_v54, %v3767_v36 }
0x1255   :  { %v3730_v62 = vpop.f32.mrb[142].mxu1  ;;  %v3770_v63 = vpop.f32.mrb[154].mxu0 }
0x1256   :  { %v3813_v1 = vadd.f32 %v3728_v41, %v3685_v61  ;;  %v5140_v2 = vpop.f32.mrb[143].mxu1  ;;  %v5148_v4 = vpop.f32.mrb[155].mxu0  ;;  %v3820_v13 = vadd.f32 %v3768_v6, %v3687_v7  ;;  %v3842_v63 = vld [vmem:[#allocation7 + $0x38] sm:$0xff] }
0x1258   :  { %v4381_v40 = vmul.f32 -1.442695, %v3813_v1  ;;  %v4382_v18 = vmul.f32 -1.442695, %v3820_v13 }
0x125a   :  { %5436 = vpow2.f32 %v4381_v40 }
0x125b   :  { %v3807_v8 = vpop.f32.mrb[144].mxu1  ;;  %5438 = vpow2.f32 %v4382_v18 }
0x125c   :  { %v5155_v9 = vpop.f32.mrb[145].mxu1  ;;  %v3808_v24 = vadd.f32 %v6573_v23, %v3807_v8 }
0x125d   :  { %v3810_v11 = vpop.f32.mrb[146].mxu1 }
0x125e   :  { %v5156_v19 = vpop.f32.mrb[147].mxu1  ;;  %v5467_v11 = vld [vmem:[#allocation12] sm:$0xff]  }
0x125f   :  { %v5469_v19 = vld [vmem:[#allocation12 + $0x10] sm:$0xff]  }
0x1264   :  { %v5437_v20 = vpop.eup %5436 }
0x1265   :  { %v3817_v14 = vadd.f32 1.0, %v5437_v20  ;;  %v5439_v21 = vpop.eup %5438  ;;  %v5470_v20 = vld [vmem:[#allocation12 + $0x18] sm:$0xff]  }
0x1266   :  { %v3824_v22 = vadd.f32 1.0, %v5439_v21 }
0x1267   :  { %5440 = vrcp.f32 %v3817_v14  ;;  %v4316_v14 = vld [vmem:[%s6784_s14] ss:$0 sm:$0xff]  ;;  %s5713_s14 = scalar_lea.vmem %s4206_s22, 1024 }
0x1268   :  { %5442 = vrcp.f32 %v3824_v22  ;;  %v2385_v21 = vadd.f32 %v4316_v14, %v6541_v47  ;;  %p5714_p4 = scmp.ne.s32.totalorder %s4206_s22, %s5713_s14  ;;  %p5719_p6 = scmp.lt.s32.totalorder %s5713_s14, %s5713_s14 }
0x126a   :  { %p5720_p7 = por %p5719_p6, %p5718_p5 }
0x126c   :  { %p5721_p8 = pnand %p5720_p7, %p5714_p4 }
0x1271   :  { %v5441_v25 = vpop.eup %5440 }
0x1272   :  { %v3827_v26 = vmul.f32 %v5441_v25, %v3808_v24  ;;  %v5443_v28 = vpop.eup %5442 }
0x1273   :  { %v3830_v29 = vsub.f32 1.0, %v5443_v28  ;;  %v3832_v32 = vmul.f32 %v5443_v28, %v3680_v57 }
0x1274   :  { %v3828_v27 = vadd.f32 %v3827_v26, %v3689_v10 }
0x1276   :  { %5444 = vtanh.f32 %v3828_v27 }
0x1280   :  { %v5445_v30 = vpop.eup %5444 }
0x1281   :  { %v3831_v31 = vmul.f32 %v5445_v30, %v3830_v29 }
0x1283   :  { %v3833_v12 = vadd.f32 %v3832_v32, %v3831_v31 }
0x1285   :  { %v3834_v35 = vpack.c.bf16 %v3833_v12, %v3833_v12 }
0x1287   :  { %3836 = vst.msk [vmem:[#allocation8 + $0x18] sm:$0xf] %vm2917_vm3, %v3834_v35  ;;  %5162 = vmatmul.mubr.msk.bf16.vlgmr.msra.gmra.mrb[156].mxu0 %vm340_vm2, %v3834_v35  ;;  %5170 = vmatmul.mubr.msk.bf16.vlgmr.msra.gmra.mrb[148].mxu1 %vm340_vm2, %v3834_v35 }
0x1288   :  { %5174 = vmatpush3.bf16.msra.mxu0 %v5465_v38  ;;  %5182 = vmatpush3.bf16.msra.mxu1 %v5269_v37 }
0x1289   :  { %5185 = vmatprep.mubr.msk.bf16.mxu1 %vm340_vm2, %v5270_v50  ;;  %5175 = vmatprep.subr.bf16.mxu0 %v5764_v0 }
0x128a   :  { %5183 = vmatprep.subr.bf16.mxu1 %v5271_v5  ;;  %5177 = vmatprep.mubr.msk.bf16.mxu0 %vm5765_vm0, %v5764_v0 }
0x128c   :  { %5176 = vmatpush3.bf16.msra.mxu0 %v5466_v42  ;;  %5184 = vmatpush3.bf16.msra.mxu1 %v5271_v5 }
0x128d   :  { %5193 = vmatprep.subr.bf16.mxu1 %v5274_v17 }
0x128f   :  { %5178 = vmatmul.mubr.msk.bf16.vlgmr.msra.gmra.mrb[160].mxu0 %vm340_vm2, %v3834_v35  ;;  %5186 = vmatmul.mubr.msk.bf16.vlgmr.msra.gmra.mrb[152].mxu1 %vm340_vm2, %v5272_v43 }
0x1290   :  { %5189 = vmatprep.mubr.msk.bf16.mxu1 %vm340_vm2, %v5273_v44  ;;  %5194 = vmatpush3.bf16.msra.mxu1 %v5274_v17 }
0x135a   :  { %v3880_v53 = vpop.f32.mrb[156].mxu0  ;;  %v3920_v45 = vpop.f32.mrb[148].mxu1 }
0x135b   :  { %v3881_v0 = vadd.f32 %v6559_v34, %v3880_v53  ;;  %v5163_v16 = vpop.f32.mrb[157].mxu0  ;;  %v5171_v46 = vpop.f32.mrb[149].mxu1  ;;  %v3921_v49 = vadd.f32 %v6566_v54, %v3920_v45 }
0x135c   :  { %v3883_v15 = vpop.f32.mrb[158].mxu0  ;;  %v3923_v51 = vpop.f32.mrb[150].mxu1 }
0x135d   :  { %v3966_v3 = vadd.f32 %v3881_v0, %v3838_v48  ;;  %v5164_v33 = vpop.f32.mrb[159].mxu0  ;;  %v5172_v52 = vpop.f32.mrb[151].mxu1  ;;  %v3973_v57 = vadd.f32 %v3921_v49, %v3840_v56 }
0x135f   :  { %v4386_v55 = vmul.f32 -1.442695, %v3966_v3  ;;  %v4387_v39 = vmul.f32 -1.442695, %v3973_v57 }
0x1361   :  { %5446 = vpow2.f32 %v4386_v55 }
0x1362   :  { %v3960_v58 = vpop.f32.mrb[160].mxu0  ;;  %5448 = vpow2.f32 %v4387_v39 }
0x1363   :  { %v5179_v37 = vpop.f32.mrb[161].mxu0  ;;  %v3961_v61 = vadd.f32 %v6573_v23, %v3960_v58  ;;  %v5468_v23 = vld [vmem:[#allocation12 + $0x8] sm:$0xff]  }
0x1364   :  { %v3963_v36 = vpop.f32.mrb[162].mxu0 }
0x1365   :  { %v5180_v41 = vpop.f32.mrb[163].mxu0 }
0x136b   :  { %v5447_v34 = vpop.eup %5446 }
0x136c   :  { %v3970_v59 = vadd.f32 1.0, %v5447_v34  ;;  %v5449_v60 = vpop.eup %5448 }
0x136d   :  { %v3977_v54 = vadd.f32 1.0, %v5449_v60 }
0x136e   :  { %5450 = vrcp.f32 %v3970_v59 }
0x136f   :  { %5452 = vrcp.f32 %v3977_v54 }
0x1378   :  { %v5451_v6 = vpop.eup %5450 }
0x1379   :  { %v3980_v62 = vmul.f32 %v5451_v6, %v3961_v61  ;;  %v5453_v2 = vpop.eup %5452 }
0x137a   :  { %v3983_v4 = vsub.f32 1.0, %v5453_v2  ;;  %v3985_v7 = vmul.f32 %v5453_v2, %v3833_v12 }
0x137b   :  { %v3981_v1 = vadd.f32 %v3980_v62, %v3842_v63 }
0x137d   :  { %5454 = vtanh.f32 %v3981_v1 }
0x1387   :  { %v5455_v40 = vpop.eup %5454 }
0x1388   :  { %v3984_v13 = vmul.f32 %v5455_v40, %v3983_v4 }
0x138a   :  { %v3986_v8 = vadd.f32 %v3985_v7, %v3984_v13 }
0x138c   :  { %v3987_v9 = vpack.c.bf16 %v3986_v8, %v3986_v8 }
0x138e   :  { %3989 = vst.msk [vmem:[#allocation8 + $0x1c] sm:$0xf] %vm2917_vm3, %v3987_v9 }
0x1395   :  { %v5275_v18 = vld [vmem:[#allocation8 + $0x18] sm:$0xff]  }
0x1396   :  { %5190 = vmatmul.mubr.msk.bf16.gmra.mrb[156].mxu1 %vm340_vm2, %v5275_v18 }
0x1397   :  { %5195 = vmatprep.mubr.msk.bf16.mxu1 %vm251_vm1, %v5467_v11 }
0x139e   :  { %5196 = vmatmul.mubr.msk.bf16.vlgmr.msra.gmra.mrb[152].mxu1 %vm251_vm1, %v5468_v23 }
0x139f   :  { %5199 = vmatprep.mubr.msk.bf16.mxu1 %vm251_vm1, %v5469_v19 }
0x13a6   :  { %5200 = vmatmul.mubr.msk.bf16.gmra.mrb[156].mxu1 %vm251_vm1, %v5470_v20 }
0x1471   :  { %v5197_v22 = vpop.f32.mrb[152].mxu1 }
0x1472   :  { %v4186_v24 = vadd.f32 %v5197_v22, %v2385_v21  ;;  %v4153_v25 = vpop.f32.mrb[153].mxu1 }
0x1473   :  { %v4184_v26 = vadd.f32 %v4153_v25, %v2385_v21  ;;  %v5198_v10 = vpop.f32.mrb[154].mxu1 }
0x1474   :  { %4194 = vst [vmem:[#allocation27 + $0x10] sm:$0xff] %v4186_v24  ;;  %v4187_v27 = vadd.f32 %v5198_v10, %v2385_v21  ;;  %v4156_v28 = vpop.f32.mrb[155].mxu1 }
0x1475   :  { %4192 = vst [vmem:[#allocation27] sm:$0xff] %v4184_v26  ;;  %v4185_v29 = vadd.f32 %v4156_v28, %v2385_v21 }
0x1476   :  { %4195 = vst [vmem:[#allocation27 + $0x18] sm:$0xff] %v4187_v27 }
0x1477   :  { %4193 = vst [vmem:[#allocation27 + $0x8] sm:$0xff] %v4185_v29 }
0x1479   :  { %v5201_v30 = vpop.f32.mrb[156].mxu1 }
0x147a   :  { %v4190_v31 = vadd.f32 %v5201_v30, %v2385_v21  ;;  %v4169_v32 = vpop.f32.mrb[157].mxu1 }
0x147b   :  { %v4188_v12 = vadd.f32 %v4169_v32, %v2385_v21  ;;  %v5202_v35 = vpop.f32.mrb[158].mxu1 }
0x147c   :  { %4198 = vst [vmem:[#allocation27 + $0x30] sm:$0xff] %v4190_v31  ;;  %v4191_v47 = vadd.f32 %v5202_v35, %v2385_v21  ;;  %v4172_v5 = vpop.f32.mrb[159].mxu1 }
0x147d   :  { %4196 = vst [vmem:[#allocation27 + $0x20] sm:$0xff] %v4188_v12  ;;  %v4189_v50 = vadd.f32 %v4172_v5, %v2385_v21 }
0x147e   :  { %4199 = vst [vmem:[#allocation27 + $0x38] sm:$0xff] %v4191_v47 }
0x147f   :  { %4197 = vst [vmem:[#allocation27 + $0x28] sm:$0xff] %v4189_v50 }
0x1480   :  { %5724 = shalt.err (!%p5721_p8)
}
0x1481   :  { %s5725_s27 = scalar_lea.hbm %s6785_s15, 1024 }
0x1482   :  { %p5726_p9 = scmp.ne.s32.totalorder %s6785_s15, %s5725_s27  ;;  %p5729_p10 = scmp.lt.u32.totalorder %s5725_s27, %s6785_s15 }
0x1484   :  { %p5731_p11 = pnand %p5729_p10, %p5726_p9 }
0x1486   :  { %5734 = shalt.err (!%p5731_p11)
}
0x1487   :  { %s5768_s20 = smov 128   ;;  %s5769_s4 = smov 8  }
0x1488   :  { %4211 = dma.vmem_to_hbm [thread:$0]  %s4206_s22, 1024, %s6785_s15, [#allocation11], %s5768_s20, %s5768_s20, %s5769_s4  }
0x1489   :  { %5747 = dma.done.wait [#allocation11], 1024  }
0x148a   :  { %5748 = vsyncadd [#allocation11], 4294966272 }
0x148b   :  { %4215 = vsyncpa [#allocation10], 1 }
0x148c   :  { %4216 = vsyncpa [#allocation13], 1 }
0x148d   :  { %4217 = vsyncpa [#allocation16], 1 }
0x148e   :  { %4218 = vsyncpa [#allocation19], 1 }
0x148f   :  { %4219 = vsyncpa [#allocation22], 1 }
0x1490   :  { %4220 = vsyncpa [#allocation25], 1 }
0x1491   :  { %4221 = vsyncpa [#allocation11], 1 }

</bundles_post_ra>
